<compile_context>
chip_gen: v7x
topology: tpu7x:2x2x1
jax: 0.10.0
libtpu: 0.0.40
codegen_flags: <defaults>
</compile_context>

<pallas_src>
import functools

import jax
import jax.numpy as jnp
from jax.experimental import pallas as pl
from jax.experimental.pallas import tpu as pltpu


def _round_up(x, m):
    return (x + m - 1) // m * m


# ----------------------------- Pallas kernels ------------------------------

def _affine_act_kernel(x_ref, s_ref, b_ref, o_ref, *, relu):
    """y = [relu](x * scale + shift) -- per-channel affine (folded BatchNorm)."""
    y = x_ref[...].astype(jnp.float32) * s_ref[...] + b_ref[...]
    if relu:
        y = jnp.maximum(y, 0.0)
    o_ref[...] = y.astype(o_ref.dtype)


def _conv3x3_acc(ph_ref, w_ref, starts, l):
    """Implicit-GEMM accumulation of the 9 kernel taps on the MXU (f32 accumulator)."""
    cout = w_ref.shape[2]
    acc = jnp.zeros((l, cout), jnp.float32)
    for t, st in enumerate(starts):
        a = ph_ref[0, st:st + l, :]          # (l, cin) bf16, contiguous static strip
        acc = acc + jnp.dot(a, w_ref[t], preferred_element_type=jnp.float32)
    return acc


def _conv3x3_kernel(ph_ref, w_ref, s_ref, b_ref, o_ref, *, starts, l, relu):
    out = _conv3x3_acc(ph_ref, w_ref, starts, l) * s_ref[...] + b_ref[...]
    if relu:
        out = jnp.maximum(out, 0.0)
    o_ref[0, :, :] = out.astype(o_ref.dtype)


def _conv3x3_res_kernel(ph_ref, w_ref, s_ref, b_ref, r_ref, o_ref, *, starts, l, relu):
    out = _conv3x3_acc(ph_ref, w_ref, starts, l) * s_ref[...] + b_ref[...]
    if relu:
        out = jnp.maximum(out, 0.0)
    out = out + r_ref[0, :, :].astype(jnp.float32)        # fused skip-connection add
    o_ref[0, :, :] = out.astype(o_ref.dtype)


def _mm_bias_kernel(a_ref, w_ref, b_ref, o_ref):
    acc = jnp.dot(a_ref[...], w_ref[...], preferred_element_type=jnp.float32)
    o_ref[...] = (acc + b_ref[...]).astype(o_ref.dtype)


# ----------------------------- Pallas wrappers ------------------------------

def _bn_scale_shift(bn, eps=1e-5):
    scale = bn["gamma"] / jnp.sqrt(bn["var"] + eps)
    shift = bn["beta"] - bn["mean"] * scale
    return scale.astype(jnp.float32), shift.astype(jnp.float32)


def affine_act(x_nhwc, scale, shift, relu=True, out_dtype=jnp.bfloat16):
    """Fused per-channel affine (+ReLU) over NHWC; emits bf16 operands for the MXU."""
    n, h, w, c = x_nhwc.shape
    m = n * h * w
    tm = min(_round_up(m, 8), 512)
    mp = _round_up(m, tm)
    x2 = x_nhwc.reshape(m, c)
    if mp != m:
        x2 = jnp.pad(x2, ((0, mp - m), (0, 0)))
    out = pl.pallas_call(
        functools.partial(_affine_act_kernel, relu=relu),
        out_shape=jax.ShapeDtypeStruct((mp, c), out_dtype),
        grid=(mp // tm,),
        in_specs=[pl.BlockSpec((tm, c), lambda i: (i, 0)),
                  pl.BlockSpec((1, c), lambda i: (0, 0)),
                  pl.BlockSpec((1, c), lambda i: (0, 0))],
        out_specs=pl.BlockSpec((tm, c), lambda i: (i, 0)),
        compiler_params=pltpu.CompilerParams(dimension_semantics=("parallel",)),
    )(x2, scale.reshape(1, c).astype(jnp.float32),
      shift.reshape(1, c).astype(jnp.float32))
    return out[:m].reshape(n, h, w, c)


def conv3x3_fused(a_bf16, w_oihw, stride, scale=None, shift=None, relu=False,
                  residual=None, out_dtype=jnp.float32):
    """3x3 conv (padding=1, bias=False) as an implicit-GEMM Pallas kernel.

    Fuses a per-output-channel affine (the BatchNorm that follows the conv), an
    optional ReLU and an optional residual add into the epilogue.  `a_bf16` is the
    already-activated NHWC bf16 input.
    """
    n, h, w, cin = a_bf16.shape
    cout = w_oihw.shape[0]
    ho = (h - 1) // stride + 1
    wo = (w - 1) // stride + 1

    # Zero-pad the *activated* input (exactly like torch's conv padding), then lay it
    # out as stride-phase planes with flattened rows, so that every kernel tap is one
    # contiguous (l, cin) strip -- no im2col patch tensor in HBM.
    ap = jnp.pad(a_bf16, ((0, 0), (1, 1), (1, 1), (0, 0)))
    hp, wp = h + 2, w + 2
    if stride == 1:
        hh, wh = hp, wp
        ph = ap.reshape(n, hp * wp, cin)
    else:
        hpe, wpe = _round_up(hp, stride), _round_up(wp, stride)
        if (hpe, wpe) != (hp, wp):
            ap = jnp.pad(ap, ((0, 0), (0, hpe - hp), (0, wpe - wp), (0, 0)))
        hh, wh = hpe // stride, wpe // stride
        ph = ap.reshape(n, hh, stride, wh, stride, cin)
        ph = ph.transpose(0, 2, 4, 1, 3, 5).reshape(n, stride * stride * hh * wh, cin)

    l = (ho - 1) * wh + wo
    starts = tuple(((i % stride) * stride + (j % stride)) * hh * wh
                   + (i // stride) * wh + (j // stride)
                   for i in range(3) for j in range(3))

    wt = jnp.transpose(w_oihw, (2, 3, 1, 0)).reshape(9, cin, cout).astype(jnp.bfloat16)
    if scale is None:
        scale = jnp.ones((cout,), jnp.float32)
    if shift is None:
        shift = jnp.zeros((cout,), jnp.float32)

    flat = ph.shape[1]
    in_specs = [pl.BlockSpec((1, flat, cin), lambda b: (b, 0, 0)),
                pl.BlockSpec((9, cin, cout), lambda b: (0, 0, 0)),
                pl.BlockSpec((1, cout), lambda b: (0, 0)),
                pl.BlockSpec((1, cout), lambda b: (0, 0))]
    args = [ph, wt, scale.reshape(1, cout).astype(jnp.float32),
            shift.reshape(1, cout).astype(jnp.float32)]
    if residual is not None:
        # Bring the residual into the same row-flattened layout as the kernel output.
        res = residual.astype(jnp.float32)
        res = jnp.pad(res, ((0, 0), (0, 0), (0, wh - wo), (0, 0)))
        res = res.reshape(n, ho * wh, cout)[:, :l, :]
        in_specs.append(pl.BlockSpec((1, l, cout), lambda b: (b, 0, 0)))
        args.append(res)
        kern = functools.partial(_conv3x3_res_kernel, starts=starts, l=l, relu=relu)
    else:
        kern = functools.partial(_conv3x3_kernel, starts=starts, l=l, relu=relu)

    out = pl.pallas_call(
        kern,
        out_shape=jax.ShapeDtypeStruct((n, l, cout), out_dtype),
        grid=(n,),
        in_specs=in_specs,
        out_specs=pl.BlockSpec((1, l, cout), lambda b: (b, 0, 0)),
        compiler_params=pltpu.CompilerParams(dimension_semantics=("parallel",)),
    )(*args)

    # Drop the (wh - wo) junk columns that kept the kernel's GEMM rows contiguous.
    out = jnp.pad(out, ((0, 0), (0, ho * wh - l), (0, 0)))
    return out.reshape(n, ho, wh, cout)[:, :, :wo, :]


def downsample_1x1(x_nhwc, w_oihw, bn, stride, eps=1e-5):
    """Shortcut branch: BatchNorm -> _Identity -> 1x1 strided conv (bias=False).

    The activation-free BatchNorm is folded into the conv weights/bias, so the whole
    branch is one bf16 matmul + bias Pallas kernel on the stride-decimated input.
    """
    n, h, w, cin = x_nhwc.shape
    cout = w_oihw.shape[0]
    scale, shift = _bn_scale_shift(bn, eps)
    w2d = w_oihw.reshape(cout, cin)
    w_fold = (w2d * scale[None, :]).T.astype(jnp.bfloat16)          # (cin, cout)
    b_fold = (w2d @ shift).reshape(1, cout).astype(jnp.float32)     # (1, cout)

    xs = x_nhwc[:, ::stride, ::stride, :]
    ho, wo = xs.shape[1], xs.shape[2]
    m = n * ho * wo
    tm = min(_round_up(m, 8), 256)
    mp = _round_up(m, tm)
    a = xs.reshape(m, cin).astype(jnp.bfloat16)
    if mp != m:
        a = jnp.pad(a, ((0, mp - m), (0, 0)))
    out = pl.pallas_call(
        _mm_bias_kernel,
        out_shape=jax.ShapeDtypeStruct((mp, cout), jnp.float32),
        grid=(mp // tm,),
        in_specs=[pl.BlockSpec((tm, cin), lambda i: (i, 0)),
                  pl.BlockSpec((cin, cout), lambda i: (0, 0)),
                  pl.BlockSpec((1, cout), lambda i: (0, 0))],
        out_specs=pl.BlockSpec((tm, cout), lambda i: (i, 0)),
        compiler_params=pltpu.CompilerParams(dimension_semantics=("parallel",)),
    )(a, w_fold, b_fold)
    return out[:m].reshape(n, ho, wo, cout)


# ----------------------------- Block forward ------------------------------

def preactivation_block_forward(params, x_nchw, *, stride, downsample, eps=1e-5):
    """PreActivationBlock.forward -- NCHW float32 in / NCHW float32 out."""
    x = jnp.transpose(x_nchw, (0, 2, 3, 1)).astype(jnp.float32)     # NHWC

    if downsample:
        residual = downsample_1x1(x, params["ds_w"], params["ds_bn"], stride, eps)
    else:
        residual = x

    s1, t1 = _bn_scale_shift(params["bn1"], eps)
    a1 = affine_act(x, s1, t1, relu=True)                           # bn1 + relu (bf16)

    s2, t2 = _bn_scale_shift(params["bn2"], eps)
    a2 = conv3x3_fused(a1, params["w1"], stride, scale=s2, shift=t2, relu=True,
                       out_dtype=jnp.bfloat16)                      # conv1 + bn2 + relu

    out = conv3x3_fused(a2, params["w2"], 1, relu=False, residual=residual,
                        out_dtype=jnp.float32)                      # conv2 + residual

    return jnp.transpose(out, (0, 3, 1, 2))                         # back to NCHW


# ----------------------------- Reference & init ------------------------------

def _ref_block(params, x_nchw, *, stride, downsample, eps=1e-5):
    """Pure-JAX f32 reference of PreActivationBlock.forward (eval-mode BatchNorm)."""
    x = x_nchw.astype(jnp.float32)

    def bn(v, p):
        s = p["gamma"] / jnp.sqrt(p["var"] + eps)
        t = p["beta"] - p["mean"] * s
        return v * s[None, :, None, None] + t[None, :, None, None]

    def conv(v, w, st, pad):
        return jax.lax.conv_general_dilated(
            v, w, (st, st), [(pad, pad), (pad, pad)],
            dimension_numbers=("NCHW", "OIHW", "NCHW"),
            precision=jax.lax.Precision.HIGHEST)

    residual = conv(bn(x, params["ds_bn"]), params["ds_w"], stride, 0) if downsample else x
    out = jax.nn.relu(bn(x, params["bn1"]))
    out = conv(out, params["w1"], stride, 1)
    out = jax.nn.relu(bn(out, params["bn2"]))
    out = conv(out, params["w2"], 1, 1)
    return out + residual


def _conv_w(key, cout, cin, k):
    fan_in = cin * k * k
    return jax.random.normal(key, (cout, cin, k, k), jnp.float32) * (2.0 / fan_in) ** 0.5


def _bn_params(key, c):
    k1, k2, k3, k4 = jax.random.split(key, 4)
    return dict(
        gamma=1.0 + 0.1 * jax.random.normal(k1, (c,), jnp.float32),
        beta=0.1 * jax.random.normal(k2, (c,), jnp.float32),
        mean=0.1 * jax.random.normal(k3, (c,), jnp.float32),
        var=1.0 + 0.1 * jnp.abs(jax.random.normal(k4, (c,), jnp.float32)),
    )


def init_block_params(key, cin, cout, downsample):
    keys = jax.random.split(key, 6)
    p = dict(
        w1=_conv_w(keys[0], cout, cin, 3),
        bn1=_bn_params(keys[1], cin),
        w2=_conv_w(keys[2], cout, cout, 3),
        bn2=_bn_params(keys[3], cout),
    )
    if downsample:
        p["ds_w"] = _conv_w(keys[4], cout, cin, 1)
        p["ds_bn"] = _bn_params(keys[5], cin)
    return p


# ----------------------------- Main ------------------------------

if __name__ == "__main__":
    key = jax.random.PRNGKey(0)
    kp1, kp2, kx = jax.random.split(key, 3)

    # Strided block with the 1x1 downsample shortcut: 64 -> 128 channels, stride 2.
    cin, cout, stride = 64, 128, 2
    x = jax.random.normal(kx, (2, cin, 16, 16), jnp.float32)
    p1 = init_block_params(kp1, cin, cout, downsample=True)
    fwd1 = jax.jit(functools.partial(preactivation_block_forward,
                                     stride=stride, downsample=True))
    out1 = jax.block_until_ready(fwd1(p1, x))
    assert out1.shape == (2, cout, 8, 8), out1.shape
    ref1 = _ref_block(p1, x, stride=stride, downsample=True)
    err1 = float(jnp.max(jnp.abs(out1 - ref1)))
    tol1 = 5e-2 * (float(jnp.max(jnp.abs(ref1))) + 1e-6)
    assert err1 <= tol1, (err1, tol1)

    # Identity-shortcut block: 64 -> 64 channels, stride 1.
    p2 = init_block_params(kp2, cin, cin, downsample=False)
    fwd2 = jax.jit(functools.partial(preactivation_block_forward,
                                     stride=1, downsample=False))
    out2 = jax.block_until_ready(fwd2(p2, x))
    assert out2.shape == (2, cin, 16, 16), out2.shape
    ref2 = _ref_block(p2, x, stride=1, downsample=False)
    err2 = float(jnp.max(jnp.abs(out2 - ref2)))
    tol2 = 5e-2 * (float(jnp.max(jnp.abs(ref2))) + 1e-6)
    assert err2 <= tol2, (err2, tol2)

    assert bool(jnp.all(jnp.isfinite(out1))) and bool(jnp.all(jnp.isfinite(out2)))
    print("KERNEL_OK")
</pallas_src>

<mosaic_0001>
module attributes {stable_mosaic.version = 11 : i64} {
  func.func @_affine_act_kernel(%arg0: i32, %arg1: memref<512x64xf32, #tpu.memory_space<vmem>>, %arg2: memref<1x64xf32, #tpu.memory_space<vmem>>, %arg3: memref<1x64xf32, #tpu.memory_space<vmem>>, %arg4: memref<512x64xbf16, #tpu.memory_space<vmem>>) attributes {dimension_semantics = [#tpu.dimension_semantics<parallel>], iteration_bounds = array<i64: 1>, scalar_prefetch = 0 : i64, scratch_operands = 0 : i64, tpu.core_type = #tpu.core_type<tc>, window_params = [{transform_indices = @transform_0, window_bounds = array<i64: 512, 64>}, {pipeline_mode = #tpu.pipeline_mode<synchronous>, transform_indices = @transform_1, window_bounds = array<i64: 1, 64>}, {pipeline_mode = #tpu.pipeline_mode<synchronous>, transform_indices = @transform_2, window_bounds = array<i64: 1, 64>}, {transform_indices = @transform_3, window_bounds = array<i64: 512, 64>}]} {
    %c0 = arith.constant 0 : index
    %c0_0 = arith.constant 0 : index
    %0 = vector.load %arg1[%c0, %c0_0] : memref<512x64xf32, #tpu.memory_space<vmem>>, vector<512x64xf32>
    %c0_1 = arith.constant 0 : index
    %c0_2 = arith.constant 0 : index
    %1 = vector.load %arg2[%c0_1, %c0_2] : memref<1x64xf32, #tpu.memory_space<vmem>>, vector<1x64xf32>
    %2 = vector.broadcast %1 : vector<1x64xf32> to vector<512x64xf32>
    %3 = arith.mulf %0, %2 : vector<512x64xf32>
    %c0_3 = arith.constant 0 : index
    %c0_4 = arith.constant 0 : index
    %4 = vector.load %arg3[%c0_3, %c0_4] : memref<1x64xf32, #tpu.memory_space<vmem>>, vector<1x64xf32>
    %5 = vector.broadcast %4 : vector<1x64xf32> to vector<512x64xf32>
    %6 = arith.addf %3, %5 : vector<512x64xf32>
    %cst = arith.constant 0.000000e+00 : f32
    %7 = vector.broadcast %cst : f32 to vector<512x64xf32>
    %8 = arith.maximumf %6, %7 : vector<512x64xf32>
    %9 = arith.truncf %8 : vector<512x64xf32> to vector<512x64xbf16>
    %c0_5 = arith.constant 0 : index
    %c0_6 = arith.constant 0 : index
    %10 = vector.load %arg4[%c0_5, %c0_6] : memref<512x64xbf16, #tpu.memory_space<vmem>>, vector<512x64xbf16>
    tpu.vector_store %arg4[%c0_5, %c0_6], %9 {strides = array<i32>} : memref<512x64xbf16, #tpu.memory_space<vmem>>, vector<512x64xbf16>,
    return
  }
  func.func @transform_0(%arg0: i32) -> (i32, i32) {
    %c0_i32 = arith.constant 0 : i32
    %c0_i32_0 = arith.constant 0 : i32
    return %arg0, %c0_i32 : i32, i32
  }
  func.func @transform_1(%arg0: i32) -> (i32, i32) {
    %c0_i32 = arith.constant 0 : i32
    %c0_i32_0 = arith.constant 0 : i32
    %c0_i32_1 = arith.constant 0 : i32
    return %c0_i32, %c0_i32_0 : i32, i32
  }
  func.func @transform_2(%arg0: i32) -> (i32, i32) {
    %c0_i32 = arith.constant 0 : i32
    %c0_i32_0 = arith.constant 0 : i32
    %c0_i32_1 = arith.constant 0 : i32
    return %c0_i32, %c0_i32_0 : i32, i32
  }
  func.func @transform_3(%arg0: i32) -> (i32, i32) {
    %c0_i32 = arith.constant 0 : i32
    %c0_i32_0 = arith.constant 0 : i32
    return %arg0, %c0_i32 : i32, i32
  }
}

module attributes {stable_mosaic.version = 11 : i64} {
  func.func @_conv3x3_kernel(%arg0: i32, %arg1: memref<1x324x64xbf16, #tpu.memory_space<vmem>>, %arg2: memref<9x64x128xbf16, #tpu.memory_space<vmem>>, %arg3: memref<1x128xf32, #tpu.memory_space<vmem>>, %arg4: memref<1x128xf32, #tpu.memory_space<vmem>>, %arg5: memref<1x71x128xbf16, #tpu.memory_space<vmem>>) attributes {dimension_semantics = [#tpu.dimension_semantics<parallel>], iteration_bounds = array<i64: 2>, scalar_prefetch = 0 : i64, scratch_operands = 0 : i64, tpu.core_type = #tpu.core_type<tc>, window_params = [{transform_indices = @transform_0, window_bounds = array<i64: 1, 324, 64>}, {pipeline_mode = #tpu.pipeline_mode<synchronous>, transform_indices = @transform_1, window_bounds = array<i64: 9, 64, 128>}, {pipeline_mode = #tpu.pipeline_mode<synchronous>, transform_indices = @transform_2, window_bounds = array<i64: 1, 128>}, {pipeline_mode = #tpu.pipeline_mode<synchronous>, transform_indices = @transform_3, window_bounds = array<i64: 1, 128>}, {transform_indices = @transform_4, window_bounds = array<i64: 1, 71, 128>}]} {
    %cst = arith.constant 0.000000e+00 : f32
    %0 = vector.broadcast %cst : f32 to vector<71x128xf32>
    %c0 = arith.constant 0 : index
    %c0_0 = arith.constant 0 : index
    %c0_1 = arith.constant 0 : index
    %1 = vector.load %arg1[%c0, %c0_0, %c0_1] : memref<1x324x64xbf16, #tpu.memory_space<vmem>>, vector<1x71x64xbf16>
    %2 = vector.shape_cast %1 : vector<1x71x64xbf16> to vector<71x64xbf16>
    %c0_2 = arith.constant 0 : index
    %c0_3 = arith.constant 0 : index
    %c0_4 = arith.constant 0 : index
    %3 = vector.load %arg2[%c0_2, %c0_3, %c0_4] : memref<9x64x128xbf16, #tpu.memory_space<vmem>>, vector<1x64x128xbf16>
    %4 = vector.shape_cast %3 : vector<1x64x128xbf16> to vector<64x128xbf16>
    %cst_5 = arith.constant dense<0.000000e+00> : vector<71x128xf32>
    %5 = tpu.matmul %2, %4, %cst_5 {dimension_numbers = #tpu.dot_dimension_numbers<[1], [0], [0], [1], [0, 0, 1, 1], [], []>} : vector<71x64xbf16>, vector<64x128xbf16>, vector<71x128xf32> -> vector<71x128xf32>
    %6 = arith.addf %0, %5 : vector<71x128xf32>
    %c0_6 = arith.constant 0 : index
    %c81 = arith.constant 81 : index
    %c0_7 = arith.constant 0 : index
    %7 = vector.load %arg1[%c0_6, %c81, %c0_7] : memref<1x324x64xbf16, #tpu.memory_space<vmem>>, vector<1x71x64xbf16>
    %8 = vector.shape_cast %7 : vector<1x71x64xbf16> to vector<71x64xbf16>
    %c1 = arith.constant 1 : index
    %c0_8 = arith.constant 0 : index
    %c0_9 = arith.constant 0 : index
    %9 = vector.load %arg2[%c1, %c0_8, %c0_9] : memref<9x64x128xbf16, #tpu.memory_space<vmem>>, vector<1x64x128xbf16>
    %10 = vector.shape_cast %9 : vector<1x64x128xbf16> to vector<64x128xbf16>
    %cst_10 = arith.constant dense<0.000000e+00> : vector<71x128xf32>
    %11 = tpu.matmul %8, %10, %cst_10 {dimension_numbers = #tpu.dot_dimension_numbers<[1], [0], [0], [1], [0, 0, 1, 1], [], []>} : vector<71x64xbf16>, vector<64x128xbf16>, vector<71x128xf32> -> vector<71x128xf32>
    %12 = arith.addf %6, %11 : vector<71x128xf32>
    %c0_11 = arith.constant 0 : index
    %c1_12 = arith.constant 1 : index
    %c0_13 = arith.constant 0 : index
    %13 = vector.load %arg1[%c0_11, %c1_12, %c0_13] : memref<1x324x64xbf16, #tpu.memory_space<vmem>>, vector<1x71x64xbf16>
    %14 = vector.shape_cast %13 : vector<1x71x64xbf16> to vector<71x64xbf16>
    %c2 = arith.constant 2 : index
    %c0_14 = arith.constant 0 : index
    %c0_15 = arith.constant 0 : index
    %15 = vector.load %arg2[%c2, %c0_14, %c0_15] : memref<9x64x128xbf16, #tpu.memory_space<vmem>>, vector<1x64x128xbf16>
    %16 = vector.shape_cast %15 : vector<1x64x128xbf16> to vector<64x128xbf16>
    %cst_16 = arith.constant dense<0.000000e+00> : vector<71x128xf32>
    %17 = tpu.matmul %14, %16, %cst_16 {dimension_numbers = #tpu.dot_dimension_numbers<[1], [0], [0], [1], [0, 0, 1, 1], [], []>} : vector<71x64xbf16>, vector<64x128xbf16>, vector<71x128xf32> -> vector<71x128xf32>
    %18 = arith.addf %12, %17 : vector<71x128xf32>
    %c0_17 = arith.constant 0 : index
    %c162 = arith.constant 162 : index
    %c0_18 = arith.constant 0 : index
    %19 = vector.load %arg1[%c0_17, %c162, %c0_18] : memref<1x324x64xbf16, #tpu.memory_space<vmem>>, vector<1x71x64xbf16>
    %20 = vector.shape_cast %19 : vector<1x71x64xbf16> to vector<71x64xbf16>
    %c3 = arith.constant 3 : index
    %c0_19 = arith.constant 0 : index
    %c0_20 = arith.constant 0 : index
    %21 = vector.load %arg2[%c3, %c0_19, %c0_20] : memref<9x64x128xbf16, #tpu.memory_space<vmem>>, vector<1x64x128xbf16>
    %22 = vector.shape_cast %21 : vector<1x64x128xbf16> to vector<64x128xbf16>
    %cst_21 = arith.constant dense<0.000000e+00> : vector<71x128xf32>
    %23 = tpu.matmul %20, %22, %cst_21 {dimension_numbers = #tpu.dot_dimension_numbers<[1], [0], [0], [1], [0, 0, 1, 1], [], []>} : vector<71x64xbf16>, vector<64x128xbf16>, vector<71x128xf32> -> vector<71x128xf32>
    %24 = arith.addf %18, %23 : vector<71x128xf32>
    %c0_22 = arith.constant 0 : index
    %c243 = arith.constant 243 : index
    %c0_23 = arith.constant 0 : index
    %25 = vector.load %arg1[%c0_22, %c243, %c0_23] : memref<1x324x64xbf16, #tpu.memory_space<vmem>>, vector<1x71x64xbf16>
    %26 = vector.shape_cast %25 : vector<1x71x64xbf16> to vector<71x64xbf16>
    %c4 = arith.constant 4 : index
    %c0_24 = arith.constant 0 : index
    %c0_25 = arith.constant 0 : index
    %27 = vector.load %arg2[%c4, %c0_24, %c0_25] : memref<9x64x128xbf16, #tpu.memory_space<vmem>>, vector<1x64x128xbf16>
    %28 = vector.shape_cast %27 : vector<1x64x128xbf16> to vector<64x128xbf16>
    %cst_26 = arith.constant dense<0.000000e+00> : vector<71x128xf32>
    %29 = tpu.matmul %26, %28, %cst_26 {dimension_numbers = #tpu.dot_dimension_numbers<[1], [0], [0], [1], [0, 0, 1, 1], [], []>} : vector<71x64xbf16>, vector<64x128xbf16>, vector<71x128xf32> -> vector<71x128xf32>
    %30 = arith.addf %24, %29 : vector<71x128xf32>
    %c0_27 = arith.constant 0 : index
    %c163 = arith.constant 163 : index
    %c0_28 = arith.constant 0 : index
    %31 = vector.load %arg1[%c0_27, %c163, %c0_28] : memref<1x324x64xbf16, #tpu.memory_space<vmem>>, vector<1x71x64xbf16>
    %32 = vector.shape_cast %31 : vector<1x71x64xbf16> to vector<71x64xbf16>
    %c5 = arith.constant 5 : index
    %c0_29 = arith.constant 0 : index
    %c0_30 = arith.constant 0 : index
    %33 = vector.load %arg2[%c5, %c0_29, %c0_30] : memref<9x64x128xbf16, #tpu.memory_space<vmem>>, vector<1x64x128xbf16>
    %34 = vector.shape_cast %33 : vector<1x64x128xbf16> to vector<64x128xbf16>
    %cst_31 = arith.constant dense<0.000000e+00> : vector<71x128xf32>
    %35 = tpu.matmul %32, %34, %cst_31 {dimension_numbers = #tpu.dot_dimension_numbers<[1], [0], [0], [1], [0, 0, 1, 1], [], []>} : vector<71x64xbf16>, vector<64x128xbf16>, vector<71x128xf32> -> vector<71x128xf32>
    %36 = arith.addf %30, %35 : vector<71x128xf32>
    %c0_32 = arith.constant 0 : index
    %c9 = arith.constant 9 : index
    %c0_33 = arith.constant 0 : index
    %37 = vector.load %arg1[%c0_32, %c9, %c0_33] : memref<1x324x64xbf16, #tpu.memory_space<vmem>>, vector<1x71x64xbf16>
    %38 = vector.shape_cast %37 : vector<1x71x64xbf16> to vector<71x64xbf16>
    %c6 = arith.constant 6 : index
    %c0_34 = arith.constant 0 : index
    %c0_35 = arith.constant 0 : index
    %39 = vector.load %arg2[%c6, %c0_34, %c0_35] : memref<9x64x128xbf16, #tpu.memory_space<vmem>>, vector<1x64x128xbf16>
    %40 = vector.shape_cast %39 : vector<1x64x128xbf16> to vector<64x128xbf16>
    %cst_36 = arith.constant dense<0.000000e+00> : vector<71x128xf32>
    %41 = tpu.matmul %38, %40, %cst_36 {dimension_numbers = #tpu.dot_dimension_numbers<[1], [0], [0], [1], [0, 0, 1, 1], [], []>} : vector<71x64xbf16>, vector<64x128xbf16>, vector<71x128xf32> -> vector<71x128xf32>
    %42 = arith.addf %36, %41 : vector<71x128xf32>
    %c0_37 = arith.constant 0 : index
    %c90 = arith.constant 90 : index
    %c0_38 = arith.constant 0 : index
    %43 = vector.load %arg1[%c0_37, %c90, %c0_38] : memref<1x324x64xbf16, #tpu.memory_space<vmem>>, vector<1x71x64xbf16>
    %44 = vector.shape_cast %43 : vector<1x71x64xbf16> to vector<71x64xbf16>
    %c7 = arith.constant 7 : index
    %c0_39 = arith.constant 0 : index
    %c0_40 = arith.constant 0 : index
    %45 = vector.load %arg2[%c7, %c0_39, %c0_40] : memref<9x64x128xbf16, #tpu.memory_space<vmem>>, vector<1x64x128xbf16>
    %46 = vector.shape_cast %45 : vector<1x64x128xbf16> to vector<64x128xbf16>
    %cst_41 = arith.constant dense<0.000000e+00> : vector<71x128xf32>
    %47 = tpu.matmul %44, %46, %cst_41 {dimension_numbers = #tpu.dot_dimension_numbers<[1], [0], [0], [1], [0, 0, 1, 1], [], []>} : vector<71x64xbf16>, vector<64x128xbf16>, vector<71x128xf32> -> vector<71x128xf32>
    %48 = arith.addf %42, %47 : vector<71x128xf32>
    %c0_42 = arith.constant 0 : index
    %c10 = arith.constant 10 : index
    %c0_43 = arith.constant 0 : index
    %49 = vector.load %arg1[%c0_42, %c10, %c0_43] : memref<1x324x64xbf16, #tpu.memory_space<vmem>>, vector<1x71x64xbf16>
    %50 = vector.shape_cast %49 : vector<1x71x64xbf16> to vector<71x64xbf16>
    %c8 = arith.constant 8 : index
    %c0_44 = arith.constant 0 : index
    %c0_45 = arith.constant 0 : index
    %51 = vector.load %arg2[%c8, %c0_44, %c0_45] : memref<9x64x128xbf16, #tpu.memory_space<vmem>>, vector<1x64x128xbf16>
    %52 = vector.shape_cast %51 : vector<1x64x128xbf16> to vector<64x128xbf16>
    %cst_46 = arith.constant dense<0.000000e+00> : vector<71x128xf32>
    %53 = tpu.matmul %50, %52, %cst_46 {dimension_numbers = #tpu.dot_dimension_numbers<[1], [0], [0], [1], [0, 0, 1, 1], [], []>} : vector<71x64xbf16>, vector<64x128xbf16>, vector<71x128xf32> -> vector<71x128xf32>
    %54 = arith.addf %48, %53 : vector<71x128xf32>
    %c0_47 = arith.constant 0 : index
    %c0_48 = arith.constant 0 : index
    %55 = vector.load %arg3[%c0_47, %c0_48] : memref<1x128xf32, #tpu.memory_space<vmem>>, vector<1x128xf32>
    %56 = vector.broadcast %55 : vector<1x128xf32> to vector<71x128xf32>
    %57 = arith.mulf %54, %56 : vector<71x128xf32>
    %c0_49 = arith.constant 0 : index
    %c0_50 = arith.constant 0 : index
    %58 = vector.load %arg4[%c0_49, %c0_50] : memref<1x128xf32, #tpu.memory_space<vmem>>, vector<1x128xf32>
    %59 = vector.broadcast %58 : vector<1x128xf32> to vector<71x128xf32>
    %60 = arith.addf %57, %59 : vector<71x128xf32>
    %cst_51 = arith.constant 0.000000e+00 : f32
    %61 = vector.broadcast %cst_51 : f32 to vector<71x128xf32>
    %62 = arith.maximumf %60, %61 : vector<71x128xf32>
    %63 = arith.truncf %62 : vector<71x128xf32> to vector<71x128xbf16>
    %c0_52 = arith.constant 0 : index
    %c0_53 = arith.constant 0 : index
    %c0_54 = arith.constant 0 : index
    %64 = vector.load %arg5[%c0_52, %c0_53, %c0_54] : memref<1x71x128xbf16, #tpu.memory_space<vmem>>, vector<1x71x128xbf16>
    %65 = vector.shape_cast %64 : vector<1x71x128xbf16> to vector<71x128xbf16>
    %66 = vector.shape_cast %63 : vector<71x128xbf16> to vector<1x71x128xbf16>
    tpu.vector_store %arg5[%c0_52, %c0_53, %c0_54], %66 {strides = array<i32>} : memref<1x71x128xbf16, #tpu.memory_space<vmem>>, vector<1x71x128xbf16>,
    return
  }
  func.func @transform_0(%arg0: i32) -> (i32, i32, i32) {
    %c0_i32 = arith.constant 0 : i32
    %c0_i32_0 = arith.constant 0 : i32
    %c0_i32_1 = arith.constant 0 : i32
    return %arg0, %c0_i32, %c0_i32_0 : i32, i32, i32
  }
  func.func @transform_1(%arg0: i32) -> (i32, i32, i32) {
    %c0_i32 = arith.constant 0 : i32
    %c0_i32_0 = arith.constant 0 : i32
    %c0_i32_1 = arith.constant 0 : i32
    %c0_i32_2 = arith.constant 0 : i32
    return %c0_i32, %c0_i32_0, %c0_i32_1 : i32, i32, i32
  }
  func.func @transform_2(%arg0: i32) -> (i32, i32) {
    %c0_i32 = arith.constant 0 : i32
    %c0_i32_0 = arith.constant 0 : i32
    %c0_i32_1 = arith.constant 0 : i32
    return %c0_i32, %c0_i32_0 : i32, i32
  }
  func.func @transform_3(%arg0: i32) -> (i32, i32) {
    %c0_i32 = arith.constant 0 : i32
    %c0_i32_0 = arith.constant 0 : i32
    %c0_i32_1 = arith.constant 0 : i32
    return %c0_i32, %c0_i32_0 : i32, i32
  }
  func.func @transform_4(%arg0: i32) -> (i32, i32, i32) {
    %c0_i32 = arith.constant 0 : i32
    %c0_i32_0 = arith.constant 0 : i32
    %c0_i32_1 = arith.constant 0 : i32
    return %arg0, %c0_i32, %c0_i32_0 : i32, i32, i32
  }
}

module attributes {stable_mosaic.version = 11 : i64} {
  func.func @_mm_bias_kernel(%arg0: i32, %arg1: memref<128x64xbf16, #tpu.memory_space<vmem>>, %arg2: memref<64x128xbf16, #tpu.memory_space<vmem>>, %arg3: memref<1x128xf32, #tpu.memory_space<vmem>>, %arg4: memref<128x128xf32, #tpu.memory_space<vmem>>) attributes {dimension_semantics = [#tpu.dimension_semantics<parallel>], iteration_bounds = array<i64: 1>, scalar_prefetch = 0 : i64, scratch_operands = 0 : i64, tpu.core_type = #tpu.core_type<tc>, window_params = [{transform_indices = @transform_0, window_bounds = array<i64: 128, 64>}, {pipeline_mode = #tpu.pipeline_mode<synchronous>, transform_indices = @transform_1, window_bounds = array<i64: 64, 128>}, {pipeline_mode = #tpu.pipeline_mode<synchronous>, transform_indices = @transform_2, window_bounds = array<i64: 1, 128>}, {transform_indices = @transform_3, window_bounds = array<i64: 128, 128>}]} {
    %c0 = arith.constant 0 : index
    %c0_0 = arith.constant 0 : index
    %0 = vector.load %arg1[%c0, %c0_0] : memref<128x64xbf16, #tpu.memory_space<vmem>>, vector<128x64xbf16>
    %c0_1 = arith.constant 0 : index
    %c0_2 = arith.constant 0 : index
    %1 = vector.load %arg2[%c0_1, %c0_2] : memref<64x128xbf16, #tpu.memory_space<vmem>>, vector<64x128xbf16>
    %cst = arith.constant dense<0.000000e+00> : vector<128x128xf32>
    %2 = tpu.matmul %0, %1, %cst {dimension_numbers = #tpu.dot_dimension_numbers<[1], [0], [0], [1], [0, 0, 1, 1], [], []>} : vector<128x64xbf16>, vector<64x128xbf16>, vector<128x128xf32> -> vector<128x128xf32>
    %c0_3 = arith.constant 0 : index
    %c0_4 = arith.constant 0 : index
    %3 = vector.load %arg3[%c0_3, %c0_4] : memref<1x128xf32, #tpu.memory_space<vmem>>, vector<1x128xf32>
    %4 = vector.broadcast %3 : vector<1x128xf32> to vector<128x128xf32>
    %5 = arith.addf %2, %4 : vector<128x128xf32>
    %c0_5 = arith.constant 0 : index
    %c0_6 = arith.constant 0 : index
    %6 = vector.load %arg4[%c0_5, %c0_6] : memref<128x128xf32, #tpu.memory_space<vmem>>, vector<128x128xf32>
    tpu.vector_store %arg4[%c0_5, %c0_6], %5 {strides = array<i32>} : memref<128x128xf32, #tpu.memory_space<vmem>>, vector<128x128xf32>,
    return
  }
  func.func @transform_0(%arg0: i32) -> (i32, i32) {
    %c0_i32 = arith.constant 0 : i32
    %c0_i32_0 = arith.constant 0 : i32
    return %arg0, %c0_i32 : i32, i32
  }
  func.func @transform_1(%arg0: i32) -> (i32, i32) {
    %c0_i32 = arith.constant 0 : i32
    %c0_i32_0 = arith.constant 0 : i32
    %c0_i32_1 = arith.constant 0 : i32
    return %c0_i32, %c0_i32_0 : i32, i32
  }
  func.func @transform_2(%arg0: i32) -> (i32, i32) {
    %c0_i32 = arith.constant 0 : i32
    %c0_i32_0 = arith.constant 0 : i32
    %c0_i32_1 = arith.constant 0 : i32
    return %c0_i32, %c0_i32_0 : i32, i32
  }
  func.func @transform_3(%arg0: i32) -> (i32, i32) {
    %c0_i32 = arith.constant 0 : i32
    %c0_i32_0 = arith.constant 0 : i32
    return %arg0, %c0_i32 : i32, i32
  }
}

module attributes {stable_mosaic.version = 11 : i64} {
  func.func @_conv3x3_res_kernel(%arg0: i32, %arg1: memref<1x100x128xbf16, #tpu.memory_space<vmem>>, %arg2: memref<9x128x128xbf16, #tpu.memory_space<vmem>>, %arg3: memref<1x128xf32, #tpu.memory_space<vmem>>, %arg4: memref<1x128xf32, #tpu.memory_space<vmem>>, %arg5: memref<1x78x128xf32, #tpu.memory_space<vmem>>, %arg6: memref<1x78x128xf32, #tpu.memory_space<vmem>>) attributes {dimension_semantics = [#tpu.dimension_semantics<parallel>], iteration_bounds = array<i64: 2>, scalar_prefetch = 0 : i64, scratch_operands = 0 : i64, tpu.core_type = #tpu.core_type<tc>, window_params = [{transform_indices = @transform_0, window_bounds = array<i64: 1, 100, 128>}, {pipeline_mode = #tpu.pipeline_mode<synchronous>, transform_indices = @transform_1, window_bounds = array<i64: 9, 128, 128>}, {pipeline_mode = #tpu.pipeline_mode<synchronous>, transform_indices = @transform_2, window_bounds = array<i64: 1, 128>}, {pipeline_mode = #tpu.pipeline_mode<synchronous>, transform_indices = @transform_3, window_bounds = array<i64: 1, 128>}, {transform_indices = @transform_4, window_bounds = array<i64: 1, 78, 128>}, {transform_indices = @transform_5, window_bounds = array<i64: 1, 78, 128>}]} {
    %cst = arith.constant 0.000000e+00 : f32
    %0 = vector.broadcast %cst : f32 to vector<78x128xf32>
    %c0 = arith.constant 0 : index
    %c0_0 = arith.constant 0 : index
    %c0_1 = arith.constant 0 : index
    %1 = vector.load %arg1[%c0, %c0_0, %c0_1] : memref<1x100x128xbf16, #tpu.memory_space<vmem>>, vector<1x78x128xbf16>
    %2 = vector.shape_cast %1 : vector<1x78x128xbf16> to vector<78x128xbf16>
    %c0_2 = arith.constant 0 : index
    %c0_3 = arith.constant 0 : index
    %c0_4 = arith.constant 0 : index
    %3 = vector.load %arg2[%c0_2, %c0_3, %c0_4] : memref<9x128x128xbf16, #tpu.memory_space<vmem>>, vector<1x128x128xbf16>
    %4 = vector.shape_cast %3 : vector<1x128x128xbf16> to vector<128x128xbf16>
    %cst_5 = arith.constant dense<0.000000e+00> : vector<78x128xf32>
    %5 = tpu.matmul %2, %4, %cst_5 {dimension_numbers = #tpu.dot_dimension_numbers<[1], [0], [0], [1], [0, 0, 1, 1], [], []>} : vector<78x128xbf16>, vector<128x128xbf16>, vector<78x128xf32> -> vector<78x128xf32>
    %6 = arith.addf %0, %5 : vector<78x128xf32>
    %c0_6 = arith.constant 0 : index
    %c1 = arith.constant 1 : index
    %c0_7 = arith.constant 0 : index
    %7 = vector.load %arg1[%c0_6, %c1, %c0_7] : memref<1x100x128xbf16, #tpu.memory_space<vmem>>, vector<1x78x128xbf16>
    %8 = vector.shape_cast %7 : vector<1x78x128xbf16> to vector<78x128xbf16>
    %c1_8 = arith.constant 1 : index
    %c0_9 = arith.constant 0 : index
    %c0_10 = arith.constant 0 : index
    %9 = vector.load %arg2[%c1_8, %c0_9, %c0_10] : memref<9x128x128xbf16, #tpu.memory_space<vmem>>, vector<1x128x128xbf16>
    %10 = vector.shape_cast %9 : vector<1x128x128xbf16> to vector<128x128xbf16>
    %cst_11 = arith.constant dense<0.000000e+00> : vector<78x128xf32>
    %11 = tpu.matmul %8, %10, %cst_11 {dimension_numbers = #tpu.dot_dimension_numbers<[1], [0], [0], [1], [0, 0, 1, 1], [], []>} : vector<78x128xbf16>, vector<128x128xbf16>, vector<78x128xf32> -> vector<78x128xf32>
    %12 = arith.addf %6, %11 : vector<78x128xf32>
    %c0_12 = arith.constant 0 : index
    %c2 = arith.constant 2 : index
    %c0_13 = arith.constant 0 : index
    %13 = vector.load %arg1[%c0_12, %c2, %c0_13] : memref<1x100x128xbf16, #tpu.memory_space<vmem>>, vector<1x78x128xbf16>
    %14 = vector.shape_cast %13 : vector<1x78x128xbf16> to vector<78x128xbf16>
    %c2_14 = arith.constant 2 : index
    %c0_15 = arith.constant 0 : index
    %c0_16 = arith.constant 0 : index
    %15 = vector.load %arg2[%c2_14, %c0_15, %c0_16] : memref<9x128x128xbf16, #tpu.memory_space<vmem>>, vector<1x128x128xbf16>
    %16 = vector.shape_cast %15 : vector<1x128x128xbf16> to vector<128x128xbf16>
    %cst_17 = arith.constant dense<0.000000e+00> : vector<78x128xf32>
    %17 = tpu.matmul %14, %16, %cst_17 {dimension_numbers = #tpu.dot_dimension_numbers<[1], [0], [0], [1], [0, 0, 1, 1], [], []>} : vector<78x128xbf16>, vector<128x128xbf16>, vector<78x128xf32> -> vector<78x128xf32>
    %18 = arith.addf %12, %17 : vector<78x128xf32>
    %c0_18 = arith.constant 0 : index
    %c10 = arith.constant 10 : index
    %c0_19 = arith.constant 0 : index
    %19 = vector.load %arg1[%c0_18, %c10, %c0_19] : memref<1x100x128xbf16, #tpu.memory_space<vmem>>, vector<1x78x128xbf16>
    %20 = vector.shape_cast %19 : vector<1x78x128xbf16> to vector<78x128xbf16>
    %c3 = arith.constant 3 : index
    %c0_20 = arith.constant 0 : index
    %c0_21 = arith.constant 0 : index
    %21 = vector.load %arg2[%c3, %c0_20, %c0_21] : memref<9x128x128xbf16, #tpu.memory_space<vmem>>, vector<1x128x128xbf16>
    %22 = vector.shape_cast %21 : vector<1x128x128xbf16> to vector<128x128xbf16>
    %cst_22 = arith.constant dense<0.000000e+00> : vector<78x128xf32>
    %23 = tpu.matmul %20, %22, %cst_22 {dimension_numbers = #tpu.dot_dimension_numbers<[1], [0], [0], [1], [0, 0, 1, 1], [], []>} : vector<78x128xbf16>, vector<128x128xbf16>, vector<78x128xf32> -> vector<78x128xf32>
    %24 = arith.addf %18, %23 : vector<78x128xf32>
    %c0_23 = arith.constant 0 : index
    %c11 = arith.constant 11 : index
    %c0_24 = arith.constant 0 : index
    %25 = vector.load %arg1[%c0_23, %c11, %c0_24] : memref<1x100x128xbf16, #tpu.memory_space<vmem>>, vector<1x78x128xbf16>
    %26 = vector.shape_cast %25 : vector<1x78x128xbf16> to vector<78x128xbf16>
    %c4 = arith.constant 4 : index
    %c0_25 = arith.constant 0 : index
    %c0_26 = arith.constant 0 : index
    %27 = vector.load %arg2[%c4, %c0_25, %c0_26] : memref<9x128x128xbf16, #tpu.memory_space<vmem>>, vector<1x128x128xbf16>
    %28 = vector.shape_cast %27 : vector<1x128x128xbf16> to vector<128x128xbf16>
    %cst_27 = arith.constant dense<0.000000e+00> : vector<78x128xf32>
    %29 = tpu.matmul %26, %28, %cst_27 {dimension_numbers = #tpu.dot_dimension_numbers<[1], [0], [0], [1], [0, 0, 1, 1], [], []>} : vector<78x128xbf16>, vector<128x128xbf16>, vector<78x128xf32> -> vector<78x128xf32>
    %30 = arith.addf %24, %29 : vector<78x128xf32>
    %c0_28 = arith.constant 0 : index
    %c12 = arith.constant 12 : index
    %c0_29 = arith.constant 0 : index
    %31 = vector.load %arg1[%c0_28, %c12, %c0_29] : memref<1x100x128xbf16, #tpu.memory_space<vmem>>, vector<1x78x128xbf16>
    %32 = vector.shape_cast %31 : vector<1x78x128xbf16> to vector<78x128xbf16>
    %c5 = arith.constant 5 : index
    %c0_30 = arith.constant 0 : index
    %c0_31 = arith.constant 0 : index
    %33 = vector.load %arg2[%c5, %c0_30, %c0_31] : memref<9x128x128xbf16, #tpu.memory_space<vmem>>, vector<1x128x128xbf16>
    %34 = vector.shape_cast %33 : vector<1x128x128xbf16> to vector<128x128xbf16>
    %cst_32 = arith.constant dense<0.000000e+00> : vector<78x128xf32>
    %35 = tpu.matmul %32, %34, %cst_32 {dimension_numbers = #tpu.dot_dimension_numbers<[1], [0], [0], [1], [0, 0, 1, 1], [], []>} : vector<78x128xbf16>, vector<128x128xbf16>, vector<78x128xf32> -> vector<78x128xf32>
    %36 = arith.addf %30, %35 : vector<78x128xf32>
    %c0_33 = arith.constant 0 : index
    %c20 = arith.constant 20 : index
    %c0_34 = arith.constant 0 : index
    %37 = vector.load %arg1[%c0_33, %c20, %c0_34] : memref<1x100x128xbf16, #tpu.memory_space<vmem>>, vector<1x78x128xbf16>
    %38 = vector.shape_cast %37 : vector<1x78x128xbf16> to vector<78x128xbf16>
    %c6 = arith.constant 6 : index
    %c0_35 = arith.constant 0 : index
    %c0_36 = arith.constant 0 : index
    %39 = vector.load %arg2[%c6, %c0_35, %c0_36] : memref<9x128x128xbf16, #tpu.memory_space<vmem>>, vector<1x128x128xbf16>
    %40 = vector.shape_cast %39 : vector<1x128x128xbf16> to vector<128x128xbf16>
    %cst_37 = arith.constant dense<0.000000e+00> : vector<78x128xf32>
    %41 = tpu.matmul %38, %40, %cst_37 {dimension_numbers = #tpu.dot_dimension_numbers<[1], [0], [0], [1], [0, 0, 1, 1], [], []>} : vector<78x128xbf16>, vector<128x128xbf16>, vector<78x128xf32> -> vector<78x128xf32>
    %42 = arith.addf %36, %41 : vector<78x128xf32>
    %c0_38 = arith.constant 0 : index
    %c21 = arith.constant 21 : index
    %c0_39 = arith.constant 0 : index
    %43 = vector.load %arg1[%c0_38, %c21, %c0_39] : memref<1x100x128xbf16, #tpu.memory_space<vmem>>, vector<1x78x128xbf16>
    %44 = vector.shape_cast %43 : vector<1x78x128xbf16> to vector<78x128xbf16>
    %c7 = arith.constant 7 : index
    %c0_40 = arith.constant 0 : index
    %c0_41 = arith.constant 0 : index
    %45 = vector.load %arg2[%c7, %c0_40, %c0_41] : memref<9x128x128xbf16, #tpu.memory_space<vmem>>, vector<1x128x128xbf16>
    %46 = vector.shape_cast %45 : vector<1x128x128xbf16> to vector<128x128xbf16>
    %cst_42 = arith.constant dense<0.000000e+00> : vector<78x128xf32>
    %47 = tpu.matmul %44, %46, %cst_42 {dimension_numbers = #tpu.dot_dimension_numbers<[1], [0], [0], [1], [0, 0, 1, 1], [], []>} : vector<78x128xbf16>, vector<128x128xbf16>, vector<78x128xf32> -> vector<78x128xf32>
    %48 = arith.addf %42, %47 : vector<78x128xf32>
    %c0_43 = arith.constant 0 : index
    %c22 = arith.constant 22 : index
    %c0_44 = arith.constant 0 : index
    %49 = vector.load %arg1[%c0_43, %c22, %c0_44] : memref<1x100x128xbf16, #tpu.memory_space<vmem>>, vector<1x78x128xbf16>
    %50 = vector.shape_cast %49 : vector<1x78x128xbf16> to vector<78x128xbf16>
    %c8 = arith.constant 8 : index
    %c0_45 = arith.constant 0 : index
    %c0_46 = arith.constant 0 : index
    %51 = vector.load %arg2[%c8, %c0_45, %c0_46] : memref<9x128x128xbf16, #tpu.memory_space<vmem>>, vector<1x128x128xbf16>
    %52 = vector.shape_cast %51 : vector<1x128x128xbf16> to vector<128x128xbf16>
    %cst_47 = arith.constant dense<0.000000e+00> : vector<78x128xf32>
    %53 = tpu.matmul %50, %52, %cst_47 {dimension_numbers = #tpu.dot_dimension_numbers<[1], [0], [0], [1], [0, 0, 1, 1], [], []>} : vector<78x128xbf16>, vector<128x128xbf16>, vector<78x128xf32> -> vector<78x128xf32>
    %54 = arith.addf %48, %53 : vector<78x128xf32>
    %c0_48 = arith.constant 0 : index
    %c0_49 = arith.constant 0 : index
    %55 = vector.load %arg3[%c0_48, %c0_49] : memref<1x128xf32, #tpu.memory_space<vmem>>, vector<1x128xf32>
    %56 = vector.broadcast %55 : vector<1x128xf32> to vector<78x128xf32>
    %57 = arith.mulf %54, %56 : vector<78x128xf32>
    %c0_50 = arith.constant 0 : index
    %c0_51 = arith.constant 0 : index
    %58 = vector.load %arg4[%c0_50, %c0_51] : memref<1x128xf32, #tpu.memory_space<vmem>>, vector<1x128xf32>
    %59 = vector.broadcast %58 : vector<1x128xf32> to vector<78x128xf32>
    %60 = arith.addf %57, %59 : vector<78x128xf32>
    %c0_52 = arith.constant 0 : index
    %c0_53 = arith.constant 0 : index
    %c0_54 = arith.constant 0 : index
    %61 = vector.load %arg5[%c0_52, %c0_53, %c0_54] : memref<1x78x128xf32, #tpu.memory_space<vmem>>, vector<1x78x128xf32>
    %62 = vector.shape_cast %61 : vector<1x78x128xf32> to vector<78x128xf32>
    %63 = arith.addf %60, %62 : vector<78x128xf32>
    %c0_55 = arith.constant 0 : index
    %c0_56 = arith.constant 0 : index
    %c0_57 = arith.constant 0 : index
    %64 = vector.load %arg6[%c0_55, %c0_56, %c0_57] : memref<1x78x128xf32, #tpu.memory_space<vmem>>, vector<1x78x128xf32>
    %65 = vector.shape_cast %64 : vector<1x78x128xf32> to vector<78x128xf32>
    %66 = vector.shape_cast %63 : vector<78x128xf32> to vector<1x78x128xf32>
    tpu.vector_store %arg6[%c0_55, %c0_56, %c0_57], %66 {strides = array<i32>} : memref<1x78x128xf32, #tpu.memory_space<vmem>>, vector<1x78x128xf32>,
    return
  }
  func.func @transform_0(%arg0: i32) -> (i32, i32, i32) {
    %c0_i32 = arith.constant 0 : i32
    %c0_i32_0 = arith.constant 0 : i32
    %c0_i32_1 = arith.constant 0 : i32
    return %arg0, %c0_i32, %c0_i32_0 : i32, i32, i32
  }
  func.func @transform_1(%arg0: i32) -> (i32, i32, i32) {
    %c0_i32 = arith.constant 0 : i32
    %c0_i32_0 = arith.constant 0 : i32
    %c0_i32_1 = arith.constant 0 : i32
    %c0_i32_2 = arith.constant 0 : i32
    return %c0_i32, %c0_i32_0, %c0_i32_1 : i32, i32, i32
  }
  func.func @transform_2(%arg0: i32) -> (i32, i32) {
    %c0_i32 = arith.constant 0 : i32
    %c0_i32_0 = arith.constant 0 : i32
    %c0_i32_1 = arith.constant 0 : i32
    return %c0_i32, %c0_i32_0 : i32, i32
  }
  func.func @transform_3(%arg0: i32) -> (i32, i32) {
    %c0_i32 = arith.constant 0 : i32
    %c0_i32_0 = arith.constant 0 : i32
    %c0_i32_1 = arith.constant 0 : i32
    return %c0_i32, %c0_i32_0 : i32, i32
  }
  func.func @transform_4(%arg0: i32) -> (i32, i32, i32) {
    %c0_i32 = arith.constant 0 : i32
    %c0_i32_0 = arith.constant 0 : i32
    %c0_i32_1 = arith.constant 0 : i32
    return %arg0, %c0_i32, %c0_i32_0 : i32, i32, i32
  }
  func.func @transform_5(%arg0: i32) -> (i32, i32, i32) {
    %c0_i32 = arith.constant 0 : i32
    %c0_i32_0 = arith.constant 0 : i32
    %c0_i32_1 = arith.constant 0 : i32
    return %arg0, %c0_i32, %c0_i32_0 : i32, i32, i32
  }
}

</mosaic_0001>

<bundles_post_ra>
// kernel: preactivation_block_forward.5
= control target key start
LH: loop header
LB: loop body
LE: loop exit
PB: predicated region body
PF: predicated region fallthrough
CT: control target
= control target key end

     0   :  { %8 = vsyncpa [#allocation3], 0  ;;  %s781_s12 = smov [#allocation2]   ;;  %s1210_s0 = inlined_call_operand.hbm [shape: f32[512,64], index: 0, kind: input, shape index: {}]   ;;  %s1211_s1 = inlined_call_operand.vmem [shape: f32[1,64], index: 1, kind: input, shape index: {}]   ;;  %s1212_s2 = inlined_call_operand.vmem [shape: f32[1,64], index: 2, kind: input, shape index: {}]   ;;  %s1213_s3 = inlined_call_operand.vmem [shape: bf16[512,64], index: 3, kind: output, shape index: {}]  }
   0x1   :  { %s14_s13 = sshll.u32 %s781_s12, 4  ;;  %s757_s16 = scalar_lea.hbm %s1210_s0, 8192  ;;  %s15_s13 = int_to_ptr.vmem [resolvable:$true] %s14_s13 }
   0x2   :  { %p758_p0 = scmp.ne.s32.totalorder %s1210_s0, %s757_s16  ;;  %p761_p1 = scmp.lt.u32.totalorder %s757_s16, %s1210_s0 }
   0x4   :  { %p763_p2 = pnand %p761_p1, %p758_p0 }
   0x6   :  { %766 = shalt.err (!%p763_p2)
}
   0x7   :  { %s767_s21 = scalar_lea.vmem %s15_s13, 8192  ;;  %p772_p4 = scmp.lt.s32.totalorder %s15_s13, %s15_s13 }
   0x8   :  { %p768_p3 = scmp.ne.s32.totalorder %s15_s13, %s767_s21  ;;  %p773_p5 = scmp.lt.s32.totalorder %s767_s21, %s767_s21 }
   0xa   :  { %p774_p6 = por %p773_p5, %p772_p4 }
   0xc   :  { %p775_p7 = pnand %p774_p6, %p768_p3 }
   0xe   :  { %778 = shalt.err (!%p775_p7)
}
   0xf   :  { %s782_s22 = smov 128   ;;  %s783_s23 = smov 8  }
  0x10   :  { %20 = dma.hbm_to_vmem [thread:$0]  %s1210_s0, 8192, %s15_s13, [#allocation3], %s782_s22, %s782_s22, %s783_s23  }
  0x11   :  { %779 = dma.done.wait [#allocation3], 8192  }
  0x12   :  { %780 = vsyncadd [#allocation3], 4294959104  ;;  %v28_v0 = vld [vmem:[#allocation2] sm:$0xff]  ;;  %v29_v4 = vld [vmem:[#allocation2 + $0x8] sm:$0xff]  ;;  %vm554_vm0 = vcmask 519168  }
  0x13   :  { %v819_v1 = vld [vmem:[%s1211_s1] ss:$0 sm:$0xff]  ;;  %v30_v5 = vld [vmem:[#allocation2 + $0x10] sm:$0xff]  ;;  %v31_v6 = vld [vmem:[#allocation2 + $0x18] sm:$0xff] }
  0x14   :  { %v824_v2 = vld [vmem:[%s1212_s2] ss:$0 sm:$0xff]  ;;  %v99_v3 = vmul.f32 %v819_v1, %v28_v0  ;;  %v100_v7 = vmul.f32 %v819_v1, %v29_v4  ;;  %v101_v8 = vmul.f32 %v819_v1, %v30_v5  ;;  %v102_v9 = vmul.f32 %v819_v1, %v31_v6  ;;  %v33_v11 = vld [vmem:[#allocation2 + $0x28] sm:$0xff]  ;;  %v34_v12 = vld [vmem:[#allocation2 + $0x30] sm:$0xff] }
  0x15   :  { %v32_v10 = vld [vmem:[#allocation2 + $0x20] sm:$0xff]  ;;  %v104_v15 = vmul.f32 %v819_v1, %v33_v11  ;;  %v105_v16 = vmul.f32 %v819_v1, %v34_v12  ;;  %v35_v17 = vld [vmem:[#allocation2 + $0x38] sm:$0xff]  ;;  %v37_v35 = vld [vmem:[#allocation2 + $0x48] sm:$0xff] }
  0x16   :  { %v170_v13 = vadd.f32 %v824_v2, %v99_v3  ;;  %v103_v14 = vmul.f32 %v819_v1, %v32_v10  ;;  %v171_v18 = vadd.f32 %v824_v2, %v100_v7  ;;  %v172_v19 = vadd.f32 %v824_v2, %v101_v8  ;;  %v36_v30 = vld [vmem:[#allocation2 + $0x40] sm:$0xff]  ;;  %v38_v36 = vld [vmem:[#allocation2 + $0x50] sm:$0xff]  ;;  %v39_v37 = vld [vmem:[#allocation2 + $0x58] sm:$0xff] }
  0x17   :  { %v173_v20 = vadd.f32 %v824_v2, %v102_v9  ;;  %v106_v21 = vmul.f32 %v819_v1, %v35_v17  ;;  %v175_v24 = vadd.f32 %v824_v2, %v104_v15  ;;  %v176_v25 = vadd.f32 %v824_v2, %v105_v16  ;;  %v40_v42 = vld [vmem:[#allocation2 + $0x60] sm:$0xff]  ;;  %v41_v43 = vld [vmem:[#allocation2 + $0x68] sm:$0xff]  ;;  %v42_v44 = vld [vmem:[#allocation2 + $0x70] sm:$0xff] }
  0x18   :  { %v234_v22 = vmax.f32 %v170_v13, 0.0  ;;  %v174_v23 = vadd.f32 %v824_v2, %v103_v14  ;;  %v235_v26 = vmax.f32 %v171_v18, 0.0  ;;  %v236_v27 = vmax.f32 %v172_v19, 0.0  ;;  %v43_v49 = vld [vmem:[#allocation2 + $0x78] sm:$0xff]  ;;  %v44_v8 = vld [vmem:[#allocation2 + $0x80] sm:$0xff]  ;;  %v45_v13 = vld [vmem:[#allocation2 + $0x88] sm:$0xff] }
  0x19   :  { %v237_v28 = vmax.f32 %v173_v20, 0.0  ;;  %v177_v29 = vadd.f32 %v824_v2, %v106_v21  ;;  %v239_v33 = vmax.f32 %v175_v24, 0.0  ;;  %v240_v34 = vmax.f32 %v176_v25, 0.0  ;;  %v46_v14 = vld [vmem:[#allocation2 + $0x90] sm:$0xff]  ;;  %v47_v15 = vld [vmem:[#allocation2 + $0x98] sm:$0xff]  ;;  %v48_v20 = vld [vmem:[#allocation2 + $0xa0] sm:$0xff] }
  0x1a   :  { %v690_v31 = vpack.c.bf16 %v234_v22, %v234_v22  ;;  %v238_v32 = vmax.f32 %v174_v23, 0.0  ;;  %v691_v38 = vpack.c.bf16 %v235_v26, %v235_v26  ;;  %v692_v39 = vpack.c.bf16 %v236_v27, %v236_v27  ;;  %v49_v21 = vld [vmem:[#allocation2 + $0xa8] sm:$0xff]  ;;  %v50_v22 = vld [vmem:[#allocation2 + $0xb0] sm:$0xff]  ;;  %v51_v27 = vld [vmem:[#allocation2 + $0xb8] sm:$0xff] }
  0x1b   :  { %v693_v40 = vpack.c.bf16 %v237_v28, %v237_v28  ;;  %v241_v41 = vmax.f32 %v177_v29, 0.0  ;;  %v695_v46 = vpack.c.bf16 %v239_v33, %v239_v33  ;;  %v696_v47 = vpack.c.bf16 %v240_v34, %v240_v34 }
  0x1c   :  { %555 = vst.msk [vmem:[%s1213_s3] sm:$0xf] %vm554_vm0, %v690_v31  ;;  %v694_v45 = vpack.c.bf16 %v238_v32, %v238_v32  ;;  %v107_v48 = vmul.f32 %v819_v1, %v36_v30  ;;  %556 = vst.msk [vmem:[%s1213_s3 + $0x4] sm:$0xf] %vm554_vm0, %v691_v38  ;;  %v108_v51 = vmul.f32 %v819_v1, %v37_v35 }
  0x1d   :  { %557 = vst.msk [vmem:[%s1213_s3 + $0x8] sm:$0xf] %vm554_vm0, %v692_v39  ;;  %558 = vst.msk [vmem:[%s1213_s3 + $0xc] sm:$0xf] %vm554_vm0, %v693_v40  ;;  %v697_v50 = vpack.c.bf16 %v241_v41, %v241_v41  ;;  %v109_v52 = vmul.f32 %v819_v1, %v38_v36  ;;  %v110_v53 = vmul.f32 %v819_v1, %v39_v37 }
  0x1e   :  { %559 = vst.msk [vmem:[%s1213_s3 + $0x10] sm:$0xf] %vm554_vm0, %v694_v45  ;;  %560 = vst.msk [vmem:[%s1213_s3 + $0x14] sm:$0xf] %vm554_vm0, %v695_v46  ;;  %v178_v54 = vadd.f32 %v824_v2, %v107_v48  ;;  %v111_v55 = vmul.f32 %v819_v1, %v40_v42  ;;  %v112_v56 = vmul.f32 %v819_v1, %v41_v43  ;;  %v52_v48 = vld [vmem:[#allocation2 + $0xc0] sm:$0xff] }
  0x1f   :  { %561 = vst.msk [vmem:[%s1213_s3 + $0x18] sm:$0xf] %vm554_vm0, %v696_v47  ;;  %v113_v57 = vmul.f32 %v819_v1, %v42_v44  ;;  %562 = vst.msk [vmem:[%s1213_s3 + $0x1c] sm:$0xf] %vm554_vm0, %v697_v50  ;;  %v179_v58 = vadd.f32 %v824_v2, %v108_v51  ;;  %v180_v59 = vadd.f32 %v824_v2, %v109_v52 }
  0x20   :  { %v181_v60 = vadd.f32 %v824_v2, %v110_v53  ;;  %v114_v61 = vmul.f32 %v819_v1, %v43_v49  ;;  %v242_v62 = vmax.f32 %v178_v54, 0.0  ;;  %v182_v63 = vadd.f32 %v824_v2, %v111_v55  ;;  %v53_v53 = vld [vmem:[#allocation2 + $0xc8] sm:$0xff]  ;;  %v54_v54 = vld [vmem:[#allocation2 + $0xd0] sm:$0xff]  ;;  %v55_v55 = vld [vmem:[#allocation2 + $0xd8] sm:$0xff] }
  0x21   :  { %v183_v0 = vadd.f32 %v824_v2, %v112_v56  ;;  %v184_v3 = vadd.f32 %v824_v2, %v113_v57  ;;  %v243_v4 = vmax.f32 %v179_v58, 0.0  ;;  %v244_v5 = vmax.f32 %v180_v59, 0.0 }
  0x22   :  { %v245_v6 = vmax.f32 %v181_v60, 0.0  ;;  %v185_v7 = vadd.f32 %v824_v2, %v114_v61  ;;  %v698_v9 = vpack.c.bf16 %v242_v62, %v242_v62  ;;  %v246_v10 = vmax.f32 %v182_v63, 0.0  ;;  %v56_v60 = vld [vmem:[#allocation2 + $0xe0] sm:$0xff]  ;;  %v57_v61 = vld [vmem:[#allocation2 + $0xe8] sm:$0xff]  ;;  %v58_v62 = vld [vmem:[#allocation2 + $0xf0] sm:$0xff] }
  0x23   :  { %v247_v11 = vmax.f32 %v183_v0, 0.0  ;;  %v248_v12 = vmax.f32 %v184_v3, 0.0  ;;  %v699_v16 = vpack.c.bf16 %v243_v4, %v243_v4  ;;  %v700_v17 = vpack.c.bf16 %v244_v5, %v244_v5  ;;  %v59_v5 = vld [vmem:[#allocation2 + $0xf8] sm:$0xff] }
  0x24   :  { %v701_v18 = vpack.c.bf16 %v245_v6, %v245_v6  ;;  %v249_v19 = vmax.f32 %v185_v7, 0.0  ;;  %563 = vst.msk [vmem:[%s1213_s3 + $0x20] sm:$0xf] %vm554_vm0, %v698_v9  ;;  %v702_v23 = vpack.c.bf16 %v246_v10, %v246_v10  ;;  %v115_v26 = vmul.f32 %v819_v1, %v44_v8 }
  0x25   :  { %v703_v24 = vpack.c.bf16 %v247_v11, %v247_v11  ;;  %v704_v25 = vpack.c.bf16 %v248_v12, %v248_v12  ;;  %564 = vst.msk [vmem:[%s1213_s3 + $0x24] sm:$0xf] %vm554_vm0, %v699_v16  ;;  %565 = vst.msk [vmem:[%s1213_s3 + $0x28] sm:$0xf] %vm554_vm0, %v700_v17  ;;  %v116_v29 = vmul.f32 %v819_v1, %v45_v13 }
  0x26   :  { %566 = vst.msk [vmem:[%s1213_s3 + $0x2c] sm:$0xf] %vm554_vm0, %v701_v18  ;;  %v705_v28 = vpack.c.bf16 %v249_v19, %v249_v19  ;;  %v117_v30 = vmul.f32 %v819_v1, %v46_v14  ;;  %v118_v31 = vmul.f32 %v819_v1, %v47_v15  ;;  %567 = vst.msk [vmem:[%s1213_s3 + $0x30] sm:$0xf] %vm554_vm0, %v702_v23 }
  0x27   :  { %568 = vst.msk [vmem:[%s1213_s3 + $0x34] sm:$0xf] %vm554_vm0, %v703_v24  ;;  %569 = vst.msk [vmem:[%s1213_s3 + $0x38] sm:$0xf] %vm554_vm0, %v704_v25  ;;  %v186_v32 = vadd.f32 %v824_v2, %v115_v26  ;;  %v119_v33 = vmul.f32 %v819_v1, %v48_v20  ;;  %v120_v34 = vmul.f32 %v819_v1, %v49_v21  ;;  %v60_v26 = vld [vmem:[#allocation2 + $0x100] sm:$0xff] }
  0x28   :  { %v121_v35 = vmul.f32 %v819_v1, %v50_v22  ;;  %570 = vst.msk [vmem:[%s1213_s3 + $0x3c] sm:$0xf] %vm554_vm0, %v705_v28  ;;  %v187_v36 = vadd.f32 %v824_v2, %v116_v29  ;;  %v188_v37 = vadd.f32 %v824_v2, %v117_v30  ;;  %v189_v38 = vadd.f32 %v824_v2, %v118_v31  ;;  %v61_v31 = vld [vmem:[#allocation2 + $0x108] sm:$0xff] }
  0x29   :  { %v122_v39 = vmul.f32 %v819_v1, %v51_v27  ;;  %v250_v40 = vmax.f32 %v186_v32, 0.0  ;;  %v190_v41 = vadd.f32 %v824_v2, %v119_v33  ;;  %v191_v42 = vadd.f32 %v824_v2, %v120_v34  ;;  %v62_v32 = vld [vmem:[#allocation2 + $0x110] sm:$0xff]  ;;  %v63_v33 = vld [vmem:[#allocation2 + $0x118] sm:$0xff] }
  0x2a   :  { %v192_v43 = vadd.f32 %v824_v2, %v121_v35  ;;  %v251_v44 = vmax.f32 %v187_v36, 0.0  ;;  %v252_v45 = vmax.f32 %v188_v37, 0.0  ;;  %v253_v46 = vmax.f32 %v189_v38, 0.0  ;;  %v64_v38 = vld [vmem:[#allocation2 + $0x120] sm:$0xff] }
  0x2b   :  { %v193_v47 = vadd.f32 %v824_v2, %v122_v39  ;;  %v706_v49 = vpack.c.bf16 %v250_v40, %v250_v40  ;;  %v254_v50 = vmax.f32 %v190_v41, 0.0  ;;  %v255_v51 = vmax.f32 %v191_v42, 0.0  ;;  %v65_v39 = vld [vmem:[#allocation2 + $0x128] sm:$0xff]  ;;  %v66_v40 = vld [vmem:[#allocation2 + $0x130] sm:$0xff] }
  0x2c   :  { %v256_v52 = vmax.f32 %v192_v43, 0.0  ;;  %v707_v56 = vpack.c.bf16 %v251_v44, %v251_v44  ;;  %v708_v57 = vpack.c.bf16 %v252_v45, %v252_v45  ;;  %v709_v58 = vpack.c.bf16 %v253_v46, %v253_v46  ;;  %v67_v45 = vld [vmem:[#allocation2 + $0x138] sm:$0xff] }
  0x2d   :  { %v257_v59 = vmax.f32 %v193_v47, 0.0  ;;  %571 = vst.msk [vmem:[%s1213_s3 + $0x40] sm:$0xf] %vm554_vm0, %v706_v49  ;;  %v710_v63 = vpack.c.bf16 %v254_v50, %v254_v50  ;;  %v711_v0 = vpack.c.bf16 %v255_v51, %v255_v51  ;;  %v123_v4 = vmul.f32 %v819_v1, %v52_v48 }
  0x2e   :  { %v712_v3 = vpack.c.bf16 %v256_v52, %v256_v52  ;;  %572 = vst.msk [vmem:[%s1213_s3 + $0x44] sm:$0xf] %vm554_vm0, %v707_v56  ;;  %573 = vst.msk [vmem:[%s1213_s3 + $0x48] sm:$0xf] %vm554_vm0, %v708_v57  ;;  %v124_v7 = vmul.f32 %v819_v1, %v53_v53  ;;  %v125_v8 = vmul.f32 %v819_v1, %v54_v54 }
  0x2f   :  { %574 = vst.msk [vmem:[%s1213_s3 + $0x4c] sm:$0xf] %vm554_vm0, %v709_v58  ;;  %v713_v6 = vpack.c.bf16 %v257_v59, %v257_v59  ;;  %v126_v9 = vmul.f32 %v819_v1, %v55_v55  ;;  %575 = vst.msk [vmem:[%s1213_s3 + $0x50] sm:$0xf] %vm554_vm0, %v710_v63  ;;  %v194_v10 = vadd.f32 %v824_v2, %v123_v4  ;;  %v68_v4 = vld [vmem:[#allocation2 + $0x140] sm:$0xff] }
  0x30   :  { %576 = vst.msk [vmem:[%s1213_s3 + $0x54] sm:$0xf] %vm554_vm0, %v711_v0  ;;  %577 = vst.msk [vmem:[%s1213_s3 + $0x58] sm:$0xf] %vm554_vm0, %v712_v3  ;;  %v127_v11 = vmul.f32 %v819_v1, %v56_v60  ;;  %v128_v12 = vmul.f32 %v819_v1, %v57_v61  ;;  %v129_v13 = vmul.f32 %v819_v1, %v58_v62 }
  0x31   :  { %578 = vst.msk [vmem:[%s1213_s3 + $0x5c] sm:$0xf] %vm554_vm0, %v713_v6  ;;  %v195_v14 = vadd.f32 %v824_v2, %v124_v7  ;;  %v196_v15 = vadd.f32 %v824_v2, %v125_v8  ;;  %v197_v16 = vadd.f32 %v824_v2, %v126_v9  ;;  %v130_v17 = vmul.f32 %v819_v1, %v59_v5  ;;  %v69_v9 = vld [vmem:[#allocation2 + $0x148] sm:$0xff] }
  0x32   :  { %v258_v18 = vmax.f32 %v194_v10, 0.0  ;;  %v198_v19 = vadd.f32 %v824_v2, %v127_v11  ;;  %v199_v20 = vadd.f32 %v824_v2, %v128_v12  ;;  %v200_v21 = vadd.f32 %v824_v2, %v129_v13  ;;  %v70_v10 = vld [vmem:[#allocation2 + $0x150] sm:$0xff]  ;;  %v71_v11 = vld [vmem:[#allocation2 + $0x158] sm:$0xff] }
  0x33   :  { %v259_v22 = vmax.f32 %v195_v14, 0.0  ;;  %v260_v23 = vmax.f32 %v196_v15, 0.0  ;;  %v261_v24 = vmax.f32 %v197_v16, 0.0  ;;  %v201_v25 = vadd.f32 %v824_v2, %v130_v17  ;;  %v72_v16 = vld [vmem:[#allocation2 + $0x160] sm:$0xff]  ;;  %v73_v17 = vld [vmem:[#allocation2 + $0x168] sm:$0xff] }
  0x34   :  { %v714_v27 = vpack.c.bf16 %v258_v18, %v258_v18  ;;  %v262_v28 = vmax.f32 %v198_v19, 0.0  ;;  %v263_v29 = vmax.f32 %v199_v20, 0.0  ;;  %v264_v30 = vmax.f32 %v200_v21, 0.0  ;;  %v74_v18 = vld [vmem:[#allocation2 + $0x170] sm:$0xff] }
  0x35   :  { %v715_v34 = vpack.c.bf16 %v259_v22, %v259_v22  ;;  %v716_v35 = vpack.c.bf16 %v260_v23, %v260_v23  ;;  %v717_v36 = vpack.c.bf16 %v261_v24, %v261_v24  ;;  %v265_v37 = vmax.f32 %v201_v25, 0.0  ;;  %v75_v23 = vld [vmem:[#allocation2 + $0x178] sm:$0xff] }
  0x36   :  { %579 = vst.msk [vmem:[%s1213_s3 + $0x60] sm:$0xf] %vm554_vm0, %v714_v27  ;;  %v718_v41 = vpack.c.bf16 %v262_v28, %v262_v28  ;;  %v719_v42 = vpack.c.bf16 %v263_v29, %v263_v29  ;;  %v720_v43 = vpack.c.bf16 %v264_v30, %v264_v30  ;;  %v131_v44 = vmul.f32 %v819_v1, %v60_v26 }
  0x37   :  { %580 = vst.msk [vmem:[%s1213_s3 + $0x64] sm:$0xf] %vm554_vm0, %v715_v34  ;;  %581 = vst.msk [vmem:[%s1213_s3 + $0x68] sm:$0xf] %vm554_vm0, %v716_v35  ;;  %v721_v46 = vpack.c.bf16 %v265_v37, %v265_v37  ;;  %v132_v47 = vmul.f32 %v819_v1, %v61_v31  ;;  %v133_v48 = vmul.f32 %v819_v1, %v62_v32 }
  0x38   :  { %582 = vst.msk [vmem:[%s1213_s3 + $0x6c] sm:$0xf] %vm554_vm0, %v717_v36  ;;  %v134_v49 = vmul.f32 %v819_v1, %v63_v33  ;;  %583 = vst.msk [vmem:[%s1213_s3 + $0x70] sm:$0xf] %vm554_vm0, %v718_v41  ;;  %v202_v50 = vadd.f32 %v824_v2, %v131_v44  ;;  %v135_v51 = vmul.f32 %v819_v1, %v64_v38  ;;  %v76_v44 = vld [vmem:[#allocation2 + $0x180] sm:$0xff] }
  0x39   :  { %584 = vst.msk [vmem:[%s1213_s3 + $0x74] sm:$0xf] %vm554_vm0, %v719_v42  ;;  %585 = vst.msk [vmem:[%s1213_s3 + $0x78] sm:$0xf] %vm554_vm0, %v720_v43  ;;  %v136_v52 = vmul.f32 %v819_v1, %v65_v39  ;;  %v137_v53 = vmul.f32 %v819_v1, %v66_v40  ;;  %v203_v54 = vadd.f32 %v824_v2, %v132_v47 }
  0x3a   :  { %586 = vst.msk [vmem:[%s1213_s3 + $0x7c] sm:$0xf] %vm554_vm0, %v721_v46  ;;  %v204_v55 = vadd.f32 %v824_v2, %v133_v48  ;;  %v205_v56 = vadd.f32 %v824_v2, %v134_v49  ;;  %v138_v57 = vmul.f32 %v819_v1, %v67_v45  ;;  %v266_v58 = vmax.f32 %v202_v50, 0.0  ;;  %v77_v49 = vld [vmem:[#allocation2 + $0x188] sm:$0xff]  ;;  %v78_v50 = vld [vmem:[#allocation2 + $0x190] sm:$0xff] }
  0x3b   :  { %v206_v59 = vadd.f32 %v824_v2, %v135_v51  ;;  %v207_v60 = vadd.f32 %v824_v2, %v136_v52  ;;  %v208_v61 = vadd.f32 %v824_v2, %v137_v53  ;;  %v267_v62 = vmax.f32 %v203_v54, 0.0  ;;  %v79_v51 = vld [vmem:[#allocation2 + $0x198] sm:$0xff] }
  0x3c   :  { %v268_v63 = vmax.f32 %v204_v55, 0.0  ;;  %v269_v0 = vmax.f32 %v205_v56, 0.0  ;;  %v209_v3 = vadd.f32 %v824_v2, %v138_v57  ;;  %v722_v5 = vpack.c.bf16 %v266_v58, %v266_v58  ;;  %v80_v56 = vld [vmem:[#allocation2 + $0x1a0] sm:$0xff]  ;;  %v81_v57 = vld [vmem:[#allocation2 + $0x1a8] sm:$0xff]  ;;  %v82_v58 = vld [vmem:[#allocation2 + $0x1b0] sm:$0xff] }
  0x3d   :  { %v270_v6 = vmax.f32 %v206_v59, 0.0  ;;  %v271_v7 = vmax.f32 %v207_v60, 0.0  ;;  %v272_v8 = vmax.f32 %v208_v61, 0.0  ;;  %v723_v12 = vpack.c.bf16 %v267_v62, %v267_v62 }
  0x3e   :  { %v724_v13 = vpack.c.bf16 %v268_v63, %v268_v63  ;;  %v725_v14 = vpack.c.bf16 %v269_v0, %v269_v0  ;;  %v273_v15 = vmax.f32 %v209_v3, 0.0  ;;  %587 = vst.msk [vmem:[%s1213_s3 + $0x80] sm:$0xf] %vm554_vm0, %v722_v5  ;;  %v139_v22 = vmul.f32 %v819_v1, %v68_v4  ;;  %v83_v63 = vld [vmem:[#allocation2 + $0x1b8] sm:$0xff] }
  0x3f   :  { %v726_v19 = vpack.c.bf16 %v270_v6, %v270_v6  ;;  %v727_v20 = vpack.c.bf16 %v271_v7, %v271_v7  ;;  %v728_v21 = vpack.c.bf16 %v272_v8, %v272_v8  ;;  %588 = vst.msk [vmem:[%s1213_s3 + $0x84] sm:$0xf] %vm554_vm0, %v723_v12  ;;  %v140_v25 = vmul.f32 %v819_v1, %v69_v9 }
  0x40   :  { %589 = vst.msk [vmem:[%s1213_s3 + $0x88] sm:$0xf] %vm554_vm0, %v724_v13  ;;  %590 = vst.msk [vmem:[%s1213_s3 + $0x8c] sm:$0xf] %vm554_vm0, %v725_v14  ;;  %v729_v24 = vpack.c.bf16 %v273_v15, %v273_v15  ;;  %v141_v26 = vmul.f32 %v819_v1, %v70_v10  ;;  %v142_v27 = vmul.f32 %v819_v1, %v71_v11 }
  0x41   :  { %591 = vst.msk [vmem:[%s1213_s3 + $0x90] sm:$0xf] %vm554_vm0, %v726_v19  ;;  %592 = vst.msk [vmem:[%s1213_s3 + $0x94] sm:$0xf] %vm554_vm0, %v727_v20  ;;  %v210_v28 = vadd.f32 %v824_v2, %v139_v22  ;;  %v143_v29 = vmul.f32 %v819_v1, %v72_v16  ;;  %v144_v30 = vmul.f32 %v819_v1, %v73_v17  ;;  %v84_v22 = vld [vmem:[#allocation2 + $0x1c0] sm:$0xff] }
  0x42   :  { %593 = vst.msk [vmem:[%s1213_s3 + $0x98] sm:$0xf] %vm554_vm0, %v728_v21  ;;  %v145_v31 = vmul.f32 %v819_v1, %v74_v18  ;;  %594 = vst.msk [vmem:[%s1213_s3 + $0x9c] sm:$0xf] %vm554_vm0, %v729_v24  ;;  %v211_v32 = vadd.f32 %v824_v2, %v140_v25  ;;  %v212_v33 = vadd.f32 %v824_v2, %v141_v26 }
  0x43   :  { %v213_v34 = vadd.f32 %v824_v2, %v142_v27  ;;  %v146_v35 = vmul.f32 %v819_v1, %v75_v23  ;;  %v274_v36 = vmax.f32 %v210_v28, 0.0  ;;  %v214_v37 = vadd.f32 %v824_v2, %v143_v29  ;;  %v85_v27 = vld [vmem:[#allocation2 + $0x1c8] sm:$0xff]  ;;  %v86_v28 = vld [vmem:[#allocation2 + $0x1d0] sm:$0xff]  ;;  %v87_v29 = vld [vmem:[#allocation2 + $0x1d8] sm:$0xff] }
  0x44   :  { %v215_v38 = vadd.f32 %v824_v2, %v144_v30  ;;  %v216_v39 = vadd.f32 %v824_v2, %v145_v31  ;;  %v275_v40 = vmax.f32 %v211_v32, 0.0  ;;  %v276_v41 = vmax.f32 %v212_v33, 0.0 }
  0x45   :  { %v277_v42 = vmax.f32 %v213_v34, 0.0  ;;  %v217_v43 = vadd.f32 %v824_v2, %v146_v35  ;;  %v730_v45 = vpack.c.bf16 %v274_v36, %v274_v36  ;;  %v278_v46 = vmax.f32 %v214_v37, 0.0  ;;  %v88_v34 = vld [vmem:[#allocation2 + $0x1e0] sm:$0xff]  ;;  %v89_v35 = vld [vmem:[#allocation2 + $0x1e8] sm:$0xff]  ;;  %v90_v36 = vld [vmem:[#allocation2 + $0x1f0] sm:$0xff] }
  0x46   :  { %v279_v47 = vmax.f32 %v215_v38, 0.0  ;;  %v280_v48 = vmax.f32 %v216_v39, 0.0  ;;  %v731_v52 = vpack.c.bf16 %v275_v40, %v275_v40  ;;  %v732_v53 = vpack.c.bf16 %v276_v41, %v276_v41  ;;  %v91_v41 = vld [vmem:[#allocation2 + $0x1f8] sm:$0xff] }
  0x47   :  { %v733_v54 = vpack.c.bf16 %v277_v42, %v277_v42  ;;  %v281_v55 = vmax.f32 %v217_v43, 0.0  ;;  %595 = vst.msk [vmem:[%s1213_s3 + $0xa0] sm:$0xf] %vm554_vm0, %v730_v45  ;;  %v734_v59 = vpack.c.bf16 %v278_v46, %v278_v46  ;;  %v147_v62 = vmul.f32 %v819_v1, %v76_v44 }
  0x48   :  { %v735_v60 = vpack.c.bf16 %v279_v47, %v279_v47  ;;  %v736_v61 = vpack.c.bf16 %v280_v48, %v280_v48  ;;  %596 = vst.msk [vmem:[%s1213_s3 + $0xa4] sm:$0xf] %vm554_vm0, %v731_v52  ;;  %597 = vst.msk [vmem:[%s1213_s3 + $0xa8] sm:$0xf] %vm554_vm0, %v732_v53  ;;  %v148_v3 = vmul.f32 %v819_v1, %v77_v49 }
  0x49   :  { %598 = vst.msk [vmem:[%s1213_s3 + $0xac] sm:$0xf] %vm554_vm0, %v733_v54  ;;  %v737_v0 = vpack.c.bf16 %v281_v55, %v281_v55  ;;  %v149_v4 = vmul.f32 %v819_v1, %v78_v50  ;;  %v150_v5 = vmul.f32 %v819_v1, %v79_v51  ;;  %599 = vst.msk [vmem:[%s1213_s3 + $0xb0] sm:$0xf] %vm554_vm0, %v734_v59 }
  0x4a   :  { %600 = vst.msk [vmem:[%s1213_s3 + $0xb4] sm:$0xf] %vm554_vm0, %v735_v60  ;;  %601 = vst.msk [vmem:[%s1213_s3 + $0xb8] sm:$0xf] %vm554_vm0, %v736_v61  ;;  %v218_v6 = vadd.f32 %v824_v2, %v147_v62  ;;  %v151_v7 = vmul.f32 %v819_v1, %v80_v56  ;;  %v152_v8 = vmul.f32 %v819_v1, %v81_v57 }
  0x4b   :  { %v153_v9 = vmul.f32 %v819_v1, %v82_v58  ;;  %602 = vst.msk [vmem:[%s1213_s3 + $0xbc] sm:$0xf] %vm554_vm0, %v737_v0  ;;  %v219_v10 = vadd.f32 %v824_v2, %v148_v3  ;;  %v220_v11 = vadd.f32 %v824_v2, %v149_v4  ;;  %v221_v12 = vadd.f32 %v824_v2, %v150_v5 }
  0x4c   :  { %v154_v13 = vmul.f32 %v819_v1, %v83_v63  ;;  %v282_v14 = vmax.f32 %v218_v6, 0.0  ;;  %v222_v15 = vadd.f32 %v824_v2, %v151_v7  ;;  %v223_v16 = vadd.f32 %v824_v2, %v152_v8 }
  0x4d   :  { %v224_v17 = vadd.f32 %v824_v2, %v153_v9  ;;  %v283_v18 = vmax.f32 %v219_v10, 0.0  ;;  %v284_v19 = vmax.f32 %v220_v11, 0.0  ;;  %v285_v20 = vmax.f32 %v221_v12, 0.0 }
  0x4e   :  { %v225_v21 = vadd.f32 %v824_v2, %v154_v13  ;;  %v738_v23 = vpack.c.bf16 %v282_v14, %v282_v14  ;;  %v286_v24 = vmax.f32 %v222_v15, 0.0  ;;  %v287_v25 = vmax.f32 %v223_v16, 0.0 }
  0x4f   :  { %v288_v26 = vmax.f32 %v224_v17, 0.0  ;;  %v739_v30 = vpack.c.bf16 %v283_v18, %v283_v18  ;;  %v740_v31 = vpack.c.bf16 %v284_v19, %v284_v19  ;;  %v741_v32 = vpack.c.bf16 %v285_v20, %v285_v20 }
  0x50   :  { %v289_v33 = vmax.f32 %v225_v21, 0.0  ;;  %603 = vst.msk [vmem:[%s1213_s3 + $0xc0] sm:$0xf] %vm554_vm0, %v738_v23  ;;  %v742_v37 = vpack.c.bf16 %v286_v24, %v286_v24  ;;  %v743_v38 = vpack.c.bf16 %v287_v25, %v287_v25  ;;  %v155_v40 = vmul.f32 %v819_v1, %v84_v22 }
  0x51   :  { %v744_v39 = vpack.c.bf16 %v288_v26, %v288_v26  ;;  %604 = vst.msk [vmem:[%s1213_s3 + $0xc4] sm:$0xf] %vm554_vm0, %v739_v30  ;;  %605 = vst.msk [vmem:[%s1213_s3 + $0xc8] sm:$0xf] %vm554_vm0, %v740_v31  ;;  %v156_v43 = vmul.f32 %v819_v1, %v85_v27  ;;  %v157_v44 = vmul.f32 %v819_v1, %v86_v28 }
  0x52   :  { %606 = vst.msk [vmem:[%s1213_s3 + $0xcc] sm:$0xf] %vm554_vm0, %v741_v32  ;;  %v745_v42 = vpack.c.bf16 %v289_v33, %v289_v33  ;;  %v158_v45 = vmul.f32 %v819_v1, %v87_v29  ;;  %607 = vst.msk [vmem:[%s1213_s3 + $0xd0] sm:$0xf] %vm554_vm0, %v742_v37  ;;  %v226_v46 = vadd.f32 %v824_v2, %v155_v40 }
  0x53   :  { %608 = vst.msk [vmem:[%s1213_s3 + $0xd4] sm:$0xf] %vm554_vm0, %v743_v38  ;;  %609 = vst.msk [vmem:[%s1213_s3 + $0xd8] sm:$0xf] %vm554_vm0, %v744_v39  ;;  %v159_v47 = vmul.f32 %v819_v1, %v88_v34  ;;  %v160_v48 = vmul.f32 %v819_v1, %v89_v35  ;;  %v161_v49 = vmul.f32 %v819_v1, %v90_v36 }
  0x54   :  { %610 = vst.msk [vmem:[%s1213_s3 + $0xdc] sm:$0xf] %vm554_vm0, %v745_v42  ;;  %v227_v50 = vadd.f32 %v824_v2, %v156_v43  ;;  %v228_v51 = vadd.f32 %v824_v2, %v157_v44  ;;  %v229_v52 = vadd.f32 %v824_v2, %v158_v45  ;;  %v162_v53 = vmul.f32 %v819_v1, %v91_v41 }
  0x55   :  { %v290_v54 = vmax.f32 %v226_v46, 0.0  ;;  %v230_v55 = vadd.f32 %v824_v2, %v159_v47  ;;  %v231_v56 = vadd.f32 %v824_v2, %v160_v48  ;;  %v232_v57 = vadd.f32 %v824_v2, %v161_v49 }
  0x56   :  { %v291_v58 = vmax.f32 %v227_v50, 0.0  ;;  %v292_v59 = vmax.f32 %v228_v51, 0.0  ;;  %v293_v60 = vmax.f32 %v229_v52, 0.0  ;;  %v233_v61 = vadd.f32 %v824_v2, %v162_v53 }
  0x57   :  { %v746_v62 = vpack.c.bf16 %v290_v54, %v290_v54  ;;  %v294_v63 = vmax.f32 %v230_v55, 0.0  ;;  %v295_v0 = vmax.f32 %v231_v56, 0.0  ;;  %v296_v3 = vmax.f32 %v232_v57, 0.0 }
  0x58   :  { %v747_v4 = vpack.c.bf16 %v291_v58, %v291_v58  ;;  %v748_v5 = vpack.c.bf16 %v292_v59, %v292_v59  ;;  %v749_v6 = vpack.c.bf16 %v293_v60, %v293_v60  ;;  %v297_v1 = vmax.f32 %v233_v61, 0.0 }
  0x59   :  { %611 = vst.msk [vmem:[%s1213_s3 + $0xe0] sm:$0xf] %vm554_vm0, %v746_v62  ;;  %v750_v7 = vpack.c.bf16 %v294_v63, %v294_v63  ;;  %v751_v8 = vpack.c.bf16 %v295_v0, %v295_v0  ;;  %v752_v9 = vpack.c.bf16 %v296_v3, %v296_v3 }
  0x5a   :  { %612 = vst.msk [vmem:[%s1213_s3 + $0xe4] sm:$0xf] %vm554_vm0, %v747_v4  ;;  %613 = vst.msk [vmem:[%s1213_s3 + $0xe8] sm:$0xf] %vm554_vm0, %v748_v5  ;;  %v753_v2 = vpack.c.bf16 %v297_v1, %v297_v1 }
  0x5b   :  { %614 = vst.msk [vmem:[%s1213_s3 + $0xec] sm:$0xf] %vm554_vm0, %v749_v6  ;;  %615 = vst.msk [vmem:[%s1213_s3 + $0xf0] sm:$0xf] %vm554_vm0, %v750_v7 }
  0x5c   :  { %616 = vst.msk [vmem:[%s1213_s3 + $0xf4] sm:$0xf] %vm554_vm0, %v751_v8  ;;  %617 = vst.msk [vmem:[%s1213_s3 + $0xf8] sm:$0xf] %vm554_vm0, %v752_v9 }
  0x5d   :  { %618 = vst.msk [vmem:[%s1213_s3 + $0xfc] sm:$0xf] %vm554_vm0, %v753_v2 }
  0x5e   :  { %623 = vsyncpa [#allocation3], 1 }

// kernel: preactivation_block_forward.4
= control target key start
LH: loop header
LB: loop body
LE: loop exit
PB: predicated region body
PF: predicated region fallthrough
CT: control target
= control target key end

     0   :  { %vm110_vm0 = vcmask 523264   ;;  %s444_s1 = inlined_call_operand.vmem [shape: bf16[64,128], index: 1, kind: input, shape index: {}]   ;;  %s445_s0 = inlined_call_operand.vmem [shape: bf16[128,64], index: 0, kind: input, shape index: {}]   ;;  %s446_s2 = inlined_call_operand.vmem [shape: f32[1,128], index: 2, kind: input, shape index: {}]   ;;  %s447_s3 = inlined_call_operand.vmem [shape: f32[128,128], index: 3, kind: output, shape index: {}]  }
   0x1   :  { %v317_v0 = vld [vmem:[%s444_s1] sm:$0xff]   ;;  %v318_v1 = vld [vmem:[%s444_s1 + $0x8] sm:$0xff]   ;;  %v319_v2 = vld [vmem:[%s444_s1 + $0x10] sm:$0xff]  }
   0x2   :  { %285 = vmatprep.subr.bf16.mxu0 %v317_v0  ;;  %309 = vmatprep.subr.bf16.mxu1 %v317_v0  ;;  %v321_v3 = vld [vmem:[%s445_s0] sm:$0xff]   ;;  %v320_v5 = vld [vmem:[%s444_s1 + $0x18] sm:$0xff]   ;;  %v323_v6 = vld [vmem:[%s445_s0 + $0x8] sm:$0xff]  }
   0x3   :  { %286 = vmatpush3.bf16.msra.mxu0 %v317_v0  ;;  %313 = vmatpush3.bf16.msra.mxu1 %v317_v0  ;;  %v322_v4 = vld [vmem:[%s445_s0 + $0x20] sm:$0xff]   ;;  %v324_v7 = vld [vmem:[%s445_s0 + $0x28] sm:$0xff]   ;;  %v325_v8 = vld [vmem:[%s445_s0 + $0x10] sm:$0xff]  }
   0x4   :  { %287 = vmatprep.subr.bf16.mxu0 %v318_v1  ;;  %310 = vmatprep.subr.bf16.mxu1 %v318_v1  ;;  %v326_v9 = vld [vmem:[%s445_s0 + $0x30] sm:$0xff]   ;;  %v327_v10 = vld [vmem:[%s445_s0 + $0x18] sm:$0xff]   ;;  %v252_v12 = vld [vmem:[%s446_s2] ss:$0 sm:$0xff] }
   0x5   :  { %293 = vmatprep.mubr.msk.bf16.mxu0 %vm110_vm0, %v321_v3  ;;  %301 = vmatprep.mubr.msk.bf16.mxu1 %vm110_vm0, %v322_v4  ;;  %v328_v11 = vld [vmem:[%s445_s0 + $0x38] sm:$0xff]  }
   0x7   :  { %288 = vmatpush3.bf16.msra.mxu0 %v318_v1  ;;  %314 = vmatpush3.bf16.msra.mxu1 %v318_v1 }
   0x8   :  { %289 = vmatprep.subr.bf16.mxu0 %v319_v2  ;;  %311 = vmatprep.subr.bf16.mxu1 %v319_v2 }
   0xb   :  { %290 = vmatpush3.bf16.msra.mxu0 %v319_v2  ;;  %315 = vmatpush3.bf16.msra.mxu1 %v319_v2 }
   0xc   :  { %291 = vmatprep.subr.bf16.mxu0 %v320_v5  ;;  %312 = vmatprep.subr.bf16.mxu1 %v320_v5 }
   0xf   :  { %292 = vmatpush3.bf16.msra.mxu0 %v320_v5  ;;  %316 = vmatpush3.bf16.msra.mxu1 %v320_v5 }
  0x12   :  { %294 = vmatmul.mubr.msk.bf16.vlgmr.msra.gmra.mrb[0].mxu0 %vm110_vm0, %v323_v6  ;;  %302 = vmatmul.mubr.msk.bf16.vlgmr.msra.gmra.mrb[0].mxu1 %vm110_vm0, %v324_v7 }
  0x13   :  { %297 = vmatprep.mubr.msk.bf16.mxu0 %vm110_vm0, %v325_v8  ;;  %305 = vmatprep.mubr.msk.bf16.mxu1 %vm110_vm0, %v326_v9 }
  0x1a   :  { %298 = vmatmul.mubr.msk.bf16.gmra.mrb[4].mxu0 %vm110_vm0, %v327_v10  ;;  %306 = vmatmul.mubr.msk.bf16.gmra.mrb[4].mxu1 %vm110_vm0, %v328_v11 }
  0xe5   :  { %v295_v13 = vpop.f32.mrb[0].mxu0  ;;  %v303_v14 = vpop.f32.mrb[0].mxu1 }
  0xe6   :  { %v178_v15 = vadd.f32 %v295_v13, %v252_v12  ;;  %v210_v16 = vadd.f32 %v303_v14, %v252_v12  ;;  %v169_v17 = vpop.f32.mrb[1].mxu0  ;;  %v201_v18 = vpop.f32.mrb[1].mxu1 }
  0xe7   :  { %v170_v19 = vadd.f32 %v252_v12, %v169_v17  ;;  %v202_v20 = vadd.f32 %v252_v12, %v201_v18  ;;  %v296_v21 = vpop.f32.mrb[2].mxu0  ;;  %v304_v22 = vpop.f32.mrb[2].mxu1 }
  0xe8   :  { %234 = vst [vmem:[%s447_s3 + $0x10] sm:$0xff] %v178_v15  ;;  %242 = vst [vmem:[%s447_s3 + $0x50] sm:$0xff] %v210_v16  ;;  %v181_v23 = vadd.f32 %v296_v21, %v252_v12  ;;  %v213_v24 = vadd.f32 %v304_v22, %v252_v12  ;;  %v172_v25 = vpop.f32.mrb[3].mxu0  ;;  %v204_v26 = vpop.f32.mrb[3].mxu1 }
  0xe9   :  { %232 = vst [vmem:[%s447_s3] sm:$0xff] %v170_v19  ;;  %240 = vst [vmem:[%s447_s3 + $0x40] sm:$0xff] %v202_v20  ;;  %v173_v27 = vadd.f32 %v252_v12, %v172_v25  ;;  %v205_v28 = vadd.f32 %v252_v12, %v204_v26 }
  0xea   :  { %235 = vst [vmem:[%s447_s3 + $0x18] sm:$0xff] %v181_v23  ;;  %243 = vst [vmem:[%s447_s3 + $0x58] sm:$0xff] %v213_v24 }
  0xeb   :  { %233 = vst [vmem:[%s447_s3 + $0x8] sm:$0xff] %v173_v27  ;;  %241 = vst [vmem:[%s447_s3 + $0x48] sm:$0xff] %v205_v28 }
  0xed   :  { %v299_v29 = vpop.f32.mrb[4].mxu0  ;;  %v307_v30 = vpop.f32.mrb[4].mxu1 }
  0xee   :  { %v194_v31 = vadd.f32 %v299_v29, %v252_v12  ;;  %v226_v32 = vadd.f32 %v307_v30, %v252_v12  ;;  %v185_v33 = vpop.f32.mrb[5].mxu0  ;;  %v217_v34 = vpop.f32.mrb[5].mxu1 }
  0xef   :  { %v186_v35 = vadd.f32 %v252_v12, %v185_v33  ;;  %v218_v36 = vadd.f32 %v252_v12, %v217_v34  ;;  %v300_v37 = vpop.f32.mrb[6].mxu0  ;;  %v308_v38 = vpop.f32.mrb[6].mxu1 }
  0xf0   :  { %238 = vst [vmem:[%s447_s3 + $0x30] sm:$0xff] %v194_v31  ;;  %246 = vst [vmem:[%s447_s3 + $0x70] sm:$0xff] %v226_v32  ;;  %v197_v39 = vadd.f32 %v300_v37, %v252_v12  ;;  %v229_v40 = vadd.f32 %v308_v38, %v252_v12  ;;  %v188_v41 = vpop.f32.mrb[7].mxu0  ;;  %v220_v42 = vpop.f32.mrb[7].mxu1 }
  0xf1   :  { %236 = vst [vmem:[%s447_s3 + $0x20] sm:$0xff] %v186_v35  ;;  %244 = vst [vmem:[%s447_s3 + $0x60] sm:$0xff] %v218_v36  ;;  %v189_v43 = vadd.f32 %v252_v12, %v188_v41  ;;  %v221_v44 = vadd.f32 %v252_v12, %v220_v42 }
  0xf2   :  { %239 = vst [vmem:[%s447_s3 + $0x38] sm:$0xff] %v197_v39  ;;  %247 = vst [vmem:[%s447_s3 + $0x78] sm:$0xff] %v229_v40 }
  0xf3   :  { %237 = vst [vmem:[%s447_s3 + $0x28] sm:$0xff] %v189_v43  ;;  %245 = vst [vmem:[%s447_s3 + $0x68] sm:$0xff] %v221_v44 }

// kernel: preactivation_block_forward.6
= control target key start
LH: loop header
LB: loop body
LE: loop exit
PB: predicated region body
PF: predicated region fallthrough
CT: control target
= control target key end

     0   :  { %s2795_s15 = smov 0   ;;  %s3290_s0 = inlined_call_operand.vmem [shape: bf16[2,324,64], index: 0, kind: input, shape index: {}]   ;;  %s3291_s1 = inlined_call_operand.vmem [shape: bf16[9,64,128], index: 1, kind: input, shape index: {}]   ;;  %s3292_s2 = inlined_call_operand.vmem [shape: f32[1,128], index: 2, kind: input, shape index: {}]   ;;  %s3293_s3 = inlined_call_operand.vmem [shape: f32[1,128], index: 3, kind: input, shape index: {}]   ;;  %s3294_s4 = inlined_call_operand.vmem [shape: bf16[2,71,128], index: 4, kind: output, shape index: {}]  }
   0x1 LB: > { %s1955_s16 = sadd.s32 4294967295, %s2766_s15   ;;  %p1959_p0 = scmp.ge.s32.totalorder %s2766_s15, 1  ;;  %s2766_s15 = sphi %s2795_s15, %s14_s15  }
   0x2   : > { %p162_p1 = scmp.lt.s32.totalorder %s2766_s15, 3 }
   0x4   : > { %p163_p2 = pnand %p1959_p0, %p162_p1 }
   0x5   : > { %v2689_v0 = vld [vmem:[%s3291_s1 + $0x20] sm:$0xff] (!%p163_p2)   ;;  %v2768_v1 = vmov (!%p163_p2), 0.0   ;;  %v2691_v3 = vld [vmem:[%s3291_s1 + $0x28] sm:$0xff] (!%p163_p2)   ;;  %vm2769_vm0 = vmmov (!%p163_p2), 0   ;;  %p188_p3 = scmp.lt.s32.totalorder (!%p163_p2), %s1955_s16, 1  ;;  %v2693_v5 = vld [vmem:[%s3291_s1 + $0x30] sm:$0xff] (!%p163_p2)  }
   0x6   : > { %166 = sbr.rel (%p163_p2) target bundleno = 425 (0x1a9), region = 36  ;;  %2268 = vmatprep.subr.bf16.mxu1 (!%p163_p2), %v2768_v1  ;;  %2380 = vmatprep.subr.bf16.mxu0 (!%p163_p2), %v2768_v1  ;;  %v2811_v2 = vld [vmem:[%s3291_s1 + $0x80] sm:$0xff] (!%p163_p2)   ;;  %v2823_v4 = vld [vmem:[%s3291_s1 + $0x88] sm:$0xff] (!%p163_p2)   ;;  %v2839_v6 = vld [vmem:[%s3291_s1 + $0x90] sm:$0xff] (!%p163_p2)   ;;  %vm321_vm1 = vcmask (!%p163_p2), 523264   ;;  %vm750_vm4 = vcmask (!%p163_p2), 1046528  }
   0x7   : > { %2269 = vmatpush3.bf16.msra.mxu1 (!%p163_p2), %v2689_v0  ;;  %2276 = vmatprep.mubr.msk.bf16.mxu1 (!%p163_p2), %vm2769_vm0, %v2768_v1  ;;  %v2695_v7 = vld [vmem:[%s3291_s1 + $0x38] sm:$0xff] (!%p163_p2)   ;;  %vm257_vm2 = vsmask.f32 (!%p163_p2), 7424  ;;  %vm924_vm3 = vsmask.f32 (!%p163_p2), 6400  ;;  %v2701_v22 = vld [vmem:[%s3291_s1] sm:$0xff] (!%p163_p2)  }
   0x8   : > { %2381 = vmatpush3.bf16.msra.mxu0 (!%p163_p2), %v2811_v2  ;;  %2270 = vmatprep.subr.bf16.mxu1 (!%p163_p2), %v2768_v1  ;;  %v2853_v8 = vld [vmem:[%s3291_s1 + $0x98] sm:$0xff] (!%p163_p2)   ;;  %v2702_v29 = vld [vmem:[%s3291_s1 + $0xa0] sm:$0xff] (!%p163_p2)   ;;  %v2703_v38 = vld [vmem:[%s3291_s1 + $0xa8] sm:$0xff] (!%p163_p2)   ;;  %vm1894_vm5 = vcmask (!%p163_p2), 1043456   ;;  %vm1895_vm6 = vsmask.f32 (!%p163_p2), 3328 }
   0x9   : > { %2382 = vmatprep.subr.bf16.mxu0 (!%p163_p2), %v2768_v1  ;;  %2388 = vmatprep.mubr.msk.bf16.mxu0 (!%p163_p2), %vm2769_vm0, %v2768_v1  ;;  %v2707_v41 = vld [vmem:[%s3291_s1 + $0x8] sm:$0xff] (!%p163_p2)   ;;  %v2712_v50 = vld [vmem:[%s3291_s1 + $0x10] sm:$0xff] (!%p163_p2)   ;;  %v2708_v0 = vld [vmem:[%s3291_s1 + $0xb8] sm:$0xff] (!%p163_p2)  }
   0xa   : > { %v2706_v53 = vld [vmem:[%s3291_s1 + $0xb0] sm:$0xff] (!%p163_p2)   ;;  %vm1896_vm7 = vmand (!%p163_p2), %vm1894_vm5, %vm1895_vm6 }
   0xb   : > { %2271 = vmatpush3.bf16.msra.mxu1 (!%p163_p2), %v2691_v3 }
   0xc   : > { %2383 = vmatpush3.bf16.msra.mxu0 (!%p163_p2), %v2823_v4  ;;  %2272 = vmatprep.subr.bf16.mxu1 (!%p163_p2), %v2768_v1 }
   0xd   : > { %s3296_s16 = smov (!%p188_p3, %s1955_s16), 1  ;;  %2384 = vmatprep.subr.bf16.mxu0 %v2768_v1 }
   0xe   : > { %s2677_s27 = smul.u32 164, %s3296_s16 }
   0xf   : > { %2273 = vmatpush3.bf16.msra.mxu1 %v2693_v5  ;;  %s2678_s26 = smul.u32 36, %s3296_s16 }
  0x10   : > { %s2848_s8 = scalar_lea.vmem %s3290_s0, %s2677_s27  ;;  %2385 = vmatpush3.bf16.msra.mxu0 %v2839_v6  ;;  %2274 = vmatprep.subr.bf16.mxu1 %v2768_v1 }
  0x11   : > { %v2697_v9 = vld [vmem:[%s2848_s8 + $0x28] sm:$0xff]   ;;  %v2698_v10 = vld [vmem:[%s2848_s8 + $0x30] sm:$0xff]   ;;  %2386 = vmatprep.subr.bf16.mxu0 %v2768_v1  ;;  %v2700_v14 = vld [vmem:[%s2848_s8 + $0x80] sm:$0xff]   ;;  %s3265_s29 = scalar_lea.vmem %s3294_s4, %s2678_s26 }
  0x12   : > { %v259_v11 = vshrl.u32 %v2697_v9, 16  ;;  %v261_v12 = vshll.u32 %v2697_v9, 16  ;;  %v266_v13 = vshll.u32 %v2698_v10, 16  ;;  %v2699_v15 = vld [vmem:[%s2848_s8 + $0x78] sm:$0xfe]   ;;  %v934_v18 = vshrl.u32 %v2700_v14, 16 }
  0x13   : > { %2275 = vmatpush3.bf16.msra.mxu1 %v2695_v7  ;;  %v937_v19 = vshll.u32 %v2700_v14, 16  ;;  %v926_v20 = vshrl.u32 %v2699_v15, 16  ;;  %v929_v21 = vshll.u32 %v2699_v15, 16  ;;  %v270_v23 = vshrl.u32 %v2698_v10, 16  ;;  %v2704_v32 = vld [vmem:[%s2848_s8 + $0x38] sm:$0xff]   ;;  %v2705_v34 = vld [vmem:[%s2848_s8 + $0x88] sm:$0xff]  }
  0x14   : > { %v263_v16 = vrot.slane %v261_v12, 1  ;;  %v268_v17 = vrot.slane %v266_v13, 1  ;;  %2387 = vmatpush3.bf16.msra.mxu0 %v2853_v8  ;;  %2296 = vmatprep.subr.bf16.mxu1 %v2768_v1  ;;  %v936_v25 = vrot.slane %v934_v18, 1  ;;  %v274_v36 = vshll.u32 %v2704_v32, 16  ;;  %v2709_v43 = vld [vmem:[%s2848_s8 + $0x40] sm:$0xff]   ;;  %v2890_v47 = vld [vmem:[%s2848_s8 + $0x58] sm:$0xff]  }
  0x15   : > { %v939_v26 = vrot.slane %v937_v19, 2  ;;  %2408 = vmatprep.subr.bf16.mxu0 %v2768_v1  ;;  %v928_v27 = vrot.slane %v926_v20, 1  ;;  %v931_v28 = vrot.slane %v929_v21, 2  ;;  %v943_v39 = vshrl.u32 %v2705_v34, 16  ;;  %v2900_v52 = vld [vmem:[%s2848_s8 + $0x50] sm:$0xfe]  }
  0x16   : > { %v264_v24 = vor.u32 %v263_v16, %v259_v11  ;;  %v272_v35 = vor.u32 %v270_v23, %v268_v17  ;;  %v946_v40 = vshll.u32 %v2705_v34, 16  ;;  %v276_v42 = vrot.slane %v274_v36, 1  ;;  %v2713_v63 = vld [vmem:[%s2848_s8 + $0x48] ss:$0 sps:$4 sm:$0xff]   ;;  %v2921_v7 = vld [vmem:[%s2848_s8 + $0x60] sm:$0xff]   ;;  %v2716_v9 = vld [vmem:[%s3291_s1 + $0x18] sm:$0xff]  }
  0x17   : > { %v940_v31 = vor.u32 %v939_v26, %v936_v25  ;;  %v932_v33 = vor.u32 %v931_v28, %v928_v27  ;;  %v945_v44 = vrot.slane %v943_v39, 1  ;;  %v278_v46 = vshrl.u32 %v2704_v32, 16  ;;  %v2715_v21 = vld [vmem:[%s3291_s1 + $0xc0] sm:$0xff]   ;;  %v2718_v26 = vld [vmem:[%s3291_s1 + $0xc8] sm:$0xff]  }
  0x18   : > { %v269_v30 = vsel %vm257_vm2, %v264_v24, %v268_v17  ;;  %v948_v45 = vrot.slane %v946_v40, 2  ;;  %v277_v48 = vsel %vm257_vm2, %v272_v35, %v276_v42  ;;  %v282_v49 = vshll.u32 %v2709_v43, 16  ;;  %v2935_v17 = vld [vmem:[%s2848_s8 + $0x68] sm:$0xff]  }
  0x19   : > { %2277 = vmatmul.mubr.msk.bf16.vlgmr.msra.gmra.mrb[0].mxu1 %vm321_vm1, %v269_v30  ;;  %v941_v37 = vsel %vm924_vm3, %v932_v33, %v940_v31  ;;  %v1107_v55 = vshrl.u32 %v2890_v47, 16  ;;  %v1110_v56 = vshll.u32 %v2890_v47, 16  ;;  %v1099_v58 = vshrl.u32 %v2900_v52, 16  ;;  %v2722_v33 = vld [vmem:[%s3291_s1 + $0xd0] sm:$0xff]  }
  0x1a   : > { %2297 = vmatpush3.bf16.msra.mxu1 %v2701_v22  ;;  %2280 = vmatprep.mubr.msk.bf16.mxu1 %vm2769_vm0, %v2768_v1  ;;  %v2897_v51 = vor.u32 %v948_v45, %v945_v44  ;;  %v284_v54 = vrot.slane %v282_v49, 1  ;;  %v1102_v59 = vshll.u32 %v2900_v52, 16  ;;  %v280_v60 = vor.u32 %v278_v46, %v276_v42  ;;  %v2721_v45 = vld [vmem:[%s3291_s1 + $0x40] sm:$0xff]   ;;  %v2724_v49 = vld [vmem:[%s3291_s1 + $0x48] sm:$0xff]  }
  0x1b   : > { %2298 = vmatprep.subr.bf16.mxu1 %v2768_v1  ;;  %2389 = vmatmul.mubr.msk.bf16.vlgmr.msra.gmra.mrb[0].mxu0 %vm321_vm1, %v941_v37  ;;  %v1109_v61 = vrot.slane %v1107_v55, 1  ;;  %v1112_v62 = vrot.slane %v1110_v56, 2  ;;  %v1101_v3 = vrot.slane %v1099_v58, 1  ;;  %v1116_v12 = vshrl.u32 %v2921_v7, 16  ;;  %v2725_v37 = vld [vmem:[%s3291_s1 + $0xd8] sm:$0xff]   ;;  %v2729_v55 = vld [vmem:[%s3291_s1 + $0x50] sm:$0xff]  }
  0x1c   : > { %2409 = vmatpush3.bf16.msra.mxu0 %v2702_v29  ;;  %2392 = vmatprep.mubr.msk.bf16.mxu0 %vm2769_vm0, %v2768_v1  ;;  %v950_v57 = vsel %vm924_vm3, %v940_v31, %v2897_v51  ;;  %v1104_v5 = vrot.slane %v1102_v59, 2  ;;  %v1119_v13 = vshll.u32 %v2921_v7, 16  ;;  %v285_v14 = vsel %vm257_vm2, %v280_v60, %v284_v54  ;;  %v2957_v29 = vld [vmem:[%s2848_s8 + $0x70] sm:$0x1f]  }
  0x1d   : > { %2410 = vmatprep.subr.bf16.mxu0 %v2768_v1  ;;  %v1113_v11 = vor.u32 %v1112_v62, %v1109_v61  ;;  %v286_v15 = vshrl.u32 %v2709_v43, 16  ;;  %v290_v16 = vshll.u32 %v2713_v63, 16  ;;  %v1118_v19 = vrot.slane %v1116_v12, 1  ;;  %v2985_v43 = vld [vmem:[%s2848_s8] sm:$0xff]   ;;  %v2733_v61 = vld [vmem:[%s3291_s1 + $0x58] sm:$0xff]   ;;  %v3021_v62 = vld [vmem:[%s2848_s8 + $0x10] sm:$0xff]  }
  0x1e   : > { %2299 = vmatpush3.bf16.msra.mxu1 %v2707_v41  ;;  %v1105_v10 = vor.u32 %v1104_v5, %v1101_v3  ;;  %v1121_v20 = vrot.slane %v1119_v13, 2  ;;  %v1125_v24 = vshrl.u32 %v2935_v17, 16  ;;  %v1128_v25 = vshll.u32 %v2935_v17, 16 }
  0x1f   : > { %2300 = vmatprep.subr.bf16.mxu1 %v2768_v1  ;;  %v288_v22 = vor.u32 %v286_v15, %v284_v54  ;;  %v292_v23 = vrot.slane %v290_v16, 1  ;;  %v294_v30 = vshrl.u32 %v2713_v63, 16  ;;  %v1134_v35 = vshrl.u32 %v2957_v29, 16  ;;  %v2732_v15 = vld [vmem:[%s3291_s1 + $0xe0] sm:$0xff]   ;;  %v3058_v16 = vld [vmem:[%s2848_s8 + $0x18] sm:$0xff]  }
  0x20   : > { %2411 = vmatpush3.bf16.msra.mxu0 %v2703_v38  ;;  %v1114_v18 = vsel %vm924_vm3, %v1105_v10, %v1113_v11  ;;  %v1122_v27 = vor.u32 %v1121_v20, %v1118_v19  ;;  %v1127_v31 = vrot.slane %v1125_v24, 1  ;;  %v1130_v32 = vrot.slane %v1128_v25, 2  ;;  %v2735_v19 = vld [vmem:[%s2848_s8 + $0x1c] sm:$0xff]   ;;  %v2736_v20 = vld [vmem:[%s3291_s1 + $0xe8] sm:$0xff]   ;;  %v2739_v24 = vld [vmem:[%s3291_s1 + $0xf0] sm:$0xff]  }
  0x21   : > { %2281 = vmatmul.mubr.msk.bf16.gmra.mrb[4].mxu1 %vm321_vm1, %v277_v48  ;;  %2412 = vmatprep.subr.bf16.mxu0 %v2768_v1  ;;  %v293_v28 = vsel %vm257_vm2, %v288_v22, %v292_v23  ;;  %v1137_v36 = vshll.u32 %v2957_v29, 16  ;;  %v296_v38 = vor.u32 %v294_v30, %v292_v23  ;;  %v1136_v41 = vrot.slane %v1134_v35, 1  ;;  %v2727_v48 = vld [vmem:[%s2848_s8 + $0x4] sm:$0xff]  }
  0x22   : > { %2284 = vmatprep.mubr.msk.bf16.mxu1 %vm2769_vm0, %v2768_v1  ;;  %2301 = vmatpush3.bf16.msra.mxu1 %v2712_v50  ;;  %v1123_v34 = vsel %vm924_vm3, %v1113_v11, %v1122_v27  ;;  %v1131_v39 = vor.u32 %v1130_v32, %v1127_v31  ;;  %v2728_v50 = vld [vmem:[%s2848_s8 + $0xc] sm:$0xff]   ;;  %v1306_v54 = vshll.u32 %v2727_v48, 16  ;;  %v751_v58 = vrot.slane %v2900_v52, 1  ;;  %v2737_v30 = vld [vmem:[%s2848_s8 + $0x24] ss:$0 sps:$4 sm:$0xff]   ;;  %v2741_v31 = vld [vmem:[%s3291_s1 + $0xf8] sm:$0xff]  }
  0x23   : > { %2393 = vmatmul.mubr.msk.bf16.gmra.mrb[4].mxu0 %vm321_vm1, %v950_v57  ;;  %2302 = vmatprep.subr.bf16.mxu1 %v2768_v1  ;;  %v1139_v42 = vrot.slane %v1137_v36, 2  ;;  %v1311_v56 = vshll.u32 %v2728_v50, 16  ;;  %v1304_v57 = vshrl.u32 %v2727_v48, 16  ;;  %v752_v60 = vrot.slane %v2890_v47, 1  ;;  %v2731_v47 = vld [vmem:[%s2848_s8 + $0x14] sm:$0xff]  }
  0x24   : > { %2413 = vmatpush3.bf16.msra.mxu0 %v2706_v53  ;;  %2416 = vmatprep.mubr.msk.bf16.mxu0 %vm2769_vm0, %v2768_v1  ;;  %v1132_v40 = vsel %vm924_vm3, %v1122_v27, %v1131_v39  ;;  %v3005_v53 = vld [vmem:[%s2848_s8 + $0x8] sm:$0xff]   ;;  %v1308_v59 = vrot.slane %v1306_v54, 1  ;;  %v756_v3 = vrot.slane %v2935_v17, 1  ;;  %v1315_v11 = vshrl.u32 %v2728_v50, 16 }
  0x25   : > { %2414 = vmatprep.subr.bf16.mxu0 %v2768_v1  ;;  %v1140_v44 = vor.u32 %v1139_v42, %v1136_v41  ;;  %v1313_v63 = vrot.slane %v1311_v56, 1  ;;  %v3025_v52 = vsel %vm750_vm4, %v751_v58, %v752_v60  ;;  %v1323_v22 = vshrl.u32 %v2731_v47, 16  ;;  %v2740_v50 = vld [vmem:[%s3291_s1 + $0x68] sm:$0xff]  }
  0x26   : > { %2303 = vmatpush3.bf16.msra.mxu1 %v2716_v9  ;;  %v1309_v5 = vor.u32 %v1308_v59, %v1304_v57  ;;  %v1327_v23 = vshll.u32 %v2735_v19, 16  ;;  %v554_v25 = vshll.u32 %v2985_v43, 16  ;;  %v558_v32 = vshll.u32 %v3005_v53, 16  ;;  %v2744_v57 = vld [vmem:[%s3291_s1 + $0x70] sm:$0xff]  }
  0x27   : > { %2324 = vmatprep.subr.bf16.mxu1 %v2768_v1  ;;  %v1141_v46 = vsel %vm924_vm3, %v1131_v39, %v1140_v44  ;;  %v1317_v17 = vor.u32 %v1315_v11, %v1313_v63  ;;  %v1331_v36 = vshrl.u32 %v2735_v19, 16  ;;  %v572_v56 = vshll.u32 %v3058_v16, 16  ;;  %v2742_v59 = vld [vmem:[%s2848_s8 + $0x2c] sm:$0xfe]  }
  0x28   : > { %2415 = vmatpush3.bf16.msra.mxu0 %v2708_v0  ;;  %v754_v0 = vrot.slane %v2921_v7, 1  ;;  %v758_v7 = vrot.slane %v2957_v29, 1  ;;  %v1314_v13 = vsel %vm257_vm2, %v1309_v5, %v1313_v63  ;;  %v576_v5 = vshrl.u32 %v3058_v16, 16  ;;  %v2749_v19 = vld [vmem:[%s3291_s1 + $0x108] sm:$0xff]  }
  0x29   : > { %2285 = vmatmul.mubr.msk.bf16.gmra.mrb[8].mxu1 %vm321_vm1, %v285_v14  ;;  %2436 = vmatprep.subr.bf16.mxu0 %v2768_v1  ;;  %v1319_v14 = vshll.u32 %v2731_v47, 16  ;;  %v574_v63 = vrot.slane %v572_v56, 1 }
  0x2a   : > { %2288 = vmatprep.mubr.msk.bf16.mxu1 %vm2769_vm0, %v2768_v1  ;;  %v3034_v9 = vsel %vm750_vm4, %v752_v60, %v754_v0  ;;  %v3037_v10 = vsel %vm750_vm4, %v754_v0, %v756_v3  ;;  %v3044_v12 = vsel %vm750_vm4, %v756_v3, %v758_v7  ;;  %v2743_v60 = vld [vmem:[%s2848_s8 + $0x34] sm:$0xff]   ;;  %v1506_v0 = vrot.slane %v2742_v59, 1 }
  0x2b   : > { %2417 = vmatmul.mubr.msk.bf16.vlgmr.msra.gmra.mrb[0].mxu0 %vm321_vm1, %v1114_v18  ;;  %v1321_v18 = vrot.slane %v1319_v14, 1  ;;  %v1507_v47 = vrot.slane %v2743_v60, 1  ;;  %v2745_v14 = vld [vmem:[%s2848_s8 + $0x3c] sm:$0xff]  }
  0x2c   : > { %2420 = vmatprep.mubr.msk.bf16.mxu0 %vm2769_vm0, %v2768_v1  ;;  %2437 = vmatpush3.bf16.msra.mxu0 %v2715_v21 }
  0x2d   : > { %2438 = vmatprep.subr.bf16.mxu0 %v2768_v1  ;;  %v1322_v21 = vsel %vm257_vm2, %v1317_v17, %v1321_v18  ;;  %v1325_v27 = vor.u32 %v1323_v22, %v1321_v18  ;;  %v578_v17 = vor.u32 %v576_v5, %v574_v63  ;;  %v1509_v18 = vrot.slane %v2745_v14, 1 }
  0x30   : > { %2439 = vmatpush3.bf16.msra.mxu0 %v2718_v26  ;;  %v3079_v26 = vld [vmem:[%s2848_s8 + $0x20] ss:$0 sps:$4 sm:$0xff]  }
  0x31   : > { %2289 = vmatmul.mubr.msk.bf16.gmra.mrb[12].mxu1 %vm321_vm1, %v293_v28  ;;  %2440 = vmatprep.subr.bf16.mxu0 %v2768_v1  ;;  %v1329_v28 = vrot.slane %v1327_v23, 1  ;;  %v579_v11 = vshll.u32 %v3079_v26, 16  ;;  %v583_v22 = vshrl.u32 %v3079_v26, 16  ;;  %v2748_v23 = vld [vmem:[%s2848_s8 + $0x44] sm:$0xff]  }
  0x32   : > { %2292 = vmatprep.mubr.msk.bf16.mxu1 %vm2769_vm0, %v2768_v1 }
  0x33   : > { %2421 = vmatmul.mubr.msk.bf16.gmra.mrb[4].mxu0 %vm321_vm1, %v1123_v34  ;;  %v556_v34 = vrot.slane %v554_v25, 1  ;;  %v1330_v35 = vsel %vm257_vm2, %v1325_v27, %v1329_v28  ;;  %v1511_v27 = vrot.slane %v2748_v23, 1 }
  0x34   : > { %2424 = vmatprep.mubr.msk.bf16.mxu0 %vm2769_vm0, %v2768_v1  ;;  %2441 = vmatpush3.bf16.msra.mxu0 %v2722_v33  ;;  %v552_v33 = vshrl.u32 %v2985_v43, 16 }
  0x35   : > { %2442 = vmatprep.subr.bf16.mxu0 %v2768_v1 }
  0x36   : > { %v557_v39 = vor.u32 %v556_v34, %v552_v33  ;;  %v2755_v34 = vld [vmem:[%s2848_s8 + $0x14] sm:$0xff]  }
  0x38   : > { %2443 = vmatpush3.bf16.msra.mxu0 %v2725_v37  ;;  %v1335_v37 = vshll.u32 %v2737_v30, 16 }
  0x39   : > { %2293 = vmatmul.mubr.msk.bf16.gmra.mrb[16].mxu1 %vm321_vm1, %v296_v38  ;;  %2464 = vmatprep.subr.bf16.mxu0 %v2768_v1  ;;  %v560_v38 = vrot.slane %v558_v32, 1 }
  0x3a   : > { %2304 = vmatprep.mubr.msk.bf16.mxu1 %vm2769_vm0, %v2768_v1  ;;  %v1337_v41 = vrot.slane %v1335_v37, 1 }
  0x3b   : > { %2425 = vmatmul.mubr.msk.bf16.gmra.mrb[8].mxu0 %vm321_vm1, %v1132_v40  ;;  %v1333_v40 = vor.u32 %v1331_v36, %v1329_v28  ;;  %v561_v42 = vsel %vm257_vm2, %v557_v39, %v560_v38  ;;  %v1512_v28 = vsel %vm750_vm4, %v1509_v18, %v1511_v27 }
  0x3c   : > { %2428 = vmatprep.mubr.msk.bf16.mxu0 %vm2769_vm0, %v2768_v1 }
  0x41   : > { %2305 = vmatmul.mubr.msk.bf16.vlgmr.msra.gmra.mrb[0].mxu1 %vm321_vm1, %v2985_v43  ;;  %v2738_v43 = vld [vmem:[%s3291_s1 + $0x60] sm:$0xff]  }
  0x42   : > { %2325 = vmatpush3.bf16.msra.mxu1 %v2721_v45  ;;  %2308 = vmatprep.mubr.msk.bf16.mxu1 %vm2769_vm0, %v2768_v1  ;;  %v565_v45 = vshll.u32 %v3021_v62, 16 }
  0x43   : > { %2326 = vmatprep.subr.bf16.mxu1 %v2768_v1  ;;  %2429 = vmatmul.mubr.msk.bf16.gmra.mrb[12].mxu0 %vm321_vm1, %v1141_v46  ;;  %v1338_v46 = vsel %vm257_vm2, %v1333_v40, %v1337_v41 }
  0x44   : > { %2432 = vmatprep.mubr.msk.bf16.mxu0 %vm2769_vm0, %v2768_v1 }
  0x46   : > { %2327 = vmatpush3.bf16.msra.mxu1 %v2724_v49  ;;  %v567_v49 = vrot.slane %v565_v45, 1 }
  0x47   : > { %2328 = vmatprep.subr.bf16.mxu1 %v2768_v1 }
  0x49   : > { %2309 = vmatmul.mubr.msk.bf16.gmra.mrb[4].mxu1 %vm321_vm1, %v3005_v53 }
  0x4a   : > { %2312 = vmatprep.mubr.msk.bf16.mxu1 %vm2769_vm0, %v2768_v1  ;;  %2329 = vmatpush3.bf16.msra.mxu1 %v2729_v55  ;;  %v569_v55 = vshrl.u32 %v3021_v62, 16 }
  0x4b   : > { %2330 = vmatprep.subr.bf16.mxu1 %v2768_v1  ;;  %2433 = vmatmul.mubr.msk.bf16.gmra.mrb[16].mxu0 %vm321_vm1, %v1140_v44  ;;  %v562_v44 = vshrl.u32 %v3005_v53, 16  ;;  %v1339_v53 = vshrl.u32 %v2737_v30, 16  ;;  %v2750_v30 = vld [vmem:[%s2848_s8 + $0x4c] sm:$0x1f]  }
  0x4c   : > { %2444 = vmatprep.mubr.msk.bf16.mxu0 %vm2769_vm0, %v2768_v1 }
  0x4d   : > { %v564_v48 = vor.u32 %v562_v44, %v560_v38  ;;  %v1341_v58 = vor.u32 %v1339_v53, %v1337_v41  ;;  %v2759_v41 = vld [vmem:[%s2848_s8 + $0x98] sm:$0x1f]  }
  0x4e   : > { %2331 = vmatpush3.bf16.msra.mxu1 %v2733_v61  ;;  %v571_v61 = vor.u32 %v569_v55, %v567_v49  ;;  %v961_v44 = vshrl.u32 %v2759_v41, 16  ;;  %v964_v45 = vshll.u32 %v2759_v41, 16 }
  0x4f   : > { %2352 = vmatprep.subr.bf16.mxu1 %v2768_v1  ;;  %v568_v54 = vsel %vm257_vm2, %v564_v48, %v567_v49 }
  0x50   : > { %v575_v3 = vsel %vm257_vm2, %v571_v61, %v574_v63  ;;  %v963_v48 = vrot.slane %v961_v44, 1  ;;  %v3250_v63 = vld [vmem:[%s3292_s2] ss:$0 sm:$0xff] }
  0x51   : > { %2313 = vmatmul.mubr.msk.bf16.gmra.mrb[8].mxu1 %vm321_vm1, %v3021_v62  ;;  %v2747_v62 = vld [vmem:[%s3291_s1 + $0x78] sm:$0xff]  }
  0x52   : > { %2316 = vmatprep.mubr.msk.bf16.mxu1 %vm2769_vm0, %v2768_v1 }
  0x53   : > { %2445 = vmatmul.mubr.msk.bf16.vlgmr.msra.gmra.mrb[0].mxu0 %vm321_vm1, %v1314_v13  ;;  %v1508_v13 = vsel %vm750_vm4, %v1506_v0, %v1507_v47  ;;  %v3255_v0 = vld [vmem:[%s3293_s3] ss:$0 sm:$0xff] }
  0x54   : > { %2448 = vmatprep.mubr.msk.bf16.mxu0 %vm2769_vm0, %v2768_v1  ;;  %2465 = vmatpush3.bf16.msra.mxu0 %v2732_v15  ;;  %v2746_v15 = vld [vmem:[%s3291_s1 + $0x100] sm:$0xff]  }
  0x55   : > { %2466 = vmatprep.subr.bf16.mxu0 %v2768_v1 }
  0x58   : > { %2467 = vmatpush3.bf16.msra.mxu0 %v2736_v20 }
  0x59   : > { %2317 = vmatmul.mubr.msk.bf16.gmra.mrb[12].mxu1 %vm321_vm1, %v3058_v16  ;;  %2468 = vmatprep.subr.bf16.mxu0 %v2768_v1  ;;  %v581_v16 = vrot.slane %v579_v11, 1 }
  0x5a   : > { %2320 = vmatprep.mubr.msk.bf16.mxu1 %vm2769_vm0, %v2768_v1 }
  0x5b   : > { %2449 = vmatmul.mubr.msk.bf16.gmra.mrb[4].mxu0 %vm321_vm1, %v1322_v21  ;;  %v582_v20 = vsel %vm257_vm2, %v578_v17, %v581_v16  ;;  %v1510_v21 = vsel %vm750_vm4, %v1507_v47, %v1509_v18  ;;  %v585_v25 = vor.u32 %v583_v22, %v581_v16 }
  0x5c   : > { %2452 = vmatprep.mubr.msk.bf16.mxu0 %vm2769_vm0, %v2768_v1  ;;  %2469 = vmatpush3.bf16.msra.mxu0 %v2739_v24  ;;  %v2751_v24 = vld [vmem:[%s3291_s1 + $0x110] sm:$0xff]  }
  0x5d   : > { %2470 = vmatprep.subr.bf16.mxu0 %v2768_v1 }
  0x60   : > { %2471 = vmatpush3.bf16.msra.mxu0 %v2741_v31  ;;  %v1513_v31 = vrot.slane %v2750_v30, 1 }
  0x61   : > { %2321 = vmatmul.mubr.msk.bf16.gmra.mrb[16].mxu1 %vm321_vm1, %v3079_v26  ;;  %2492 = vmatprep.subr.bf16.mxu0 %v2768_v1  ;;  %v2752_v26 = vld [vmem:[%s3291_s1 + $0x118] sm:$0xff]  }
  0x62   : > { %2332 = vmatprep.mubr.msk.bf16.mxu1 %vm2769_vm0, %v2768_v1  ;;  %v1514_v32 = vsel %vm750_vm4, %v1511_v27, %v1513_v31 }
  0x63   : > { %2453 = vmatmul.mubr.msk.bf16.gmra.mrb[8].mxu0 %vm321_vm1, %v1330_v35  ;;  %v2757_v35 = vld [vmem:[%s2848_s8 + $0x90] sm:$0xff]  }
  0x64   : > { %2456 = vmatprep.mubr.msk.bf16.mxu0 %vm2769_vm0, %v2768_v1  ;;  %v952_v36 = vshrl.u32 %v2757_v35, 16  ;;  %v955_v37 = vshll.u32 %v2757_v35, 16 }
  0x66   : > { %v954_v39 = vrot.slane %v952_v36, 1  ;;  %v957_v40 = vrot.slane %v955_v37, 2 }
  0x69   : > { %2333 = vmatmul.mubr.msk.bf16.vlgmr.msra.gmra.mrb[0].mxu1 %vm321_vm1, %v561_v42  ;;  %v2758_v42 = vld [vmem:[%s2848_s8 + $0x24] sm:$0x1f]  }
  0x6a   : > { %2353 = vmatpush3.bf16.msra.mxu1 %v2738_v43  ;;  %2336 = vmatprep.mubr.msk.bf16.mxu1 %vm2769_vm0, %v2768_v1  ;;  %v958_v43 = vor.u32 %v957_v40, %v954_v39 }
  0x6b   : > { %2354 = vmatprep.subr.bf16.mxu1 %v2768_v1  ;;  %2457 = vmatmul.mubr.msk.bf16.gmra.mrb[12].mxu0 %vm321_vm1, %v1338_v46  ;;  %v1686_v46 = vrot.slane %v2758_v42, 1 }
  0x6c   : > { %2460 = vmatprep.mubr.msk.bf16.mxu0 %vm2769_vm0, %v2768_v1  ;;  %v959_v29 = vsel %vm924_vm3, %v2897_v51, %v958_v43 }
  0x6e   : > { %2355 = vmatpush3.bf16.msra.mxu1 %v2740_v50 }
  0x6f   : > { %2356 = vmatprep.subr.bf16.mxu1 %v2768_v1 }
  0x71   : > { %2337 = vmatmul.mubr.msk.bf16.gmra.mrb[4].mxu1 %vm321_vm1, %v568_v54 }
  0x72   : > { %2340 = vmatprep.mubr.msk.bf16.mxu1 %vm2769_vm0, %v2768_v1  ;;  %2357 = vmatpush3.bf16.msra.mxu1 %v2744_v57 }
  0x73   : > { %2358 = vmatprep.subr.bf16.mxu1 %v2768_v1  ;;  %2461 = vmatmul.mubr.msk.bf16.gmra.mrb[16].mxu0 %vm321_vm1, %v1341_v58 }
  0x74   : > { %2472 = vmatprep.mubr.msk.bf16.mxu0 %vm2769_vm0, %v2768_v1 }
  0x76   : > { %2359 = vmatpush3.bf16.msra.mxu1 %v2747_v62 }
  0x77   : > { %2520 = vmatprep.subr.bf16.mxu1 %v2768_v1 }
  0x79   : > { %2341 = vmatmul.mubr.msk.bf16.gmra.mrb[8].mxu1 %vm321_vm1, %v575_v3 }
  0x7a   : > { %2344 = vmatprep.mubr.msk.bf16.mxu1 %vm2769_vm0, %v2768_v1 }
  0x7b   : > { %2473 = vmatmul.mubr.msk.bf16.vlgmr.msra.gmra.mrb[0].mxu0 %vm321_vm1, %v1508_v13 }
  0x7c   : > { %2476 = vmatprep.mubr.msk.bf16.mxu0 %vm2769_vm0, %v2768_v1  ;;  %2493 = vmatpush3.bf16.msra.mxu0 %v2746_v15 }
  0x7d   : > { %2494 = vmatprep.subr.bf16.mxu0 %v2768_v1 }
  0x80   : > { %2495 = vmatpush3.bf16.msra.mxu0 %v2749_v19 }
  0x81   : > { %2345 = vmatmul.mubr.msk.bf16.gmra.mrb[12].mxu1 %vm321_vm1, %v582_v20  ;;  %2496 = vmatprep.subr.bf16.mxu0 %v2768_v1 }
  0x82   : > { %2348 = vmatprep.mubr.msk.bf16.mxu1 %vm2769_vm0, %v2768_v1 }
  0x83   : > { %2477 = vmatmul.mubr.msk.bf16.gmra.mrb[4].mxu0 %vm321_vm1, %v1510_v21 }
  0x84   : > { %2480 = vmatprep.mubr.msk.bf16.mxu0 %vm2769_vm0, %v2768_v1  ;;  %2497 = vmatpush3.bf16.msra.mxu0 %v2751_v24 }
  0x85   : > { %2498 = vmatprep.subr.bf16.mxu0 %v2768_v1 }
  0x88   : > { %2499 = vmatpush3.bf16.msra.mxu0 %v2752_v26 }
  0x89   : > { %2349 = vmatmul.mubr.msk.bf16.gmra.mrb[16].mxu1 %vm321_vm1, %v585_v25 }
  0x8a   : > { %2360 = vmatprep.mubr.msk.bf16.mxu1 %vm2769_vm0, %v2768_v1 }
  0x8b   : > { %2481 = vmatmul.mubr.msk.bf16.gmra.mrb[8].mxu0 %vm321_vm1, %v1512_v28 }
  0x8c   : > { %2484 = vmatprep.mubr.msk.bf16.mxu0 %vm2769_vm0, %v2768_v1 }
  0x91   : > { %2361 = vmatmul.mubr.msk.bf16.vlgmr.msra.gmra.mrb[0].mxu1 %vm321_vm1, %v3025_v52  ;;  %v2753_v52 = vld [vmem:[%s2848_s8 + $0x4] sm:$0xfe]  }
  0x92   : > { %2524 = vmatpush3.bf16.msra.mxu1 %v2811_v2  ;;  %2364 = vmatprep.mubr.msk.bf16.mxu1 %vm2769_vm0, %v2768_v1  ;;  %v2754_v2 = vld [vmem:[%s2848_s8 + $0xc] sm:$0xff]  }
  0x93   : > { %2521 = vmatprep.subr.bf16.mxu1 %v2768_v1  ;;  %2485 = vmatmul.mubr.msk.bf16.gmra.mrb[12].mxu0 %vm321_vm1, %v1514_v32  ;;  %v1680_v33 = vrot.slane %v2754_v2, 1 }
  0x94   : > { %2488 = vmatprep.mubr.msk.bf16.mxu0 %vm2769_vm0, %v2768_v1 }
  0x96   : > { %2525 = vmatpush3.bf16.msra.mxu1 %v2823_v4  ;;  %v1679_v4 = vrot.slane %v2753_v52, 1 }
  0x97   : > { %2522 = vmatprep.subr.bf16.mxu1 %v2768_v1 }
  0x99   : > { %2365 = vmatmul.mubr.msk.bf16.gmra.mrb[4].mxu1 %vm321_vm1, %v3034_v9  ;;  %v1681_v9 = vsel %vm750_vm4, %v1679_v4, %v1680_v33 }
  0x9a   : > { %2368 = vmatprep.mubr.msk.bf16.mxu1 %vm2769_vm0, %v2768_v1  ;;  %2526 = vmatpush3.bf16.msra.mxu1 %v2839_v6  ;;  %v1682_v6 = vrot.slane %v2755_v34, 1 }
  0x9b   : > { %2523 = vmatprep.subr.bf16.mxu1 %v2768_v1  ;;  %2489 = vmatmul.mubr.msk.bf16.gmra.mrb[16].mxu0 %vm321_vm1, %v1513_v31 }
  0x9c   : > { %2500 = vmatprep.mubr.msk.bf16.mxu0 %vm2769_vm0, %v2768_v1 }
  0x9e   : > { %2527 = vmatpush3.bf16.msra.mxu1 %v2853_v8  ;;  %v1683_v8 = vsel %vm750_vm4, %v1680_v33, %v1682_v6 }
  0xa1   : > { %2369 = vmatmul.mubr.msk.bf16.gmra.mrb[8].mxu1 %vm321_vm1, %v3037_v10  ;;  %v2756_v10 = vld [vmem:[%s2848_s8 + $0x1c] sm:$0xff]  }
  0xa2   : > { %2372 = vmatprep.mubr.msk.bf16.mxu1 %vm2769_vm0, %v2768_v1  ;;  %v1684_v38 = vrot.slane %v2756_v10, 1 }
  0xa3   : > { %2501 = vmatmul.mubr.msk.bf16.vlgmr.msra.gmra.mrb[0].mxu0 %vm321_vm1, %v1681_v9 }
  0xa4   : > { %2504 = vmatprep.mubr.msk.bf16.mxu0 %vm2769_vm0, %v2768_v1  ;;  %v1687_v49 = vsel %vm750_vm4, %v1684_v38, %v1686_v46 }
  0xa9   : > { %2373 = vmatmul.mubr.msk.bf16.gmra.mrb[12].mxu1 %vm321_vm1, %v3044_v12  ;;  %v1685_v12 = vsel %vm750_vm4, %v1682_v6, %v1684_v38 }
  0xaa   : > { %2376 = vmatprep.mubr.msk.bf16.mxu1 %vm2769_vm0, %v2768_v1 }
  0xab   : > { %2505 = vmatmul.mubr.msk.bf16.gmra.mrb[4].mxu0 %vm321_vm1, %v1683_v8 }
  0xac   : > { %2508 = vmatprep.mubr.msk.bf16.mxu0 %vm2769_vm0, %v2768_v1 }
  0xb1   : > { %2377 = vmatmul.mubr.msk.bf16.gmra.mrb[16].mxu1 %vm321_vm1, %v758_v7  ;;  %v966_v7 = vrot.slane %v964_v45, 2 }
  0xb2   : > { %2396 = vmatprep.mubr.msk.bf16.mxu1 %vm2769_vm0, %v2768_v1 }
  0xb3   : > { %2509 = vmatmul.mubr.msk.bf16.gmra.mrb[8].mxu0 %vm321_vm1, %v1685_v12  ;;  %v967_v50 = vor.u32 %v966_v7, %v963_v48 }
  0xb4   : > { %2512 = vmatprep.mubr.msk.bf16.mxu0 %vm2769_vm0, %v2768_v1 }
  0xb5   : > { %v968_v53 = vsel %vm924_vm3, %v958_v43, %v967_v50 }
  0xb9   : > { %2397 = vmatmul.mubr.msk.bf16.vlgmr.msra.gmra.mrb[8].mxu1 %vm321_vm1, %v959_v29 }
  0xba   : > { %2400 = vmatprep.mubr.msk.bf16.mxu1 %vm2769_vm0, %v2768_v1 }
  0xbb   : > { %2513 = vmatmul.mubr.msk.bf16.gmra.mrb[12].mxu0 %vm321_vm1, %v1687_v49 }
  0xbc   : > { %2516 = vmatprep.mubr.msk.bf16.mxu0 %vm2769_vm0, %v2768_v1 }
  0xc1   : > { %2401 = vmatmul.mubr.msk.bf16.gmra.mrb[12].mxu1 %vm321_vm1, %v968_v53 }
  0xc2   : > { %2404 = vmatprep.mubr.msk.bf16.mxu1 %vm2769_vm0, %v2768_v1 }
  0xc3   : > { %2517 = vmatmul.mubr.msk.bf16.gmra.mrb[16].mxu0 %vm321_vm1, %v1686_v46 }
  0xc9   : > { %2405 = vmatmul.mubr.msk.bf16.gmra.mrb[16].mxu1 %vm321_vm1, %v967_v50 }
 0x164   : > { %v833_v51 = vpop.f32.mrb[0].mxu1 }
 0x165   : > { %v2362_v54 = vpop.f32.mrb[1].mxu1 }
 0x166   : > { %v836_v55 = vpop.f32.mrb[2].mxu1 }
 0x167   : > { %v2363_v56 = vpop.f32.mrb[3].mxu1 }
 0x16c   : > { %v841_v57 = vpop.f32.mrb[4].mxu1 }
 0x16d   : > { %v2366_v58 = vpop.f32.mrb[5].mxu1 }
 0x16e   : > { %v844_v59 = vpop.f32.mrb[6].mxu1 }
 0x16f   : > { %v2367_v60 = vpop.f32.mrb[7].mxu1 }
 0x176   : > { %v1761_v61 = vpop.f32.mrb[0].mxu0 }
 0x177   : > { %v2528_v1 = vadd.f32 %v1761_v61, %v833_v51  ;;  %v2502_v62 = vpop.f32.mrb[1].mxu0 }
 0x178   : > { %v1764_v47 = vpop.f32.mrb[2].mxu0 }
 0x179   : > { %v1815_v3 = vmul.f32 %v2528_v1, %v3250_v63  ;;  %v2529_v5 = vadd.f32 %v1764_v47, %v836_v55  ;;  %v2503_v11 = vpop.f32.mrb[3].mxu0 }
 0x17b   : > { %v1831_v13 = vadd.f32 %v3255_v0, %v1815_v3  ;;  %v1816_v14 = vmul.f32 %v2529_v5, %v3250_v63 }
 0x17d   : > { %v1832_v15 = vadd.f32 %v3255_v0, %v1816_v14  ;;  %v1840_v16 = vmax.f32 %v1831_v13, 0.0 }
 0x17e   : > { %v1769_v17 = vpop.f32.mrb[4].mxu0 }
 0x17f   : > { %v1841_v18 = vmax.f32 %v1832_v15, 0.0  ;;  %v2530_v19 = vadd.f32 %v1769_v17, %v841_v57  ;;  %v2506_v20 = vpop.f32.mrb[5].mxu0  ;;  %v1897_v17 = vld [vmem:[%s3265_s29 + $0x20] sm:$0xf] }
 0x180   : > { %v1772_v21 = vpop.f32.mrb[6].mxu0 }
 0x181   : > { %v2167_v22 = vpack.c.bf16 %v1841_v18, %v1840_v16  ;;  %v1817_v23 = vmul.f32 %v2530_v19, %v3250_v63  ;;  %v2531_v24 = vadd.f32 %v1772_v21, %v844_v59  ;;  %v2507_v25 = vpop.f32.mrb[7].mxu0 }
 0x183   : > { %2168 = vst [vmem:[%s3265_s29] sm:$0xff] %v2167_v22   ;;  %v1833_v27 = vadd.f32 %v3255_v0, %v1817_v23  ;;  %v1818_v26 = vmul.f32 %v2531_v24, %v3250_v63 }
 0x185   : > { %v1834_v28 = vadd.f32 %v3255_v0, %v1818_v26  ;;  %v1842_v31 = vmax.f32 %v1833_v27, 0.0 }
 0x186   : > { %v1777_v30 = vpop.f32.mrb[8].mxu0 }
 0x187   : > { %v1843_v32 = vmax.f32 %v1834_v28, 0.0  ;;  %v2510_v52 = vpop.f32.mrb[9].mxu0 }
 0x188   : > { %v1780_v2 = vpop.f32.mrb[10].mxu0 }
 0x189   : > { %v2172_v4 = vpack.c.bf16 %v1843_v32, %v1842_v31  ;;  %v2511_v33 = vpop.f32.mrb[11].mxu0 }
 0x18b   : > { %2184 = vst [vmem:[%s3265_s29 + $0x8] sm:$0xff] %v2172_v4  }
 0x18c   : > { %v1058_v9 = vpop.f32.mrb[8].mxu1 }
 0x18d   : > { %v2532_v34 = vadd.f32 %v1777_v30, %v1058_v9  ;;  %v2398_v6 = vpop.f32.mrb[9].mxu1 }
 0x18e   : > { %v1061_v35 = vpop.f32.mrb[10].mxu1  ;;  %v1785_v10 = vpop.f32.mrb[12].mxu0 }
 0x18f   : > { %v1819_v8 = vmul.f32 %v2532_v34, %v3250_v63  ;;  %v2533_v36 = vadd.f32 %v1780_v2, %v1061_v35  ;;  %v2399_v37 = vpop.f32.mrb[11].mxu1  ;;  %v2514_v38 = vpop.f32.mrb[13].mxu0 }
 0x190   : > { %v1788_v41 = vpop.f32.mrb[14].mxu0 }
 0x191   : > { %v1835_v39 = vadd.f32 %v3255_v0, %v1819_v8  ;;  %v1820_v40 = vmul.f32 %v2533_v36, %v3250_v63  ;;  %v2515_v12 = vpop.f32.mrb[15].mxu0 }
 0x193   : > { %v1836_v42 = vadd.f32 %v3255_v0, %v1820_v40  ;;  %v1844_v44 = vmax.f32 %v1835_v39, 0.0 }
 0x194   : > { %v1066_v43 = vpop.f32.mrb[12].mxu1 }
 0x195   : > { %v1845_v45 = vmax.f32 %v1836_v42, 0.0  ;;  %v2534_v46 = vadd.f32 %v1785_v10, %v1066_v43  ;;  %v2402_v29 = vpop.f32.mrb[13].mxu1 }
 0x196   : > { %v1069_v48 = vpop.f32.mrb[14].mxu1  ;;  %v1793_v50 = vpop.f32.mrb[16].mxu0 }
 0x197   : > { %v2177_v7 = vpack.c.bf16 %v1845_v45, %v1844_v44  ;;  %v1821_v49 = vmul.f32 %v2534_v46, %v3250_v63  ;;  %v2535_v53 = vadd.f32 %v1788_v41, %v1069_v48  ;;  %v2403_v51 = vpop.f32.mrb[15].mxu1  ;;  %v2518_v54 = vpop.f32.mrb[17].mxu0 }
 0x198   : > { %v1796_v57 = vpop.f32.mrb[18].mxu0 }
 0x199   : > { %2185 = vst [vmem:[%s3265_s29 + $0x10] sm:$0xff] %v2177_v7   ;;  %v1837_v55 = vadd.f32 %v3255_v0, %v1821_v49  ;;  %v1822_v56 = vmul.f32 %v2535_v53, %v3250_v63  ;;  %v2519_v58 = vpop.f32.mrb[19].mxu0 }
 0x19b   : > { %v1838_v59 = vadd.f32 %v3255_v0, %v1822_v56  ;;  %v1846_v61 = vmax.f32 %v1837_v55, 0.0 }
 0x19c   : > { %v1074_v60 = vpop.f32.mrb[16].mxu1 }
 0x19d   : > { %v1847_v1 = vmax.f32 %v1838_v59, 0.0  ;;  %v2536_v62 = vadd.f32 %v1793_v50, %v1074_v60  ;;  %v2406_v47 = vpop.f32.mrb[17].mxu1 }
 0x19e   : > { %v1077_v3 = vpop.f32.mrb[18].mxu1 }
 0x19f   : > { %v2182_v5 = vpack.c.bf16 %v1847_v1, %v1846_v61  ;;  %v1823_v11 = vmul.f32 %v2536_v62, %v3250_v63  ;;  %v2407_v13 = vpop.f32.mrb[19].mxu1 }
 0x1a1   : > { %2186 = vst [vmem:[%s3265_s29 + $0x18] sm:$0xff] %v2182_v5   ;;  %v1839_v14 = vadd.f32 %v3255_v0, %v1823_v11 }
 0x1a3   : > { %v1848_v15 = vmax.f32 %v1839_v14, 0.0 }
 0x1a5   : > { %v2163_v16 = vpack.c.bf16 %v1848_v15, %v1848_v15 }
 0x1a7   : > { %v1898_v18 = vsel %vm1896_vm7, %v2163_v16, %v1897_v17 }
 0x1a8   : > { %1899 = vst [vmem:[%s3265_s29 + $0x20] sm:$0xf] %v1898_v18 }
 0x1a9 PF: > { %s14_s15 = sadd.s32 1, %s2766_s15  }
 0x1aa   : > { %p11_p4 = scmp.ge.s32.totalorder %s14_s15, 4  }
 0x1ac   :  { %13 = sbr.rel (!%p11_p4) target bundleno = 1 (0x1), region = 74 }

// kernel: preactivation_block_forward.7
= control target key start
LH: loop header
LB: loop body
LE: loop exit
PB: predicated region body
PF: predicated region fallthrough
CT: control target
= control target key end

     0   :  { %s3092_s18 = smov 0   ;;  %s3754_s0 = inlined_call_operand.vmem [shape: bf16[2,100,128], index: 0, kind: input, shape index: {}]   ;;  %s3755_s1 = inlined_call_operand.vmem [shape: bf16[9,128,128], index: 1, kind: input, shape index: {}]   ;;  %s3756_s2 = inlined_call_operand.vmem [shape: f32[1,128], index: 2, kind: input, shape index: {}]   ;;  %s3757_s3 = inlined_call_operand.vmem [shape: f32[1,128], index: 3, kind: input, shape index: {}]   ;;  %s3758_s4 = inlined_call_operand.vmem [shape: f32[2,78,128], index: 4, kind: input, shape index: {}]   ;;  %s3759_s5 = inlined_call_operand.vmem [shape: f32[2,78,128], index: 5, kind: output, shape index: {}]  }
   0x1 LB: > { %s2099_s19 = sadd.s32 4294967295, %s3058_s18   ;;  %p2103_p0 = scmp.ge.s32.totalorder %s3058_s18, 1  ;;  %s3058_s18 = sphi %s3092_s18, %s15_s18  }
   0x2   : > { %p197_p1 = scmp.lt.s32.totalorder %s3058_s18, 3 }
   0x4   : > { %p198_p2 = pnand %p2103_p0, %p197_p1 }
   0x5   : > { %v2953_v0 = vld [vmem:[%s3755_s1 + $0x40] sm:$0xff] (!%p198_p2)   ;;  %v3060_v1 = vmov (!%p198_p2), 0.0   ;;  %v2955_v3 = vld [vmem:[%s3755_s1 + $0x48] sm:$0xff] (!%p198_p2)   ;;  %vm3061_vm0 = vmmov (!%p198_p2), 0   ;;  %p230_p3 = scmp.lt.s32.totalorder (!%p198_p2), %s2099_s19, 1  ;;  %v2957_v5 = vld [vmem:[%s3755_s1 + $0x50] sm:$0xff] (!%p198_p2)  }
   0x6   : > { %201 = sbr.rel (%p198_p2) target bundleno = 438 (0x1b6), region = 40  ;;  %2455 = vmatprep.subr.bf16.mxu1 (!%p198_p2), %v3060_v1  ;;  %2599 = vmatprep.subr.bf16.mxu0 (!%p198_p2), %v3060_v1  ;;  %v2954_v2 = vld [vmem:[%s3755_s1 + $0x100] sm:$0xff] (!%p198_p2)   ;;  %v2956_v4 = vld [vmem:[%s3755_s1 + $0x108] sm:$0xff] (!%p198_p2)   ;;  %v2958_v6 = vld [vmem:[%s3755_s1 + $0x110] sm:$0xff] (!%p198_p2)   ;;  %vm315_vm1 = vsmask.f32 (!%p198_p2), 7424 }
   0x7   : > { %2456 = vmatpush3.bf16.msra.mxu1 (!%p198_p2), %v2953_v0  ;;  %2471 = vmatprep.mubr.msk.bf16.mxu1 (!%p198_p2), %vm3061_vm0, %v3060_v1  ;;  %v2959_v7 = vld [vmem:[%s3755_s1 + $0x58] sm:$0xff] (!%p198_p2)   ;;  %v2961_v9 = vld [vmem:[%s3755_s1 + $0x60] sm:$0xff] (!%p198_p2)   ;;  %v2963_v11 = vld [vmem:[%s3755_s1 + $0x68] sm:$0xff] (!%p198_p2)   ;;  %vm1030_vm2 = vsmask.f32 (!%p198_p2), 6400  ;;  %vm631_vm3 = vcmask (!%p198_p2), 1046528  }
   0x8   : > { %2600 = vmatpush3.bf16.msra.mxu0 (!%p198_p2), %v2954_v2  ;;  %2457 = vmatprep.subr.bf16.mxu1 (!%p198_p2), %v3060_v1  ;;  %v2960_v8 = vld [vmem:[%s3755_s1 + $0x118] sm:$0xff] (!%p198_p2)   ;;  %v2962_v10 = vld [vmem:[%s3755_s1 + $0x120] sm:$0xff] (!%p198_p2)   ;;  %v2964_v19 = vld [vmem:[%s3755_s1 + $0x128] sm:$0xff] (!%p198_p2)   ;;  %vm1237_vm4 = vcmask (!%p198_p2), 1045504   ;;  %vm1820_vm5 = vcmask (!%p198_p2), 1044480  }
   0x9   : > { %2601 = vmatprep.subr.bf16.mxu0 (!%p198_p2), %v3060_v1  ;;  %2615 = vmatprep.mubr.msk.bf16.mxu0 (!%p198_p2), %vm3061_vm0, %v3060_v1  ;;  %v2965_v22 = vld [vmem:[%s3755_s1 + $0x70] sm:$0xff] (!%p198_p2)   ;;  %v2967_v35 = vld [vmem:[%s3755_s1 + $0x78] sm:$0xff] (!%p198_p2)   ;;  %v2973_v45 = vld [vmem:[%s3755_s1 + $0x140] sm:$0xff] (!%p198_p2)   ;;  %vm1609_vm6 = vsmask.f32 (!%p198_p2), 5376 }
   0xa   : > { %v2966_v25 = vld [vmem:[%s3755_s1 + $0x130] sm:$0xff] (!%p198_p2)   ;;  %v2968_v37 = vld [vmem:[%s3755_s1 + $0x138] sm:$0xff] (!%p198_p2)   ;;  %v2977_v50 = vld [vmem:[%s3755_s1] sm:$0xff] (!%p198_p2)  }
   0xb   : > { %2458 = vmatpush3.bf16.msra.mxu1 (!%p198_p2), %v2955_v3  ;;  %v2974_v59 = vld [vmem:[%s3755_s1 + $0x148] sm:$0xff] (!%p198_p2)   ;;  %v2978_v2 = vld [vmem:[%s3755_s1 + $0x150] sm:$0xff] (!%p198_p2)  }
   0xc   : > { %2602 = vmatpush3.bf16.msra.mxu0 (!%p198_p2), %v2956_v4  ;;  %2459 = vmatprep.subr.bf16.mxu1 (!%p198_p2), %v3060_v1  ;;  %v2979_v61 = vld [vmem:[%s3755_s1 + $0x8] sm:$0xff] (!%p198_p2)  }
   0xd   : > { %s3761_s19 = smov (!%p230_p3, %s2099_s19), 1  ;;  %2603 = vmatprep.subr.bf16.mxu0 %v3060_v1 }
   0xe   : > { %s2941_s7 = smul.u32 52, %s3761_s19 }
   0xf   : > { %2460 = vmatpush3.bf16.msra.mxu1 %v2957_v5  ;;  %s2942_s9 = smul.u32 80, %s3761_s19 }
  0x10   : > { %2604 = vmatpush3.bf16.msra.mxu0 %v2958_v6  ;;  %2461 = vmatprep.subr.bf16.mxu1 %v3060_v1  ;;  %s3142_s14 = scalar_lea.vmem %s3754_s0, %s2941_s7 }
  0x11   : > { %2605 = vmatprep.subr.bf16.mxu0 %v3060_v1  ;;  %v246_v12 = vld [vmem:[%s3142_s14] sm:$0xf]  ;;  %v3157_v13 = vld [vmem:[%s3142_s14 + $0x4] sm:$0xf]  ;;  %v3163_v15 = vld [vmem:[%s3142_s14 + $0x8] sm:$0xff]   ;;  %s3695_s15 = scalar_lea.vmem %s3758_s4, %s2942_s9  ;;  %s3711_s21 = scalar_lea.vmem %s3759_s5, %s2942_s9 }
  0x12   : > { %v3160_v14 = vcombine.low %v246_v12, %v3157_v13  ;;  %v3166_v16 = vld [vmem:[%s3142_s14 + $0xc] sm:$0xff]   ;;  %v974_v17 = vld [vmem:[%s3142_s14 + $0x4] sm:$0xe]  ;;  %v3170_v18 = vld [vmem:[%s3142_s14 + $0x8] sm:$0xf]  ;;  %v324_v30 = vshll.u32 %v3163_v15, 16 }
  0x13   : > { %2462 = vmatpush3.bf16.msra.mxu1 %v2959_v7  ;;  %v2215_v21 = vcombine.low %v974_v17, %v3170_v18  ;;  %v1040_v23 = vshrl.u32 %v3166_v16, 16  ;;  %v1043_v24 = vshll.u32 %v3166_v16, 16  ;;  %v3195_v36 = vld [vmem:[%s3142_s14 + $0x14] sm:$0xff]   ;;  %v328_v46 = vshrl.u32 %v3163_v15, 16  ;;  %v3212_v47 = vld [vmem:[%s3142_s14 + $0x1c] sm:$0xff]   ;;  %v3250_v7 = vld [vmem:[%s3142_s14 + $0x24] sm:$0xff]  }
  0x14   : > { %2606 = vmatpush3.bf16.msra.mxu0 %v2960_v8  ;;  %2463 = vmatprep.subr.bf16.mxu1 %v3060_v1  ;;  %v319_v20 = vshll.u32 %v3160_v14, 16  ;;  %v317_v26 = vshrl.u32 %v3160_v14, 16  ;;  %v326_v39 = vrot.slane %v324_v30, 1  ;;  %v3201_v40 = vld [vmem:[%s3142_s14 + $0x10] sm:$0xff]   ;;  %v1049_v43 = vshrl.u32 %v3195_v36, 16  ;;  %v3223_v54 = vld [vmem:[%s3142_s14 + $0x18] sm:$0xff]  }
  0x15   : > { %2607 = vmatprep.subr.bf16.mxu0 %v3060_v1  ;;  %v1032_v27 = vshrl.u32 %v2215_v21, 16  ;;  %v1035_v28 = vshll.u32 %v2215_v21, 16  ;;  %v1042_v33 = vrot.slane %v1040_v23, 1  ;;  %v1045_v34 = vrot.slane %v1043_v24, 2  ;;  %v3245_v3 = vld [vmem:[%s3142_s14 + $0x20] sm:$0xf] }
  0x16   : > { %v321_v29 = vrot.slane %v319_v20, 1  ;;  %v1052_v44 = vshll.u32 %v3195_v36, 16  ;;  %v332_v49 = vshll.u32 %v3201_v40, 16  ;;  %v1051_v52 = vrot.slane %v1049_v43, 1  ;;  %v272_v6 = vld [vmem:[%s3142_s14 + $0x24] sm:$0xf] }
  0x17   : > { %2464 = vmatpush3.bf16.msra.mxu1 %v2961_v9  ;;  %v1034_v31 = vrot.slane %v1032_v27, 1  ;;  %v1037_v32 = vrot.slane %v1035_v28, 2  ;;  %v1046_v42 = vor.u32 %v1045_v34, %v1042_v33  ;;  %v1058_v55 = vshrl.u32 %v3212_v47, 16  ;;  %v2983_v9 = vld [vmem:[%s3755_s1 + $0x10] sm:$0xff]   ;;  %v2982_v17 = vld [vmem:[%s3755_s1 + $0x158] sm:$0xff]   ;;  %v2988_v30 = vld [vmem:[%s3755_s1 + $0x20] sm:$0xff]  }
  0x18   : > { %2608 = vmatpush3.bf16.msra.mxu0 %v2962_v10  ;;  %2465 = vmatprep.subr.bf16.mxu1 %v3060_v1  ;;  %v322_v38 = vor.u32 %v321_v29, %v317_v26  ;;  %v1054_v53 = vrot.slane %v1052_v44, 2  ;;  %v330_v56 = vor.u32 %v328_v46, %v326_v39  ;;  %v334_v57 = vrot.slane %v332_v49, 1  ;;  %v2991_v44 = vld [vmem:[%s3755_s1 + $0x170] sm:$0xff]   ;;  %v2994_v49 = vld [vmem:[%s3755_s1 + $0x178] sm:$0xff]  }
  0x19   : > { %2609 = vmatprep.subr.bf16.mxu0 %v3060_v1  ;;  %v1038_v41 = vor.u32 %v1037_v32, %v1034_v31  ;;  %v1061_v58 = vshll.u32 %v3212_v47, 16  ;;  %v336_v62 = vshrl.u32 %v3201_v40, 16  ;;  %v340_v63 = vshll.u32 %v3223_v54, 16  ;;  %v3288_v32 = vld [vmem:[%s3142_s14 + $0x2c] ss:$0 sps:$4 sm:$0x11]  }
  0x1a   : > { %v327_v48 = vsel %vm315_vm1, %v322_v38, %v326_v39  ;;  %v1055_v60 = vor.u32 %v1054_v53, %v1051_v52  ;;  %v1060_v0 = vrot.slane %v1058_v55, 1  ;;  %v335_v4 = vsel %vm315_vm1, %v330_v56, %v334_v57  ;;  %v2989_v38 = vld [vmem:[%s3755_s1 + $0x168] sm:$0xff]   ;;  %v2993_v46 = vld [vmem:[%s3755_s1 + $0x30] sm:$0xff]   ;;  %v1216_v52 = vld [vmem:[%s3142_s14 + $0x4] sm:$0xc] }
  0x1b   : > { %2466 = vmatpush3.bf16.msra.mxu1 %v2963_v11  ;;  %v1047_v51 = vsel %vm1030_vm2, %v1038_v41, %v1046_v42  ;;  %v1063_v5 = vrot.slane %v1061_v58, 2  ;;  %v3259_v10 = vcombine.low %v3245_v3, %v272_v6  ;;  %v338_v11 = vor.u32 %v336_v62, %v334_v57  ;;  %v2990_v39 = vld [vmem:[%s3755_s1 + $0x28] sm:$0xff]   ;;  %v610_v55 = vld [vmem:[%s3142_s14] sm:$0xe] }
  0x1c   : > { %2610 = vmatpush3.bf16.msra.mxu0 %v2964_v19  ;;  %2467 = vmatprep.subr.bf16.mxu1 %v3060_v1  ;;  %v1056_v8 = vsel %vm1030_vm2, %v1046_v42, %v1055_v60  ;;  %v342_v12 = vrot.slane %v340_v63, 1  ;;  %v1067_v19 = vshrl.u32 %v3250_v7, 16  ;;  %v1070_v20 = vshll.u32 %v3250_v7, 16  ;;  %v2997_v62 = vld [vmem:[%s3755_s1 + $0x180] sm:$0xff]  }
  0x1d   : > { %2611 = vmatprep.subr.bf16.mxu0 %v3060_v1  ;;  %v1064_v21 = vor.u32 %v1063_v5, %v1060_v0  ;;  %v348_v23 = vshll.u32 %v3259_v10, 16  ;;  %v344_v26 = vshrl.u32 %v3223_v54, 16  ;;  %v633_v34 = vrot.slane %v3163_v15, 1  ;;  %v2999_v63 = vld [vmem:[%s3755_s1 + $0x80] sm:$0xff]   ;;  %v3002_v5 = vld [vmem:[%s3755_s1 + $0x198] sm:$0xff]  }
  0x1e   : > { %v343_v24 = vsel %vm315_vm1, %v338_v11, %v342_v12  ;;  %v1069_v28 = vrot.slane %v1067_v19, 1  ;;  %v1072_v29 = vrot.slane %v1070_v20, 2  ;;  %v2245_v57 = vcombine.low %v1216_v52, %v3170_v18  ;;  %v255_v20 = vld [vmem:[%s3142_s14 + $0x24] sm:$0x7] }
  0x1f   : > { %2468 = vmatpush3.bf16.msra.mxu1 %v2965_v22  ;;  %v2984_v22 = vld [vmem:[%s3755_s1 + $0x18] sm:$0xff]   ;;  %v1065_v27 = vsel %vm1030_vm2, %v1055_v60, %v1064_v21  ;;  %v350_v31 = vrot.slane %v348_v23, 1  ;;  %v346_v33 = vor.u32 %v344_v26, %v342_v12  ;;  %v2161_v58 = vcombine.low %v610_v55, %v3157_v13  ;;  %v3007_v12 = vld [vmem:[%s3755_s1 + $0x1a8] sm:$0xff]   ;;  %v3428_v23 = vld [vmem:[%s3142_s14 + $0x10] sm:$0xff]  }
  0x20   : > { %2612 = vmatpush3.bf16.msra.mxu0 %v2966_v25  ;;  %2469 = vmatprep.subr.bf16.mxu1 %v3060_v1  ;;  %v2985_v25 = vld [vmem:[%s3755_s1 + $0x160] sm:$0xff]   ;;  %v1238_v60 = vrot.slane %v2245_v57, 2  ;;  %v1241_v0 = vrot.slane %v3195_v36, 2  ;;  %v3003_v36 = vld [vmem:[%s3755_s1 + $0x90] sm:$0xff]   ;;  %v1243_v6 = vrot.slane %v3212_v47, 2  ;;  %v1245_v11 = vrot.slane %v3250_v7, 2 }
  0x21   : > { %2613 = vmatprep.subr.bf16.mxu0 %v3060_v1  ;;  %v351_v42 = vsel %vm315_vm1, %v346_v33, %v350_v31  ;;  %v3006_v47 = vld [vmem:[%s3755_s1 + $0xa0] sm:$0xff]   ;;  %v3009_v7 = vld [vmem:[%s3755_s1 + $0x1b0] sm:$0xff]   ;;  %v1799_v26 = vld [vmem:[%s3142_s14 + $0x8] sm:$0x8] }
  0x22   : > { %v1246_v19 = vsel %vm1237_vm4, %v1243_v6, %v1245_v11  ;;  %v1385_v33 = vld [vmem:[%s3142_s14 + $0x8] sm:$0xc]  ;;  %v3025_v57 = vld [vmem:[%s3755_s1 + $0xd0] sm:$0xff]  }
  0x23   : > { %2470 = vmatpush3.bf16.msra.mxu1 %v2967_v35  ;;  %v635_v35 = vrot.slane %v3201_v40, 1 }
  0x24   : > { %2614 = vmatpush3.bf16.msra.mxu0 %v2968_v37  ;;  %2491 = vmatprep.subr.bf16.mxu1 %v3060_v1  ;;  %v1073_v37 = vor.u32 %v1072_v29, %v1069_v28  ;;  %v3012_v28 = vld [vmem:[%s3755_s1 + $0x1b8] sm:$0xff]  }
  0x25   : > { %2635 = vmatprep.subr.bf16.mxu0 %v3060_v1  ;;  %v3306_v41 = vsel %vm631_vm3, %v633_v34, %v635_v35 }
  0x26   : > { %2472 = vmatmul.mubr.bf16.vlgmr.msra.gmra.mrb[0].mxu1 %v327_v48  ;;  %v1074_v43 = vsel %vm1030_vm2, %v1064_v21, %v1073_v37  ;;  %v352_v48 = vshrl.u32 %v3259_v10, 16  ;;  %v3011_v21 = vld [vmem:[%s3755_s1 + $0xb0] sm:$0xff]  }
  0x27   : > { %2616 = vmatmul.mubr.bf16.vlgmr.msra.gmra.mrb[0].mxu0 %v1047_v51  ;;  %2475 = vmatprep.mubr.msk.bf16.mxu1 %vm3061_vm0, %v3060_v1  ;;  %v2995_v51 = vld [vmem:[%s3755_s1 + $0x38] sm:$0xff]  }
  0x28   : > { %2636 = vmatpush3.bf16.msra.mxu0 %v2973_v45  ;;  %2619 = vmatprep.mubr.msk.bf16.mxu0 %vm3061_vm0, %v3060_v1  ;;  %v1076_v45 = vshll.u32 %v3288_v32, 16  ;;  %v354_v53 = vor.u32 %v352_v48, %v350_v31  ;;  %v3013_v31 = vld [vmem:[%s3755_s1 + $0xb8] sm:$0xff]  }
  0x29   : > { %2637 = vmatprep.subr.bf16.mxu0 %v3060_v1  ;;  %2492 = vmatpush3.bf16.msra.mxu1 %v2977_v50 }
  0x2a   : > { %2493 = vmatprep.subr.bf16.mxu1 %v3060_v1  ;;  %v1078_v50 = vrot.slane %v1076_v45, 2 }
  0x2c   : > { %2638 = vmatpush3.bf16.msra.mxu0 %v2974_v59  ;;  %v1079_v56 = vsel %vm1030_vm2, %v1073_v37, %v1078_v50  ;;  %v632_v59 = vrot.slane %v2161_v58, 1  ;;  %v2136_v37 = vcombine.low %v3245_v3, %v255_v20  ;;  %v3020_v50 = vld [vmem:[%s3755_s1 + $0xc0] sm:$0xff]   ;;  %v637_v58 = vrot.slane %v3223_v54, 1 }
  0x2d   : > { %2639 = vmatprep.subr.bf16.mxu0 %v3060_v1  ;;  %2494 = vmatpush3.bf16.msra.mxu1 %v2979_v61  ;;  %v1239_v61 = vrot.slane %v3166_v16, 2  ;;  %v2998_v16 = vld [vmem:[%s3755_s1 + $0x188] sm:$0xff]  }
  0x2e   : > { %2476 = vmatmul.mubr.bf16.gmra.mrb[4].mxu1 %v335_v4  ;;  %2495 = vmatprep.subr.bf16.mxu1 %v3060_v1  ;;  %v3346_v18 = vsel %vm631_vm3, %v632_v59, %v633_v34  ;;  %v3000_v4 = vld [vmem:[%s3755_s1 + $0x190] sm:$0xff]  }
  0x2f   : > { %2620 = vmatmul.mubr.bf16.gmra.mrb[4].mxu0 %v1056_v8  ;;  %2479 = vmatprep.mubr.msk.bf16.mxu1 %vm3061_vm0, %v3060_v1  ;;  %v1240_v13 = vsel %vm1237_vm4, %v1238_v60, %v1239_v61  ;;  %v1244_v8 = vsel %vm1237_vm4, %v1241_v0, %v1243_v6  ;;  %v3024_v60 = vld [vmem:[%s3755_s1 + $0x1d8] sm:$0xff]  }
  0x30   : > { %2640 = vmatpush3.bf16.msra.mxu0 %v2978_v2  ;;  %2623 = vmatprep.mubr.msk.bf16.mxu0 %vm3061_vm0, %v3060_v1  ;;  %v1242_v2 = vsel %vm1237_vm4, %v1239_v61, %v1241_v0  ;;  %v3035_v6 = vld [vmem:[%s3755_s1 + $0x1f8] sm:$0xff]  }
  0x31   : > { %2641 = vmatprep.subr.bf16.mxu0 %v3060_v1  ;;  %2496 = vmatpush3.bf16.msra.mxu1 %v2983_v9  ;;  %v3005_v9 = vld [vmem:[%s3755_s1 + $0x1a0] sm:$0xff]  }
  0x32   : > { %2497 = vmatprep.subr.bf16.mxu1 %v3060_v1 }
  0x34   : > { %2642 = vmatpush3.bf16.msra.mxu0 %v2982_v17  ;;  %v3008_v17 = vld [vmem:[%s3755_s1 + $0xa8] sm:$0xff]  }
  0x35   : > { %2643 = vmatprep.subr.bf16.mxu0 %v3060_v1  ;;  %2498 = vmatpush3.bf16.msra.mxu1 %v2984_v22  ;;  %v1386_v22 = vld [vmem:[%s3142_s14 + $0xc] sm:$0xf] }
  0x36   : > { %2480 = vmatmul.mubr.bf16.gmra.mrb[8].mxu1 %v343_v24  ;;  %2499 = vmatprep.subr.bf16.mxu1 %v3060_v1  ;;  %v3431_v24 = vld [vmem:[%s3142_s14 + $0x18] sm:$0xff]   ;;  %v2325_v29 = vcombine.low %v1799_v26, %v1386_v22 }
  0x37   : > { %2624 = vmatmul.mubr.bf16.gmra.mrb[8].mxu0 %v1065_v27  ;;  %2483 = vmatprep.mubr.msk.bf16.mxu1 %vm3061_vm0, %v3060_v1  ;;  %v1247_v27 = vrot.slane %v3288_v32, 2  ;;  %v1824_v32 = vrot.slane %v3431_v24, 3  ;;  %v1444_v52 = vrot.slane %v3431_v24, 2 }
  0x38   : > { %2644 = vmatpush3.bf16.msra.mxu0 %v2985_v25  ;;  %2627 = vmatprep.mubr.msk.bf16.mxu0 %vm3061_vm0, %v3060_v1  ;;  %v3436_v25 = vld [vmem:[%s3142_s14 + $0x20] sm:$0xff]  }
  0x39   : > { %2500 = vmatpush3.bf16.msra.mxu1 %v2988_v30  ;;  %2645 = vmatprep.subr.bf16.mxu0 %v3060_v1  ;;  %v1822_v30 = vrot.slane %v3428_v23, 3  ;;  %v1826_v34 = vrot.slane %v3436_v25, 3  ;;  %v1446_v59 = vrot.slane %v3436_v25, 2 }
  0x3a   : > { %2501 = vmatprep.subr.bf16.mxu1 %v3060_v1 }
  0x3b   : > { %v1447_v61 = vsel %vm1237_vm4, %v1444_v52, %v1446_v59 }
  0x3c   : > { %2646 = vmatpush3.bf16.msra.mxu0 %v2989_v38  ;;  %v1821_v38 = vrot.slane %v2325_v29, 3  ;;  %v1631_v29 = vshll.u32 %v3431_v24, 16 }
  0x3d   : > { %2502 = vmatpush3.bf16.msra.mxu1 %v2990_v39  ;;  %2647 = vmatprep.subr.bf16.mxu0 %v3060_v1  ;;  %v3456_v39 = vsel %vm1820_vm5, %v1822_v30, %v1824_v32 }
  0x3e   : > { %2484 = vmatmul.mubr.bf16.gmra.mrb[12].mxu1 %v351_v42  ;;  %2503 = vmatprep.subr.bf16.mxu1 %v3060_v1  ;;  %v3461_v42 = vsel %vm1820_vm5, %v1824_v32, %v1826_v34  ;;  %v3467_v45 = vsel %vm1820_vm5, %v1821_v38, %v1822_v30  ;;  %v3039_v32 = vld [vmem:[%s3755_s1 + $0x200] sm:$0xff]   ;;  %v1633_v38 = vrot.slane %v1631_v29, 3 }
  0x3f   : > { %2628 = vmatmul.mubr.bf16.gmra.mrb[12].mxu0 %v1074_v43  ;;  %2487 = vmatprep.mubr.msk.bf16.mxu1 %vm3061_vm0, %v3060_v1  ;;  %v1248_v43 = vsel %vm1237_vm4, %v1245_v11, %v1247_v27  ;;  %v3037_v11 = vld [vmem:[%s3142_s14 + $0x4] sm:$0xfe]  }
  0x40   : > { %2631 = vmatprep.mubr.msk.bf16.mxu0 %vm3061_vm0, %v3060_v1  ;;  %2648 = vmatpush3.bf16.msra.mxu0 %v2991_v44  ;;  %v3464_v44 = vcombine.low %v1385_v33, %v1386_v22  ;;  %v829_v22 = vrot.slane %v3037_v11, 1 }
  0x41   : > { %2504 = vmatpush3.bf16.msra.mxu1 %v2993_v46  ;;  %2649 = vmatprep.subr.bf16.mxu0 %v3060_v1  ;;  %v1442_v46 = vrot.slane %v3428_v23, 2 }
  0x42   : > { %2505 = vmatprep.subr.bf16.mxu1 %v3060_v1  ;;  %v1441_v3 = vrot.slane %v3464_v44, 2 }
  0x43   : > { %v1445_v55 = vsel %vm1237_vm4, %v1442_v46, %v1444_v52 }
  0x44   : > { %2650 = vmatpush3.bf16.msra.mxu0 %v2994_v49  ;;  %v1443_v48 = vsel %vm1237_vm4, %v1441_v3, %v1442_v46  ;;  %v3017_v49 = vld [vmem:[%s3755_s1 + $0x1c0] sm:$0xff]   ;;  %v1637_v3 = vshrl.u32 %v3436_v25, 16  ;;  %v1640_v46 = vshll.u32 %v3436_v25, 16 }
  0x45   : > { %2506 = vmatpush3.bf16.msra.mxu1 %v2995_v51  ;;  %2671 = vmatprep.subr.bf16.mxu0 %v3060_v1  ;;  %v3018_v51 = vld [vmem:[%s3755_s1 + $0x1c8] sm:$0xff]  }
  0x46   : > { %2488 = vmatmul.mubr.bf16.gmra.mrb[16].mxu1 %v354_v53  ;;  %2527 = vmatprep.subr.bf16.mxu1 %v3060_v1  ;;  %v3022_v53 = vld [vmem:[%s3755_s1 + $0xc8] sm:$0xff]   ;;  %v1639_v52 = vrot.slane %v1637_v3, 2 }
  0x47   : > { %2632 = vmatmul.mubr.bf16.gmra.mrb[16].mxu0 %v1079_v56  ;;  %2507 = vmatprep.mubr.msk.bf16.mxu1 %vm3061_vm0, %v3060_v1  ;;  %v3021_v56 = vld [vmem:[%s3755_s1 + $0x1d0] sm:$0xff]  }
  0x48   : > { %2651 = vmatprep.mubr.msk.bf16.mxu0 %vm3061_vm0, %v3060_v1 }
  0x4e   : > { %2508 = vmatmul.mubr.bf16.vlgmr.msra.gmra.mrb[0].mxu1 %v3160_v14  ;;  %v3001_v14 = vld [vmem:[%s3755_s1 + $0x88] sm:$0xff]  }
  0x4f   : > { %2652 = vmatmul.mubr.bf16.vlgmr.msra.gmra.mrb[0].mxu0 %v1240_v13  ;;  %2511 = vmatprep.mubr.msk.bf16.mxu1 %vm3061_vm0, %v3060_v1  ;;  %v3530_v13 = vld [vmem:[%s3142_s14 + $0x28] sm:$0xff]  }
  0x50   : > { %2672 = vmatpush3.bf16.msra.mxu0 %v2997_v62  ;;  %2655 = vmatprep.mubr.msk.bf16.mxu0 %vm3061_vm0, %v3060_v1  ;;  %v3029_v62 = vld [vmem:[%s3755_s1 + $0xe0] sm:$0xff]  }
  0x51   : > { %2673 = vmatprep.subr.bf16.mxu0 %v3060_v1  ;;  %2528 = vmatpush3.bf16.msra.mxu1 %v2999_v63  ;;  %v3030_v63 = vld [vmem:[%s3755_s1 + $0x1e8] sm:$0xff]  }
  0x52   : > { %2529 = vmatprep.subr.bf16.mxu1 %v3060_v1 }
  0x54   : > { %2674 = vmatpush3.bf16.msra.mxu0 %v2998_v16  ;;  %v3031_v16 = vld [vmem:[%s3755_s1 + $0xe8] sm:$0xff]  }
  0x55   : > { %2675 = vmatprep.subr.bf16.mxu0 %v3060_v1  ;;  %2530 = vmatpush3.bf16.msra.mxu1 %v3001_v14  ;;  %v3032_v14 = vld [vmem:[%s3755_s1 + $0x1f0] sm:$0xff]  }
  0x56   : > { %2512 = vmatmul.mubr.bf16.gmra.mrb[4].mxu1 %v3163_v15  ;;  %2531 = vmatprep.subr.bf16.mxu1 %v3060_v1  ;;  %v3004_v15 = vld [vmem:[%s3755_s1 + $0x98] sm:$0xff]  }
  0x57   : > { %2656 = vmatmul.mubr.bf16.gmra.mrb[4].mxu0 %v1242_v2  ;;  %2515 = vmatprep.mubr.msk.bf16.mxu1 %vm3061_vm0, %v3060_v1  ;;  %v3033_v2 = vld [vmem:[%s3142_s14 + $0x30] ss:$0 sps:$4 sm:$0x11]  }
  0x58   : > { %2676 = vmatpush3.bf16.msra.mxu0 %v3000_v4  ;;  %2659 = vmatprep.mubr.msk.bf16.mxu0 %vm3061_vm0, %v3060_v1  ;;  %v3034_v4 = vld [vmem:[%s3755_s1 + $0xf0] sm:$0xff]  }
  0x59   : > { %2677 = vmatprep.subr.bf16.mxu0 %v3060_v1  ;;  %2532 = vmatpush3.bf16.msra.mxu1 %v3003_v36  ;;  %v1611_v36 = vshrl.u32 %v3464_v44, 16 }
  0x5a   : > { %2533 = vmatprep.subr.bf16.mxu1 %v3060_v1 }
  0x5c   : > { %2678 = vmatpush3.bf16.msra.mxu0 %v3002_v5  ;;  %v1450_v5 = vrot.slane %v3033_v2, 2 }
  0x5d   : > { %2679 = vmatprep.subr.bf16.mxu0 %v3060_v1  ;;  %2534 = vmatpush3.bf16.msra.mxu1 %v3004_v15  ;;  %v1614_v15 = vshll.u32 %v3464_v44, 16 }
  0x5e   : > { %2516 = vmatmul.mubr.bf16.gmra.mrb[8].mxu1 %v3201_v40  ;;  %2535 = vmatprep.subr.bf16.mxu1 %v3060_v1  ;;  %v639_v40 = vrot.slane %v3259_v10, 1 }
  0x5f   : > { %2660 = vmatmul.mubr.bf16.gmra.mrb[8].mxu0 %v1244_v8  ;;  %2519 = vmatprep.mubr.msk.bf16.mxu1 %vm3061_vm0, %v3060_v1  ;;  %v1619_v8 = vshrl.u32 %v3428_v23, 16 }
  0x60   : > { %2680 = vmatpush3.bf16.msra.mxu0 %v3005_v9  ;;  %2663 = vmatprep.mubr.msk.bf16.mxu0 %vm3061_vm0, %v3060_v1  ;;  %v640_v10 = vsel %vm631_vm3, %v637_v58, %v639_v40  ;;  %v1622_v9 = vshll.u32 %v3428_v23, 16 }
  0x61   : > { %2536 = vmatpush3.bf16.msra.mxu1 %v3006_v47  ;;  %2681 = vmatprep.subr.bf16.mxu0 %v3060_v1  ;;  %v3036_v47 = vld [vmem:[%s3755_s1 + $0xf8] sm:$0xff]   ;;  %v1621_v20 = vrot.slane %v1619_v8, 2 }
  0x62   : > { %2537 = vmatprep.subr.bf16.mxu1 %v3060_v1 }
  0x64   : > { %2682 = vmatpush3.bf16.msra.mxu0 %v3007_v12  ;;  %v3038_v12 = vld [vmem:[%s3142_s14 + $0xc] sm:$0xff]  }
  0x65   : > { %2538 = vmatpush3.bf16.msra.mxu1 %v3008_v17  ;;  %2683 = vmatprep.subr.bf16.mxu0 %v3060_v1  ;;  %v1613_v17 = vrot.slane %v1611_v36, 2  ;;  %v830_v23 = vrot.slane %v3038_v12, 1 }
  0x66   : > { %2520 = vmatmul.mubr.bf16.gmra.mrb[12].mxu1 %v3223_v54  ;;  %2539 = vmatprep.subr.bf16.mxu1 %v3060_v1  ;;  %v638_v54 = vsel %vm631_vm3, %v635_v35, %v637_v58  ;;  %v1448_v35 = vrot.slane %v3530_v13, 2  ;;  %v1646_v58 = vshrl.u32 %v3530_v13, 16 }
  0x67   : > { %2664 = vmatmul.mubr.bf16.gmra.mrb[12].mxu0 %v1246_v19  ;;  %2523 = vmatprep.mubr.msk.bf16.mxu1 %vm3061_vm0, %v3060_v1  ;;  %v1616_v19 = vrot.slane %v1614_v15, 3  ;;  %v831_v30 = vsel %vm631_vm3, %v829_v22, %v830_v23  ;;  %v3050_v15 = vld [vmem:[%s3755_s1 + $0x238] sm:$0xff]  }
  0x68   : > { %2667 = vmatprep.mubr.msk.bf16.mxu0 %vm3061_vm0, %v3060_v1  ;;  %2684 = vmatpush3.bf16.msra.mxu0 %v3009_v7  ;;  %v1449_v0 = vsel %vm1237_vm4, %v1446_v59, %v1448_v35  ;;  %v1451_v7 = vsel %vm1237_vm4, %v1448_v35, %v1450_v5  ;;  %v1649_v59 = vshll.u32 %v3530_v13, 16 }
  0x69   : > { %2540 = vmatpush3.bf16.msra.mxu1 %v3011_v21  ;;  %2685 = vmatprep.subr.bf16.mxu0 %v3060_v1  ;;  %v1624_v21 = vrot.slane %v1622_v9, 3  ;;  %v1617_v26 = vor.u32 %v1616_v19, %v1613_v17  ;;  %v1828_v9 = vrot.slane %v3530_v13, 3 }
  0x6a   : > { %2541 = vmatprep.subr.bf16.mxu1 %v3060_v1 }
  0x6b   : > { %v1625_v27 = vor.u32 %v1624_v21, %v1621_v20 }
  0x6c   : > { %2686 = vmatpush3.bf16.msra.mxu0 %v3012_v28  ;;  %v1628_v28 = vshrl.u32 %v3431_v24, 16  ;;  %v3040_v24 = vld [vmem:[%s3755_s1 + $0x208] sm:$0xff]  }
  0x6d   : > { %2542 = vmatpush3.bf16.msra.mxu1 %v3013_v31  ;;  %2707 = vmatprep.subr.bf16.mxu0 %v3060_v1  ;;  %v3041_v31 = vld [vmem:[%s3142_s14 + $0x14] sm:$0xff]   ;;  %v1626_v33 = vsel %vm1609_vm6, %v1617_v26, %v1625_v27 }
  0x6e   : > { %2524 = vmatmul.mubr.bf16.gmra.mrb[16].mxu1 %v2136_v37  ;;  %2563 = vmatprep.subr.bf16.mxu1 %v3060_v1  ;;  %v1630_v37 = vrot.slane %v1628_v28, 2 }
  0x6f   : > { %2668 = vmatmul.mubr.bf16.gmra.mrb[16].mxu0 %v1248_v43  ;;  %2543 = vmatprep.mubr.msk.bf16.mxu1 %vm3061_vm0, %v3060_v1  ;;  %v832_v43 = vrot.slane %v3041_v31, 1 }
  0x70   : > { %2687 = vmatprep.mubr.msk.bf16.mxu0 %vm3061_vm0, %v3060_v1  ;;  %v1634_v44 = vor.u32 %v1633_v38, %v1630_v37 }
  0x76   : > { %2544 = vmatmul.mubr.bf16.vlgmr.msra.gmra.mrb[0].mxu1 %v3346_v18  ;;  %v3027_v18 = vld [vmem:[%s3755_s1 + $0x1e0] sm:$0xff]  }
  0x77   : > { %2688 = vmatmul.mubr.bf16.vlgmr.msra.gmra.mrb[0].mxu0 %v1443_v48  ;;  %2547 = vmatprep.mubr.msk.bf16.mxu1 %vm3061_vm0, %v3060_v1  ;;  %v833_v48 = vsel %vm631_vm3, %v830_v23, %v832_v43 }
  0x78   : > { %2708 = vmatpush3.bf16.msra.mxu0 %v3017_v49  ;;  %2691 = vmatprep.mubr.msk.bf16.mxu0 %vm3061_vm0, %v3060_v1  ;;  %v3043_v49 = vld [vmem:[%s3142_s14 + $0x1c] sm:$0xff]  }
  0x79   : > { %2709 = vmatprep.subr.bf16.mxu0 %v3060_v1  ;;  %2564 = vmatpush3.bf16.msra.mxu1 %v3020_v50  ;;  %v1635_v50 = vsel %vm1609_vm6, %v1625_v27, %v1634_v44 }
  0x7a   : > { %2565 = vmatprep.subr.bf16.mxu1 %v3060_v1 }
  0x7c   : > { %2710 = vmatpush3.bf16.msra.mxu0 %v3018_v51  ;;  %v3042_v51 = vld [vmem:[%s3755_s1 + $0x210] sm:$0xff]  }
  0x7d   : > { %2711 = vmatprep.subr.bf16.mxu0 %v3060_v1  ;;  %2566 = vmatpush3.bf16.msra.mxu1 %v3022_v53  ;;  %v1642_v53 = vrot.slane %v1640_v46, 3 }
  0x7e   : > { %2548 = vmatmul.mubr.bf16.gmra.mrb[4].mxu1 %v3306_v41  ;;  %2567 = vmatprep.subr.bf16.mxu1 %v3060_v1  ;;  %v3026_v41 = vld [vmem:[%s3755_s1 + $0xd8] sm:$0xff]  }
  0x7f   : > { %2692 = vmatmul.mubr.bf16.gmra.mrb[4].mxu0 %v1445_v55  ;;  %2551 = vmatprep.mubr.msk.bf16.mxu1 %vm3061_vm0, %v3060_v1  ;;  %v834_v55 = vrot.slane %v3043_v49, 1 }
  0x80   : > { %2712 = vmatpush3.bf16.msra.mxu0 %v3021_v56  ;;  %2695 = vmatprep.mubr.msk.bf16.mxu0 %vm3061_vm0, %v3060_v1  ;;  %v1643_v56 = vor.u32 %v1642_v53, %v1639_v52 }
  0x81   : > { %2713 = vmatprep.subr.bf16.mxu0 %v3060_v1  ;;  %2568 = vmatpush3.bf16.msra.mxu1 %v3025_v57  ;;  %v3044_v57 = vld [vmem:[%s3755_s1 + $0x218] sm:$0xff]  }
  0x82   : > { %2569 = vmatprep.subr.bf16.mxu1 %v3060_v1 }
  0x84   : > { %2714 = vmatpush3.bf16.msra.mxu0 %v3024_v60  ;;  %v835_v60 = vsel %vm631_vm3, %v832_v43, %v834_v55 }
  0x85   : > { %2715 = vmatprep.subr.bf16.mxu0 %v3060_v1  ;;  %2570 = vmatpush3.bf16.msra.mxu1 %v3026_v41  ;;  %v3046_v41 = vld [vmem:[%s3142_s14 + $0x24] sm:$0xff]  }
  0x86   : > { %2552 = vmatmul.mubr.bf16.gmra.mrb[8].mxu1 %v638_v54  ;;  %2571 = vmatprep.subr.bf16.mxu1 %v3060_v1  ;;  %v1644_v54 = vsel %vm1609_vm6, %v1634_v44, %v1643_v56  ;;  %v836_v35 = vrot.slane %v3046_v41, 1 }
  0x87   : > { %2696 = vmatmul.mubr.bf16.gmra.mrb[8].mxu0 %v1447_v61  ;;  %2555 = vmatprep.mubr.msk.bf16.mxu1 %vm3061_vm0, %v3060_v1  ;;  %v3045_v61 = vld [vmem:[%s3755_s1 + $0x220] sm:$0xff]  }
  0x88   : > { %2716 = vmatpush3.bf16.msra.mxu0 %v3027_v18  ;;  %2699 = vmatprep.mubr.msk.bf16.mxu0 %vm3061_vm0, %v3060_v1  ;;  %v1648_v18 = vrot.slane %v1646_v58, 2  ;;  %v3700_v58 = vld [vmem:[%s3757_s3] ss:$0 sm:$0xff] }
  0x89   : > { %2572 = vmatpush3.bf16.msra.mxu1 %v3029_v62  ;;  %2717 = vmatprep.subr.bf16.mxu0 %v3060_v1  ;;  %v1651_v62 = vrot.slane %v1649_v59, 3 }
  0x8a   : > { %2573 = vmatprep.subr.bf16.mxu1 %v3060_v1 }
  0x8c   : > { %2718 = vmatpush3.bf16.msra.mxu0 %v3030_v63  ;;  %v1652_v63 = vor.u32 %v1651_v62, %v1648_v18 }
  0x8d   : > { %2574 = vmatpush3.bf16.msra.mxu1 %v3031_v16  ;;  %2719 = vmatprep.subr.bf16.mxu0 %v3060_v1  ;;  %v3047_v16 = vld [vmem:[%s3755_s1 + $0x228] sm:$0xff]  }
  0x8e   : > { %2556 = vmatmul.mubr.bf16.gmra.mrb[12].mxu1 %v640_v10  ;;  %2575 = vmatprep.subr.bf16.mxu1 %v3060_v1  ;;  %v1653_v2 = vsel %vm1609_vm6, %v1643_v56, %v1652_v63 }
  0x8f   : > { %2700 = vmatmul.mubr.bf16.gmra.mrb[12].mxu0 %v1449_v0  ;;  %2559 = vmatprep.mubr.msk.bf16.mxu1 %vm3061_vm0, %v3060_v1 }
  0x90   : > { %2703 = vmatprep.mubr.msk.bf16.mxu0 %vm3061_vm0, %v3060_v1  ;;  %2720 = vmatpush3.bf16.msra.mxu0 %v3032_v14  ;;  %v837_v14 = vsel %vm631_vm3, %v834_v55, %v836_v35 }
  0x91   : > { %2576 = vmatpush3.bf16.msra.mxu1 %v3034_v4  ;;  %2721 = vmatprep.subr.bf16.mxu0 %v3060_v1  ;;  %v3048_v4 = vld [vmem:[%s3755_s1 + $0x230] sm:$0xff]  }
  0x92   : > { %2577 = vmatprep.subr.bf16.mxu1 %v3060_v1 }
  0x94   : > { %2722 = vmatpush3.bf16.msra.mxu0 %v3035_v6 }
  0x95   : > { %2578 = vmatpush3.bf16.msra.mxu1 %v3036_v47  ;;  %2743 = vmatprep.subr.bf16.mxu0 %v3060_v1  ;;  %v1829_v47 = vsel %vm1820_vm5, %v1826_v34, %v1828_v9 }
  0x96   : > { %2560 = vmatmul.mubr.bf16.gmra.mrb[16].mxu1 %v639_v40  ;;  %2779 = vmatprep.subr.bf16.mxu1 %v3060_v1  ;;  %v3049_v40 = vld [vmem:[%s3142_s14 + $0x30] ss:$0 sps:$4 sm:$0x33]  }
  0x97   : > { %2704 = vmatmul.mubr.bf16.gmra.mrb[16].mxu0 %v1451_v7  ;;  %2579 = vmatprep.mubr.msk.bf16.mxu1 %vm3061_vm0, %v3060_v1  ;;  %v1655_v10 = vshrl.u32 %v3049_v40, 16  ;;  %v1658_v0 = vshll.u32 %v3049_v40, 16  ;;  %v1830_v11 = vrot.slane %v3049_v40, 3  ;;  %v2008_v40 = vld [vmem:[%s3695_s15 + $0x30] sm:$0xff] }
  0x98   : > { %2723 = vmatprep.mubr.msk.bf16.mxu0 %vm3061_vm0, %v3060_v1 }
  0x99   : > { %v1657_v36 = vrot.slane %v1655_v10, 2  ;;  %v1660_v5 = vrot.slane %v1658_v0, 3  ;;  %v1831_v12 = vsel %vm1820_vm5, %v1828_v9, %v1830_v11 }
  0x9b   : > { %v1661_v6 = vor.u32 %v1660_v5, %v1657_v36  ;;  %v2003_v5 = vld [vmem:[%s3695_s15 + $0x8] sm:$0xff] }
  0x9d   : > { %v1662_v8 = vsel %vm1609_vm6, %v1652_v63, %v1661_v6 }
  0x9e   : > { %2580 = vmatmul.mubr.bf16.vlgmr.msra.gmra.mrb[0].mxu1 %v831_v30 }
  0x9f   : > { %2724 = vmatmul.mubr.bf16.vlgmr.msra.gmra.mrb[0].mxu0 %v1626_v33  ;;  %2583 = vmatprep.mubr.msk.bf16.mxu1 %vm3061_vm0, %v3060_v1 }
  0xa0   : > { %2744 = vmatpush3.bf16.msra.mxu0 %v3039_v32  ;;  %2727 = vmatprep.mubr.msk.bf16.mxu0 %vm3061_vm0, %v3060_v1 }
  0xa1   : > { %2745 = vmatprep.subr.bf16.mxu0 %v3060_v1  ;;  %2787 = vmatpush3.bf16.msra.mxu1 %v3039_v32 }
  0xa2   : > { %2780 = vmatprep.subr.bf16.mxu1 %v3060_v1 }
  0xa4   : > { %2746 = vmatpush3.bf16.msra.mxu0 %v3040_v24 }
  0xa5   : > { %2747 = vmatprep.subr.bf16.mxu0 %v3060_v1  ;;  %2788 = vmatpush3.bf16.msra.mxu1 %v3040_v24 }
  0xa6   : > { %2584 = vmatmul.mubr.bf16.gmra.mrb[4].mxu1 %v833_v48  ;;  %2781 = vmatprep.subr.bf16.mxu1 %v3060_v1 }
  0xa7   : > { %2728 = vmatmul.mubr.bf16.gmra.mrb[4].mxu0 %v1635_v50  ;;  %2587 = vmatprep.mubr.msk.bf16.mxu1 %vm3061_vm0, %v3060_v1 }
  0xa8   : > { %2748 = vmatpush3.bf16.msra.mxu0 %v3042_v51  ;;  %2731 = vmatprep.mubr.msk.bf16.mxu0 %vm3061_vm0, %v3060_v1 }
  0xa9   : > { %2749 = vmatprep.subr.bf16.mxu0 %v3060_v1  ;;  %2789 = vmatpush3.bf16.msra.mxu1 %v3042_v51  ;;  %v3690_v51 = vld [vmem:[%s3756_s2] ss:$0 sm:$0xff] }
  0xaa   : > { %2782 = vmatprep.subr.bf16.mxu1 %v3060_v1 }
  0xac   : > { %2750 = vmatpush3.bf16.msra.mxu0 %v3044_v57 }
  0xad   : > { %2751 = vmatprep.subr.bf16.mxu0 %v3060_v1  ;;  %2790 = vmatpush3.bf16.msra.mxu1 %v3044_v57 }
  0xae   : > { %2588 = vmatmul.mubr.bf16.gmra.mrb[8].mxu1 %v835_v60  ;;  %2783 = vmatprep.subr.bf16.mxu1 %v3060_v1 }
  0xaf   : > { %2732 = vmatmul.mubr.bf16.gmra.mrb[8].mxu0 %v1644_v54  ;;  %2591 = vmatprep.mubr.msk.bf16.mxu1 %vm3061_vm0, %v3060_v1 }
  0xb0   : > { %2752 = vmatpush3.bf16.msra.mxu0 %v3045_v61  ;;  %2735 = vmatprep.mubr.msk.bf16.mxu0 %vm3061_vm0, %v3060_v1 }
  0xb1   : > { %2791 = vmatpush3.bf16.msra.mxu1 %v3045_v61  ;;  %2753 = vmatprep.subr.bf16.mxu0 %v3060_v1 }
  0xb2   : > { %2784 = vmatprep.subr.bf16.mxu1 %v3060_v1 }
  0xb4   : > { %2754 = vmatpush3.bf16.msra.mxu0 %v3047_v16 }
  0xb5   : > { %2792 = vmatpush3.bf16.msra.mxu1 %v3047_v16  ;;  %2755 = vmatprep.subr.bf16.mxu0 %v3060_v1  ;;  %v2002_v16 = vld [vmem:[%s3695_s15] sm:$0xff] }
  0xb6   : > { %2592 = vmatmul.mubr.bf16.gmra.mrb[12].mxu1 %v837_v14  ;;  %2785 = vmatprep.subr.bf16.mxu1 %v3060_v1 }
  0xb7   : > { %2736 = vmatmul.mubr.bf16.gmra.mrb[12].mxu0 %v1653_v2  ;;  %2595 = vmatprep.mubr.msk.bf16.mxu1 %vm3061_vm0, %v3060_v1 }
  0xb8   : > { %2739 = vmatprep.mubr.msk.bf16.mxu0 %vm3061_vm0, %v3060_v1  ;;  %2756 = vmatpush3.bf16.msra.mxu0 %v3048_v4 }
  0xb9   : > { %2793 = vmatpush3.bf16.msra.mxu1 %v3048_v4  ;;  %2757 = vmatprep.subr.bf16.mxu0 %v3060_v1  ;;  %v2009_v4 = vld [vmem:[%s3695_s15 + $0x38] sm:$0xff] }
  0xba   : > { %2786 = vmatprep.subr.bf16.mxu1 %v3060_v1 }
  0xbc   : > { %2758 = vmatpush3.bf16.msra.mxu0 %v3050_v15 }
  0xbd   : > { %2794 = vmatpush3.bf16.msra.mxu1 %v3050_v15 }
  0xbe   : > { %2596 = vmatmul.mubr.bf16.gmra.mrb[16].mxu1 %v836_v35 }
  0xbf   : > { %2740 = vmatmul.mubr.bf16.gmra.mrb[16].mxu0 %v1662_v8  ;;  %2771 = vmatprep.mubr.msk.bf16.mxu1 %vm3061_vm0, %v3060_v1 }
  0xc0   : > { %2759 = vmatprep.mubr.msk.bf16.mxu0 %vm3061_vm0, %v3060_v1 }
  0xc6   : > { %2772 = vmatmul.mubr.bf16.vlgmr.msra.gmra.mrb[20].mxu1 %v1829_v47 }
  0xc7   : > { %2760 = vmatmul.mubr.bf16.vlgmr.msra.gmra.mrb[0].mxu0 %v3467_v45  ;;  %2775 = vmatprep.mubr.msk.bf16.mxu1 %vm3061_vm0, %v3060_v1 }
  0xc8   : > { %2763 = vmatprep.mubr.msk.bf16.mxu0 %vm3061_vm0, %v3060_v1 }
  0xce   : > { %2776 = vmatmul.mubr.bf16.gmra.mrb[24].mxu1 %v1831_v12 }
  0xcf   : > { %2764 = vmatmul.mubr.bf16.gmra.mrb[4].mxu0 %v3456_v39 }
  0xd0   : > { %2767 = vmatprep.mubr.msk.bf16.mxu0 %vm3061_vm0, %v3060_v1 }
  0xd7   : > { %2768 = vmatmul.mubr.bf16.gmra.mrb[8].mxu0 %v3461_v42 }
 0x171   : > { %v925_v25 = vpop.f32.mrb[0].mxu1 }
 0x172   : > { %v2581_v34 = vpop.f32.mrb[1].mxu1 }
 0x173   : > { %v928_v45 = vpop.f32.mrb[2].mxu1 }
 0x174   : > { %v2582_v13 = vpop.f32.mrb[3].mxu1 }
 0x179   : > { %v3678_v17 = vpop.f32.mrb[4].mxu1 }
 0x17a   : > { %v2585_v7 = vpop.f32.mrb[5].mxu1 }
 0x17b   : > { %v3680_v19 = vpop.f32.mrb[6].mxu1 }
 0x17c   : > { %v2586_v20 = vpop.f32.mrb[7].mxu1 }
 0x181   : > { %v3682_v21 = vpop.f32.mrb[8].mxu1 }
 0x182   : > { %v2589_v22 = vpop.f32.mrb[9].mxu1 }
 0x183   : > { %v3684_v23 = vpop.f32.mrb[10].mxu1 }
 0x184   : > { %v2590_v39 = vpop.f32.mrb[11].mxu1 }
 0x189   : > { %v949_v26 = vpop.f32.mrb[12].mxu1 }
 0x18a   : > { %v1774_v1 = vpop.f32.mrb[12].mxu0  ;;  %v2593_v27 = vpop.f32.mrb[13].mxu1 }
 0x18b   : > { %v2801_v42 = vadd.f32 %v1774_v1, %v949_v26  ;;  %v2737_v28 = vpop.f32.mrb[13].mxu0  ;;  %v952_v29 = vpop.f32.mrb[14].mxu1  ;;  %v2010_v27 = vld [vmem:[%s3695_s15 + $0x40] sm:$0xff] }
 0x18c   : > { %v1777_v30 = vpop.f32.mrb[14].mxu0  ;;  %v2594_v31 = vpop.f32.mrb[15].mxu1 }
 0x18d   : > { %v2803_v33 = vadd.f32 %v1777_v30, %v952_v29  ;;  %v2738_v32 = vpop.f32.mrb[15].mxu0 }
 0x18e   : > { %v2011_v32 = vld [vmem:[%s3695_s15 + $0x48] sm:$0x3f] }
 0x191   : > { %v957_v37 = vpop.f32.mrb[16].mxu1 }
 0x192   : > { %v1782_v38 = vpop.f32.mrb[16].mxu0  ;;  %v2597_v43 = vpop.f32.mrb[17].mxu1 }
 0x193   : > { %v2805_v24 = vadd.f32 %v1782_v38, %v957_v37  ;;  %v2741_v44 = vpop.f32.mrb[17].mxu0  ;;  %v960_v3 = vpop.f32.mrb[18].mxu1  ;;  %v2005_v38 = vld [vmem:[%s3695_s15 + $0x18] sm:$0xff] }
 0x194   : > { %v1785_v46 = vpop.f32.mrb[18].mxu0  ;;  %v2598_v48 = vpop.f32.mrb[19].mxu1 }
 0x195   : > { %v2807_v49 = vadd.f32 %v1785_v46, %v960_v3  ;;  %v2742_v50 = vpop.f32.mrb[19].mxu0 }
 0x199   : > { %v1943_v52 = vpop.f32.mrb[20].mxu1 }
 0x19a   : > { %v1919_v53 = vpop.f32.mrb[0].mxu0  ;;  %v2802_v55 = vadd.f32 %v2801_v42, %v1943_v52  ;;  %v2773_v56 = vpop.f32.mrb[21].mxu1 }
 0x19b   : > { %v2795_v57 = vadd.f32 %v1919_v53, %v925_v25  ;;  %v2761_v59 = vpop.f32.mrb[1].mxu0  ;;  %v1946_v60 = vpop.f32.mrb[22].mxu1  ;;  %v2006_v56 = vld [vmem:[%s3695_s15 + $0x20] sm:$0xff] }
 0x19c   : > { %v1981_v41 = vmul.f32 %v2802_v55, %v3690_v51  ;;  %v1922_v54 = vpop.f32.mrb[2].mxu0  ;;  %v2804_v61 = vadd.f32 %v2803_v33, %v1946_v60  ;;  %v2774_v18 = vpop.f32.mrb[23].mxu1  ;;  %v2007_v60 = vld [vmem:[%s3695_s15 + $0x28] sm:$0xff] }
 0x19d   : > { %v1975_v62 = vmul.f32 %v2795_v57, %v3690_v51  ;;  %v2796_v35 = vadd.f32 %v1922_v54, %v928_v45  ;;  %v2762_v63 = vpop.f32.mrb[3].mxu0 }
 0x19e   : > { %v1998_v10 = vadd.f32 %v3700_v58, %v1981_v41  ;;  %v1982_v0 = vmul.f32 %v2804_v61, %v3690_v51 }
 0x19f   : > { %v1992_v14 = vadd.f32 %v3700_v58, %v1975_v62  ;;  %v1976_v2 = vmul.f32 %v2796_v35, %v3690_v51 }
 0x1a0   : > { %v2018_v36 = vadd.f32 %v2008_v40, %v1998_v10  ;;  %v1999_v6 = vadd.f32 %v3700_v58, %v1982_v0 }
 0x1a1   : > { %v2012_v15 = vadd.f32 %v2002_v16, %v1992_v14  ;;  %v1993_v8 = vadd.f32 %v3700_v58, %v1976_v2  ;;  %v1951_v9 = vpop.f32.mrb[24].mxu1 }
 0x1a2   : > { %2028 = vst [vmem:[%s3711_s21 + $0x30] sm:$0xff] %v2018_v36  ;;  %v2019_v47 = vadd.f32 %v2009_v4, %v1999_v6  ;;  %v1927_v11 = vpop.f32.mrb[4].mxu0  ;;  %v2806_v12 = vadd.f32 %v2805_v24, %v1951_v9  ;;  %v2777_v25 = vpop.f32.mrb[25].mxu1 }
 0x1a3   : > { %2022 = vst [vmem:[%s3711_s21] sm:$0xff] %v2012_v15  ;;  %v2013_v34 = vadd.f32 %v2003_v5, %v1993_v8  ;;  %v2797_v45 = vadd.f32 %v1927_v11, %v3678_v17  ;;  %v2765_v13 = vpop.f32.mrb[5].mxu0  ;;  %v1954_v7 = vpop.f32.mrb[26].mxu1  ;;  %v2004_v17 = vld [vmem:[%s3695_s15 + $0x10] sm:$0xff] }
 0x1a4   : > { %2029 = vst [vmem:[%s3711_s21 + $0x38] sm:$0xff] %v2019_v47  ;;  %v1983_v20 = vmul.f32 %v2806_v12, %v3690_v51  ;;  %v1930_v22 = vpop.f32.mrb[6].mxu0  ;;  %v2808_v39 = vadd.f32 %v2807_v49, %v1954_v7  ;;  %v2778_v26 = vpop.f32.mrb[27].mxu1 }
 0x1a5   : > { %2023 = vst [vmem:[%s3711_s21 + $0x8] sm:$0xff] %v2013_v34  ;;  %v1977_v1 = vmul.f32 %v2797_v45, %v3690_v51  ;;  %v2798_v42 = vadd.f32 %v1930_v22, %v3680_v19  ;;  %v2766_v28 = vpop.f32.mrb[7].mxu0 }
 0x1a6   : > { %v2000_v29 = vadd.f32 %v3700_v58, %v1983_v20  ;;  %v1984_v30 = vmul.f32 %v2808_v39, %v3690_v51 }
 0x1a7   : > { %v1994_v31 = vadd.f32 %v3700_v58, %v1977_v1  ;;  %v1978_v33 = vmul.f32 %v2798_v42, %v3690_v51 }
 0x1a8   : > { %v2020_v37 = vadd.f32 %v2010_v27, %v2000_v29  ;;  %v2001_v43 = vadd.f32 %v3700_v58, %v1984_v30 }
 0x1a9   : > { %v2014_v19 = vadd.f32 %v2004_v17, %v1994_v31  ;;  %v1995_v24 = vadd.f32 %v3700_v58, %v1978_v33 }
 0x1aa   : > { %2030 = vst [vmem:[%s3711_s21 + $0x40] sm:$0xff] %v2020_v37  ;;  %v2021_v44 = vadd.f32 %v2011_v32, %v2001_v43  ;;  %v1935_v3 = vpop.f32.mrb[8].mxu0 }
 0x1ab   : > { %2024 = vst [vmem:[%s3711_s21 + $0x10] sm:$0xff] %v2014_v19  ;;  %v2015_v46 = vadd.f32 %v2005_v38, %v1995_v24  ;;  %v2799_v48 = vadd.f32 %v1935_v3, %v3682_v21  ;;  %v2769_v49 = vpop.f32.mrb[9].mxu0 }
 0x1ac   : > { %2031 = vst [vmem:[%s3711_s21 + $0x48] sm:$0x3f] %v2021_v44  ;;  %v1938_v50 = vpop.f32.mrb[10].mxu0 }
 0x1ad   : > { %2025 = vst [vmem:[%s3711_s21 + $0x18] sm:$0xff] %v2015_v46  ;;  %v1979_v52 = vmul.f32 %v2799_v48, %v3690_v51  ;;  %v2800_v53 = vadd.f32 %v1938_v50, %v3684_v23  ;;  %v2770_v55 = vpop.f32.mrb[11].mxu0 }
 0x1af   : > { %v1996_v57 = vadd.f32 %v3700_v58, %v1979_v52  ;;  %v1980_v59 = vmul.f32 %v2800_v53, %v3690_v51 }
 0x1b1   : > { %v2016_v41 = vadd.f32 %v2006_v56, %v1996_v57  ;;  %v1997_v54 = vadd.f32 %v3700_v58, %v1980_v59 }
 0x1b3   : > { %2026 = vst [vmem:[%s3711_s21 + $0x20] sm:$0xff] %v2016_v41  ;;  %v2017_v21 = vadd.f32 %v2007_v60, %v1997_v54 }
 0x1b5   : > { %2027 = vst [vmem:[%s3711_s21 + $0x28] sm:$0xff] %v2017_v21 }
 0x1b6 PF: > { %s15_s18 = sadd.s32 1, %s3058_s18  }
 0x1b7   : > { %p12_p4 = scmp.ge.s32.totalorder %s15_s18, 4  }
 0x1b9   :  { %14 = sbr.rel (!%p12_p4) target bundleno = 1 (0x1), region = 81 }

</bundles_post_ra>
